<compile_context>
chip_gen: v5e
topology: v5e:2x2
jax: 0.10.0
libtpu: 0.0.40
codegen_flags: <defaults>
</compile_context>

<pallas_src>
import numpy as np
import jax
import jax.numpy as jnp
from jax.experimental import pallas as pl
from jax.experimental.pallas import tpu as pltpu

# ----------------------------------------------------------------------------
# Fixed representative configuration.
# ----------------------------------------------------------------------------
H = W = 16       # conv spatial size
HP = 24          # packed rows / sample: 1 top halo + 16 image + 1 bottom halo + 6 zero
WP = W + 2       # column-padded width of conv1's packed input
C_IN = 4         # input channels
C1 = 16          # conv1 output channels
C2 = 32          # conv2 output channels
HID = 64         # classifier hidden width
NCLS = 10        # classes


# ----------------------------------------------------------------------------
# Host-side weight relayouts (tiny; run once per call under jit).
# ----------------------------------------------------------------------------
def _banded_conv_weight(w_hwio, n_in_cols, in_col_offset, out_col_order):
    """Fold the 3 horizontal taps of a 3x3 conv into one banded
    (n_in_cols*Ci, G*Co) matrix per vertical tap kh.

    Output column `out_col_order[g]` of the conv lands in lane group g.  Horizontal
    zero padding is provided either by the column-padded packed input
    (in_col_offset=1) or by truncating the band at the image edge (in_col_offset=0).
    """
    _, _, ci, co = w_hwio.shape
    g_count = len(out_col_order)
    sel = np.zeros((3, n_in_cols, g_count), np.float32)
    for g, w_out in enumerate(out_col_order):
        for kw in range(3):
            x = w_out + kw - 1 + in_col_offset
            if 0 <= x < n_in_cols:
                sel[kw, x, g] = 1.0
    t = jnp.einsum("qxg,hqio->hxigo", sel, w_hwio)      # (kh, in_col, ci, g, co)
    return t.reshape(3, n_in_cols * ci, g_count * co)


def _fold_avgpool_flatten_fc1(fc1_w):
    """Compose AdaptiveAvgPool2d(7) on the 8x8 maxpooled map, the NCHW torch.flatten,
    and fc1 into one (8, 8*C2, HID) matrix indexed by (pooled row j, i*C2 + c)."""
    avg = np.zeros((8, 7), np.float32)                  # coeff of pooled row j in out a
    for a in range(7):
        avg[a, a] = 0.5
        avg[a + 1, a] = 0.5                             # window [a, a+2), weight 0.5
    w4 = fc1_w.reshape(C2, 7, 7, fc1_w.shape[-1])       # rows are NCHW-flat: (c, a, b)
    t = jnp.einsum("ja,ib,cabf->jicf", avg, avg, w4)    # (j, i, c, f)
    return t.reshape(8, 8 * C2, fc1_w.shape[-1])


# ----------------------------------------------------------------------------
# The fused kernel: conv1 -> conv2 -> maxpool -> (avgpool+flatten+fc1) -> fc2.
# ----------------------------------------------------------------------------
def vgg_kernel(x_ref, t1_ref, b1_ref, t2_ref, b2_ref, fc1_ref, fc1b_ref,
               fc2w_ref, fc2b_ref, o_ref):
    bf16 = jnp.bfloat16
    f32 = jnp.float32
    b = x_ref.shape[0]                                   # samples per grid step

    # ---- conv1 (3x3 SAME + bias + ReLU): 3 banded MXU dots over the packed slab ----
    x = x_ref[...].reshape(b * HP, WP * C_IN).astype(bf16)           # (b*24, 72)
    y1 = [jnp.dot(x, t1_ref[kh], preferred_element_type=f32)
          .reshape(b, HP, W * C1) for kh in range(3)]                # 3 x (b, 24, 256)
    # Vertical taps: output row h sums padded-input rows h, h+1, h+2.
    a1 = y1[0][:, 0:H, :] + y1[1][:, 1:H + 1, :] + y1[2][:, 2:H + 2, :]
    a1 = jnp.maximum(a1 + b1_ref[...], 0.0)                          # (b, 16, 256)

    # ---- conv2: same trick; column padding is folded into t2's band structure ------
    x2 = a1.reshape(b * H, W * C1).astype(bf16)                      # (b*16, 256)
    y2 = [jnp.dot(x2, t2_ref[kh], preferred_element_type=f32)
          .reshape(b, H, W * C2) for kh in range(3)]                 # 3 x (b, 16, 512)
    zrow = jnp.zeros((b, 1, W * C2), f32)
    a2 = (jnp.concatenate([zrow, y2[0][:, 0:H - 1, :]], axis=1)      # row h-1 tap
          + y2[1]                                                    # row h   tap
          + jnp.concatenate([y2[2][:, 1:H, :], zrow], axis=1))       # row h+1 tap
    a2 = jnp.maximum(a2 + b2_ref[...], 0.0)                          # (b, 16, 512)

    # ---- MaxPool 2x2 stride 2 -------------------------------------------------------
    # conv2's lanes are laid out [even output cols | odd output cols], so width
    # pooling is one aligned half-slab maximum; height pooling pairs adjacent rows.
    half = (W // 2) * C2                                             # 256
    wmax = jnp.maximum(a2[:, :, 0:half], a2[:, :, half:])            # (b, 16, 256)

    # ---- AdaptiveAvgPool2d(7) + NCHW flatten + fc1 (all folded into fc1_ref) --------
    acc = jnp.zeros((b, HID), f32)
    for j in range(H // 2):                                          # 8 pooled rows
        pooled_j = jnp.maximum(wmax[:, 2 * j, :], wmax[:, 2 * j + 1, :])   # (b, 256)
        acc = acc + jnp.dot(pooled_j.astype(bf16), fc1_ref[j],
                            preferred_element_type=f32)
    h = jnp.maximum(acc + fc1b_ref[...], 0.0)                        # (b, 64)

    # ---- fc2 ------------------------------------------------------------------------
    out = jnp.dot(h.astype(bf16), fc2w_ref[...], preferred_element_type=f32)
    o_ref[0] = out + fc2b_ref[...]                                   # (b, 10)


def vgg_forward_pallas(x_packed, t1, b1p, t2, b2p, fc1e, fc1b, fc2w, fc2b, block_n):
    n = x_packed.shape[0]
    assert n % block_n == 0, (n, block_n)
    g = n // block_n
    out = pl.pallas_call(
        vgg_kernel,
        out_shape=jax.ShapeDtypeStruct((g, block_n, NCLS), jnp.float32),
        grid=(g,),
        in_specs=[
            pl.BlockSpec((block_n, HP, WP * C_IN), lambda i: (i, 0, 0)),
            pl.BlockSpec(t1.shape, lambda i: (0, 0, 0)),
            pl.BlockSpec(b1p.shape, lambda i: (0, 0)),
            pl.BlockSpec(t2.shape, lambda i: (0, 0, 0)),
            pl.BlockSpec(b2p.shape, lambda i: (0, 0)),
            pl.BlockSpec(fc1e.shape, lambda i: (0, 0, 0)),
            pl.BlockSpec(fc1b.shape, lambda i: (0, 0)),
            pl.BlockSpec(fc2w.shape, lambda i: (0, 0)),
            pl.BlockSpec(fc2b.shape, lambda i: (0, 0)),
        ],
        out_specs=pl.BlockSpec((1, block_n, NCLS), lambda i: (i, 0, 0)),
        compiler_params=pltpu.CompilerParams(
            dimension_semantics=("parallel",),
            vmem_limit_bytes=32 * 1024 * 1024),
    )(x_packed, t1, b1p, t2, b2p, fc1e, fc1b, fc2w, fc2b)
    return out.reshape(n, NCLS)


# ----------------------------------------------------------------------------
# Parameters, full forward, pure-JAX reference.
# ----------------------------------------------------------------------------
def init_params(key):
    ks = jax.random.split(key, 8)
    f32 = jnp.float32
    return {
        "conv1_w": 0.10 * jax.random.normal(ks[0], (3, 3, C_IN, C1), f32),  # HWIO
        "conv1_b": 0.10 * jax.random.normal(ks[1], (C1,), f32),
        "conv2_w": 0.10 * jax.random.normal(ks[2], (3, 3, C1, C2), f32),
        "conv2_b": 0.10 * jax.random.normal(ks[3], (C2,), f32),
        "fc1_w": 0.02 * jax.random.normal(ks[4], (C2 * 7 * 7, HID), f32),   # NCHW rows
        "fc1_b": 0.02 * jax.random.normal(ks[5], (HID,), f32),
        "fc2_w": 0.05 * jax.random.normal(ks[6], (HID, NCLS), f32),
        "fc2_b": 0.05 * jax.random.normal(ks[7], (NCLS,), f32),
    }


@jax.jit
def vggnet_forward(x_nchw, p):
    n = x_nchw.shape[0]

    # Host-side input packing (tiny): NCHW -> NHWC, zero-pad (1 halo row top, 1 halo
    # row bottom + 6 extra zero rows so each sample occupies a sublane-aligned 24-row
    # slab; 1 halo column each side), then fold (W, Ci) into the lane axis.
    x = jnp.transpose(x_nchw, (0, 2, 3, 1))
    x = jnp.pad(x, ((0, 0), (1, HP - H - 1), (1, 1), (0, 0)))
    x_packed = x.reshape(n, HP, WP * C_IN)

    bf16 = jnp.bfloat16
    # Weight-only relayouts (activations untouched).
    t1 = _banded_conv_weight(p["conv1_w"], WP, 1, list(range(W))).astype(bf16)
    t2 = _banded_conv_weight(p["conv2_w"], W, 0,
                             [(g % 8) * 2 + g // 8 for g in range(W)]).astype(bf16)
    b1p = jnp.tile(p["conv1_b"], (W,)).reshape(1, W * C1)
    b2p = jnp.tile(p["conv2_b"], (W,)).reshape(1, W * C2)
    fc1e = _fold_avgpool_flatten_fc1(p["fc1_w"]).astype(bf16)
    fc1b = p["fc1_b"].reshape(1, HID)
    fc2w = p["fc2_w"].astype(bf16)
    fc2b = p["fc2_b"].reshape(1, NCLS)

    # >=2 grid steps keeps both v7x TensorCores busy; on single-TC parts (v5e/v6e)
    # block_n = n (a single step) would amortize per-step overhead best.
    block_n = n // 2 if (n >= 2 and n % 2 == 0) else n
    return vgg_forward_pallas(x_packed, t1, b1p, t2, b2p, fc1e, fc1b, fc2w, fc2b,
                              block_n)


def ref_forward(x_nchw, p):
    x = jnp.transpose(x_nchw, (0, 2, 3, 1))

    def conv(x, w, b):
        y = jax.lax.conv_general_dilated(
            x, w, window_strides=(1, 1), padding="SAME",
            dimension_numbers=("NHWC", "HWIO", "NHWC"))
        return jnp.maximum(y + b, 0.0)

    x = conv(x, p["conv1_w"], p["conv1_b"])
    x = conv(x, p["conv2_w"], p["conv2_b"])
    x = jax.lax.reduce_window(x, -jnp.inf, jax.lax.max,
                              (1, 2, 2, 1), (1, 2, 2, 1), "VALID")
    x = (x[:, 0:7] + x[:, 1:8]) * 0.5                    # AdaptiveAvgPool2d(7) on 8x8
    x = (x[:, :, 0:7] + x[:, :, 1:8]) * 0.5
    x = jnp.transpose(x, (0, 3, 1, 2)).reshape(x.shape[0], -1)   # torch.flatten order
    h = jnp.maximum(x @ p["fc1_w"] + p["fc1_b"], 0.0)
    return h @ p["fc2_w"] + p["fc2_b"]


if __name__ == "__main__":
    key = jax.random.PRNGKey(0)
    k_x, k_p = jax.random.split(key)
    x = jax.random.normal(k_x, (2, C_IN, H, W), jnp.float32)     # NCHW input
    params = init_params(k_p)

    out = jax.block_until_ready(vggnet_forward(x, params))
    ref = jax.block_until_ready(ref_forward(x, params))

    assert out.shape == (2, NCLS), out.shape
    max_err = float(jnp.max(jnp.abs(out - ref)))
    assert max_err < 5e-2, f"mismatch vs reference: {max_err}"

    print("KERNEL_OK")
</pallas_src>

<mosaic_0001>
module attributes {stable_mosaic.version = 11 : i64} {
  func.func @vgg_kernel(%arg0: i32, %arg1: memref<1x24x72xf32, #tpu.memory_space<vmem>>, %arg2: memref<3x72x256xbf16, #tpu.memory_space<vmem>>, %arg3: memref<1x256xf32, #tpu.memory_space<vmem>>, %arg4: memref<3x256x512xbf16, #tpu.memory_space<vmem>>, %arg5: memref<1x512xf32, #tpu.memory_space<vmem>>, %arg6: memref<8x256x64xbf16, #tpu.memory_space<vmem>>, %arg7: memref<1x64xf32, #tpu.memory_space<vmem>>, %arg8: memref<64x10xbf16, #tpu.memory_space<vmem>>, %arg9: memref<1x10xf32, #tpu.memory_space<vmem>>, %arg10: memref<1x1x10xf32, #tpu.memory_space<vmem>>) attributes {dimension_semantics = [#tpu.dimension_semantics<parallel>], iteration_bounds = array<i64: 2>, scalar_prefetch = 0 : i64, scratch_operands = 0 : i64, tpu.core_type = #tpu.core_type<tc>, window_params = [{transform_indices = @transform_0, window_bounds = array<i64: 1, 24, 72>}, {pipeline_mode = #tpu.pipeline_mode<synchronous>, transform_indices = @transform_1, window_bounds = array<i64: 3, 72, 256>}, {pipeline_mode = #tpu.pipeline_mode<synchronous>, transform_indices = @transform_2, window_bounds = array<i64: 1, 256>}, {pipeline_mode = #tpu.pipeline_mode<synchronous>, transform_indices = @transform_3, window_bounds = array<i64: 3, 256, 512>}, {pipeline_mode = #tpu.pipeline_mode<synchronous>, transform_indices = @transform_4, window_bounds = array<i64: 1, 512>}, {pipeline_mode = #tpu.pipeline_mode<synchronous>, transform_indices = @transform_5, window_bounds = array<i64: 8, 256, 64>}, {pipeline_mode = #tpu.pipeline_mode<synchronous>, transform_indices = @transform_6, window_bounds = array<i64: 1, 64>}, {pipeline_mode = #tpu.pipeline_mode<synchronous>, transform_indices = @transform_7, window_bounds = array<i64: 64, 10>}, {pipeline_mode = #tpu.pipeline_mode<synchronous>, transform_indices = @transform_8, window_bounds = array<i64: 1, 10>}, {transform_indices = @transform_9, window_bounds = array<i64: 1, 1, 10>}]} {
    %c0 = arith.constant 0 : index
    %c0_0 = arith.constant 0 : index
    %c0_1 = arith.constant 0 : index
    %0 = vector.load %arg1[%c0, %c0_0, %c0_1] : memref<1x24x72xf32, #tpu.memory_space<vmem>>, vector<1x24x72xf32>
    %1 = vector.shape_cast %0 : vector<1x24x72xf32> to vector<24x72xf32>
    %2 = arith.truncf %1 : vector<24x72xf32> to vector<24x72xbf16>
    %c0_2 = arith.constant 0 : index
    %c0_3 = arith.constant 0 : index
    %c0_4 = arith.constant 0 : index
    %3 = vector.load %arg2[%c0_2, %c0_3, %c0_4] : memref<3x72x256xbf16, #tpu.memory_space<vmem>>, vector<1x72x256xbf16>
    %4 = vector.shape_cast %3 : vector<1x72x256xbf16> to vector<72x256xbf16>
    %cst = arith.constant dense<0.000000e+00> : vector<24x256xf32>
    %5 = tpu.matmul %2, %4, %cst {dimension_numbers = #tpu.dot_dimension_numbers<[1], [0], [0], [1], [0, 0, 1, 1], [], []>} : vector<24x72xbf16>, vector<72x256xbf16>, vector<24x256xf32> -> vector<24x256xf32>
    %6 = vector.shape_cast %5 : vector<24x256xf32> to vector<1x24x256xf32>
    %c1 = arith.constant 1 : index
    %c0_5 = arith.constant 0 : index
    %c0_6 = arith.constant 0 : index
    %7 = vector.load %arg2[%c1, %c0_5, %c0_6] : memref<3x72x256xbf16, #tpu.memory_space<vmem>>, vector<1x72x256xbf16>
    %8 = vector.shape_cast %7 : vector<1x72x256xbf16> to vector<72x256xbf16>
    %cst_7 = arith.constant dense<0.000000e+00> : vector<24x256xf32>
    %9 = tpu.matmul %2, %8, %cst_7 {dimension_numbers = #tpu.dot_dimension_numbers<[1], [0], [0], [1], [0, 0, 1, 1], [], []>} : vector<24x72xbf16>, vector<72x256xbf16>, vector<24x256xf32> -> vector<24x256xf32>
    %10 = vector.shape_cast %9 : vector<24x256xf32> to vector<1x24x256xf32>
    %c2 = arith.constant 2 : index
    %c0_8 = arith.constant 0 : index
    %c0_9 = arith.constant 0 : index
    %11 = vector.load %arg2[%c2, %c0_8, %c0_9] : memref<3x72x256xbf16, #tpu.memory_space<vmem>>, vector<1x72x256xbf16>
    %12 = vector.shape_cast %11 : vector<1x72x256xbf16> to vector<72x256xbf16>
    %cst_10 = arith.constant dense<0.000000e+00> : vector<24x256xf32>
    %13 = tpu.matmul %2, %12, %cst_10 {dimension_numbers = #tpu.dot_dimension_numbers<[1], [0], [0], [1], [0, 0, 1, 1], [], []>} : vector<24x72xbf16>, vector<72x256xbf16>, vector<24x256xf32> -> vector<24x256xf32>
    %14 = vector.shape_cast %13 : vector<24x256xf32> to vector<1x24x256xf32>
    %15 = vector.extract_strided_slice %6 {offsets = [0, 0, 0], sizes = [1, 16, 256], strides = [1, 1, 1]} : vector<1x24x256xf32> to vector<1x16x256xf32>
    %16 = vector.extract_strided_slice %10 {offsets = [0, 1, 0], sizes = [1, 16, 256], strides = [1, 1, 1]} : vector<1x24x256xf32> to vector<1x16x256xf32>
    %17 = arith.addf %15, %16 : vector<1x16x256xf32>
    %18 = vector.extract_strided_slice %14 {offsets = [0, 2, 0], sizes = [1, 16, 256], strides = [1, 1, 1]} : vector<1x24x256xf32> to vector<1x16x256xf32>
    %19 = arith.addf %17, %18 : vector<1x16x256xf32>
    %c0_11 = arith.constant 0 : index
    %c0_12 = arith.constant 0 : index
    %20 = vector.load %arg3[%c0_11, %c0_12] : memref<1x256xf32, #tpu.memory_space<vmem>>, vector<1x256xf32>
    %21 = vector.shape_cast %20 : vector<1x256xf32> to vector<1x1x256xf32>
    %22 = vector.broadcast %21 : vector<1x1x256xf32> to vector<1x16x256xf32>
    %23 = arith.addf %19, %22 : vector<1x16x256xf32>
    %cst_13 = arith.constant 0.000000e+00 : f32
    %24 = vector.broadcast %cst_13 : f32 to vector<1x16x256xf32>
    %25 = arith.maximumf %23, %24 : vector<1x16x256xf32>
    %26 = vector.shape_cast %25 : vector<1x16x256xf32> to vector<16x256xf32>
    %27 = arith.truncf %26 : vector<16x256xf32> to vector<16x256xbf16>
    %c0_14 = arith.constant 0 : index
    %c0_15 = arith.constant 0 : index
    %c0_16 = arith.constant 0 : index
    %28 = vector.load %arg4[%c0_14, %c0_15, %c0_16] : memref<3x256x512xbf16, #tpu.memory_space<vmem>>, vector<1x256x512xbf16>
    %29 = vector.shape_cast %28 : vector<1x256x512xbf16> to vector<256x512xbf16>
    %cst_17 = arith.constant dense<0.000000e+00> : vector<16x512xf32>
    %30 = tpu.matmul %27, %29, %cst_17 {dimension_numbers = #tpu.dot_dimension_numbers<[1], [0], [0], [1], [0, 0, 1, 1], [], []>} : vector<16x256xbf16>, vector<256x512xbf16>, vector<16x512xf32> -> vector<16x512xf32>
    %31 = vector.shape_cast %30 : vector<16x512xf32> to vector<1x16x512xf32>
    %c1_18 = arith.constant 1 : index
    %c0_19 = arith.constant 0 : index
    %c0_20 = arith.constant 0 : index
    %32 = vector.load %arg4[%c1_18, %c0_19, %c0_20] : memref<3x256x512xbf16, #tpu.memory_space<vmem>>, vector<1x256x512xbf16>
    %33 = vector.shape_cast %32 : vector<1x256x512xbf16> to vector<256x512xbf16>
    %cst_21 = arith.constant dense<0.000000e+00> : vector<16x512xf32>
    %34 = tpu.matmul %27, %33, %cst_21 {dimension_numbers = #tpu.dot_dimension_numbers<[1], [0], [0], [1], [0, 0, 1, 1], [], []>} : vector<16x256xbf16>, vector<256x512xbf16>, vector<16x512xf32> -> vector<16x512xf32>
    %35 = vector.shape_cast %34 : vector<16x512xf32> to vector<1x16x512xf32>
    %c2_22 = arith.constant 2 : index
    %c0_23 = arith.constant 0 : index
    %c0_24 = arith.constant 0 : index
    %36 = vector.load %arg4[%c2_22, %c0_23, %c0_24] : memref<3x256x512xbf16, #tpu.memory_space<vmem>>, vector<1x256x512xbf16>
    %37 = vector.shape_cast %36 : vector<1x256x512xbf16> to vector<256x512xbf16>
    %cst_25 = arith.constant dense<0.000000e+00> : vector<16x512xf32>
    %38 = tpu.matmul %27, %37, %cst_25 {dimension_numbers = #tpu.dot_dimension_numbers<[1], [0], [0], [1], [0, 0, 1, 1], [], []>} : vector<16x256xbf16>, vector<256x512xbf16>, vector<16x512xf32> -> vector<16x512xf32>
    %39 = vector.shape_cast %38 : vector<16x512xf32> to vector<1x16x512xf32>
    %cst_26 = arith.constant 0.000000e+00 : f32
    %40 = vector.broadcast %cst_26 : f32 to vector<1x1x512xf32>
    %41 = vector.extract_strided_slice %31 {offsets = [0, 0, 0], sizes = [1, 15, 512], strides = [1, 1, 1]} : vector<1x16x512xf32> to vector<1x15x512xf32>
    %42 = tpu.concatenate %40, %41 in 1 : vector<1x1x512xf32>, vector<1x15x512xf32> -> vector<1x16x512xf32>
    %43 = arith.addf %42, %35 : vector<1x16x512xf32>
    %44 = vector.extract_strided_slice %39 {offsets = [0, 1, 0], sizes = [1, 15, 512], strides = [1, 1, 1]} : vector<1x16x512xf32> to vector<1x15x512xf32>
    %45 = tpu.concatenate %44, %40 in 1 : vector<1x15x512xf32>, vector<1x1x512xf32> -> vector<1x16x512xf32>
    %46 = arith.addf %43, %45 : vector<1x16x512xf32>
    %c0_27 = arith.constant 0 : index
    %c0_28 = arith.constant 0 : index
    %47 = vector.load %arg5[%c0_27, %c0_28] : memref<1x512xf32, #tpu.memory_space<vmem>>, vector<1x512xf32>
    %48 = vector.shape_cast %47 : vector<1x512xf32> to vector<1x1x512xf32>
    %49 = vector.broadcast %48 : vector<1x1x512xf32> to vector<1x16x512xf32>
    %50 = arith.addf %46, %49 : vector<1x16x512xf32>
    %cst_29 = arith.constant 0.000000e+00 : f32
    %51 = vector.broadcast %cst_29 : f32 to vector<1x16x512xf32>
    %52 = arith.maximumf %50, %51 : vector<1x16x512xf32>
    %53 = vector.extract_strided_slice %52 {offsets = [0, 0, 0], sizes = [1, 16, 256], strides = [1, 1, 1]} : vector<1x16x512xf32> to vector<1x16x256xf32>
    %54 = vector.extract_strided_slice %52 {offsets = [0, 0, 256], sizes = [1, 16, 256], strides = [1, 1, 1]} : vector<1x16x512xf32> to vector<1x16x256xf32>
    %55 = arith.maximumf %53, %54 : vector<1x16x256xf32>
    %cst_30 = arith.constant 0.000000e+00 : f32
    %56 = vector.broadcast %cst_30 : f32 to vector<1x64xf32>
    %57 = vector.extract_strided_slice %55 {offsets = [0, 0, 0], sizes = [1, 1, 256], strides = [1, 1, 1]} : vector<1x16x256xf32> to vector<1x1x256xf32>
    %58 = vector.shape_cast %57 : vector<1x1x256xf32> to vector<1x256xf32>
    %59 = vector.extract_strided_slice %55 {offsets = [0, 1, 0], sizes = [1, 1, 256], strides = [1, 1, 1]} : vector<1x16x256xf32> to vector<1x1x256xf32>
    %60 = vector.shape_cast %59 : vector<1x1x256xf32> to vector<1x256xf32>
    %61 = arith.maximumf %58, %60 : vector<1x256xf32>
    %62 = arith.truncf %61 : vector<1x256xf32> to vector<1x256xbf16>
    %c0_31 = arith.constant 0 : index
    %c0_32 = arith.constant 0 : index
    %c0_33 = arith.constant 0 : index
    %63 = vector.load %arg6[%c0_31, %c0_32, %c0_33] : memref<8x256x64xbf16, #tpu.memory_space<vmem>>, vector<1x256x64xbf16>
    %64 = vector.shape_cast %63 : vector<1x256x64xbf16> to vector<256x64xbf16>
    %cst_34 = arith.constant dense<0.000000e+00> : vector<1x64xf32>
    %65 = tpu.matmul %62, %64, %cst_34 {dimension_numbers = #tpu.dot_dimension_numbers<[1], [0], [0], [1], [0, 0, 1, 1], [], []>} : vector<1x256xbf16>, vector<256x64xbf16>, vector<1x64xf32> -> vector<1x64xf32>
    %66 = arith.addf %56, %65 : vector<1x64xf32>
    %67 = vector.extract_strided_slice %55 {offsets = [0, 2, 0], sizes = [1, 1, 256], strides = [1, 1, 1]} : vector<1x16x256xf32> to vector<1x1x256xf32>
    %68 = vector.shape_cast %67 : vector<1x1x256xf32> to vector<1x256xf32>
    %69 = vector.extract_strided_slice %55 {offsets = [0, 3, 0], sizes = [1, 1, 256], strides = [1, 1, 1]} : vector<1x16x256xf32> to vector<1x1x256xf32>
    %70 = vector.shape_cast %69 : vector<1x1x256xf32> to vector<1x256xf32>
    %71 = arith.maximumf %68, %70 : vector<1x256xf32>
    %72 = arith.truncf %71 : vector<1x256xf32> to vector<1x256xbf16>
    %c1_35 = arith.constant 1 : index
    %c0_36 = arith.constant 0 : index
    %c0_37 = arith.constant 0 : index
    %73 = vector.load %arg6[%c1_35, %c0_36, %c0_37] : memref<8x256x64xbf16, #tpu.memory_space<vmem>>, vector<1x256x64xbf16>
    %74 = vector.shape_cast %73 : vector<1x256x64xbf16> to vector<256x64xbf16>
    %cst_38 = arith.constant dense<0.000000e+00> : vector<1x64xf32>
    %75 = tpu.matmul %72, %74, %cst_38 {dimension_numbers = #tpu.dot_dimension_numbers<[1], [0], [0], [1], [0, 0, 1, 1], [], []>} : vector<1x256xbf16>, vector<256x64xbf16>, vector<1x64xf32> -> vector<1x64xf32>
    %76 = arith.addf %66, %75 : vector<1x64xf32>
    %77 = vector.extract_strided_slice %55 {offsets = [0, 4, 0], sizes = [1, 1, 256], strides = [1, 1, 1]} : vector<1x16x256xf32> to vector<1x1x256xf32>
    %78 = vector.shape_cast %77 : vector<1x1x256xf32> to vector<1x256xf32>
    %79 = vector.extract_strided_slice %55 {offsets = [0, 5, 0], sizes = [1, 1, 256], strides = [1, 1, 1]} : vector<1x16x256xf32> to vector<1x1x256xf32>
    %80 = vector.shape_cast %79 : vector<1x1x256xf32> to vector<1x256xf32>
    %81 = arith.maximumf %78, %80 : vector<1x256xf32>
    %82 = arith.truncf %81 : vector<1x256xf32> to vector<1x256xbf16>
    %c2_39 = arith.constant 2 : index
    %c0_40 = arith.constant 0 : index
    %c0_41 = arith.constant 0 : index
    %83 = vector.load %arg6[%c2_39, %c0_40, %c0_41] : memref<8x256x64xbf16, #tpu.memory_space<vmem>>, vector<1x256x64xbf16>
    %84 = vector.shape_cast %83 : vector<1x256x64xbf16> to vector<256x64xbf16>
    %cst_42 = arith.constant dense<0.000000e+00> : vector<1x64xf32>
    %85 = tpu.matmul %82, %84, %cst_42 {dimension_numbers = #tpu.dot_dimension_numbers<[1], [0], [0], [1], [0, 0, 1, 1], [], []>} : vector<1x256xbf16>, vector<256x64xbf16>, vector<1x64xf32> -> vector<1x64xf32>
    %86 = arith.addf %76, %85 : vector<1x64xf32>
    %87 = vector.extract_strided_slice %55 {offsets = [0, 6, 0], sizes = [1, 1, 256], strides = [1, 1, 1]} : vector<1x16x256xf32> to vector<1x1x256xf32>
    %88 = vector.shape_cast %87 : vector<1x1x256xf32> to vector<1x256xf32>
    %89 = vector.extract_strided_slice %55 {offsets = [0, 7, 0], sizes = [1, 1, 256], strides = [1, 1, 1]} : vector<1x16x256xf32> to vector<1x1x256xf32>
    %90 = vector.shape_cast %89 : vector<1x1x256xf32> to vector<1x256xf32>
    %91 = arith.maximumf %88, %90 : vector<1x256xf32>
    %92 = arith.truncf %91 : vector<1x256xf32> to vector<1x256xbf16>
    %c3 = arith.constant 3 : index
    %c0_43 = arith.constant 0 : index
    %c0_44 = arith.constant 0 : index
    %93 = vector.load %arg6[%c3, %c0_43, %c0_44] : memref<8x256x64xbf16, #tpu.memory_space<vmem>>, vector<1x256x64xbf16>
    %94 = vector.shape_cast %93 : vector<1x256x64xbf16> to vector<256x64xbf16>
    %cst_45 = arith.constant dense<0.000000e+00> : vector<1x64xf32>
    %95 = tpu.matmul %92, %94, %cst_45 {dimension_numbers = #tpu.dot_dimension_numbers<[1], [0], [0], [1], [0, 0, 1, 1], [], []>} : vector<1x256xbf16>, vector<256x64xbf16>, vector<1x64xf32> -> vector<1x64xf32>
    %96 = arith.addf %86, %95 : vector<1x64xf32>
    %97 = vector.extract_strided_slice %55 {offsets = [0, 8, 0], sizes = [1, 1, 256], strides = [1, 1, 1]} : vector<1x16x256xf32> to vector<1x1x256xf32>
    %98 = vector.shape_cast %97 : vector<1x1x256xf32> to vector<1x256xf32>
    %99 = vector.extract_strided_slice %55 {offsets = [0, 9, 0], sizes = [1, 1, 256], strides = [1, 1, 1]} : vector<1x16x256xf32> to vector<1x1x256xf32>
    %100 = vector.shape_cast %99 : vector<1x1x256xf32> to vector<1x256xf32>
    %101 = arith.maximumf %98, %100 : vector<1x256xf32>
    %102 = arith.truncf %101 : vector<1x256xf32> to vector<1x256xbf16>
    %c4 = arith.constant 4 : index
    %c0_46 = arith.constant 0 : index
    %c0_47 = arith.constant 0 : index
    %103 = vector.load %arg6[%c4, %c0_46, %c0_47] : memref<8x256x64xbf16, #tpu.memory_space<vmem>>, vector<1x256x64xbf16>
    %104 = vector.shape_cast %103 : vector<1x256x64xbf16> to vector<256x64xbf16>
    %cst_48 = arith.constant dense<0.000000e+00> : vector<1x64xf32>
    %105 = tpu.matmul %102, %104, %cst_48 {dimension_numbers = #tpu.dot_dimension_numbers<[1], [0], [0], [1], [0, 0, 1, 1], [], []>} : vector<1x256xbf16>, vector<256x64xbf16>, vector<1x64xf32> -> vector<1x64xf32>
    %106 = arith.addf %96, %105 : vector<1x64xf32>
    %107 = vector.extract_strided_slice %55 {offsets = [0, 10, 0], sizes = [1, 1, 256], strides = [1, 1, 1]} : vector<1x16x256xf32> to vector<1x1x256xf32>
    %108 = vector.shape_cast %107 : vector<1x1x256xf32> to vector<1x256xf32>
    %109 = vector.extract_strided_slice %55 {offsets = [0, 11, 0], sizes = [1, 1, 256], strides = [1, 1, 1]} : vector<1x16x256xf32> to vector<1x1x256xf32>
    %110 = vector.shape_cast %109 : vector<1x1x256xf32> to vector<1x256xf32>
    %111 = arith.maximumf %108, %110 : vector<1x256xf32>
    %112 = arith.truncf %111 : vector<1x256xf32> to vector<1x256xbf16>
    %c5 = arith.constant 5 : index
    %c0_49 = arith.constant 0 : index
    %c0_50 = arith.constant 0 : index
    %113 = vector.load %arg6[%c5, %c0_49, %c0_50] : memref<8x256x64xbf16, #tpu.memory_space<vmem>>, vector<1x256x64xbf16>
    %114 = vector.shape_cast %113 : vector<1x256x64xbf16> to vector<256x64xbf16>
    %cst_51 = arith.constant dense<0.000000e+00> : vector<1x64xf32>
    %115 = tpu.matmul %112, %114, %cst_51 {dimension_numbers = #tpu.dot_dimension_numbers<[1], [0], [0], [1], [0, 0, 1, 1], [], []>} : vector<1x256xbf16>, vector<256x64xbf16>, vector<1x64xf32> -> vector<1x64xf32>
    %116 = arith.addf %106, %115 : vector<1x64xf32>
    %117 = vector.extract_strided_slice %55 {offsets = [0, 12, 0], sizes = [1, 1, 256], strides = [1, 1, 1]} : vector<1x16x256xf32> to vector<1x1x256xf32>
    %118 = vector.shape_cast %117 : vector<1x1x256xf32> to vector<1x256xf32>
    %119 = vector.extract_strided_slice %55 {offsets = [0, 13, 0], sizes = [1, 1, 256], strides = [1, 1, 1]} : vector<1x16x256xf32> to vector<1x1x256xf32>
    %120 = vector.shape_cast %119 : vector<1x1x256xf32> to vector<1x256xf32>
    %121 = arith.maximumf %118, %120 : vector<1x256xf32>
    %122 = arith.truncf %121 : vector<1x256xf32> to vector<1x256xbf16>
    %c6 = arith.constant 6 : index
    %c0_52 = arith.constant 0 : index
    %c0_53 = arith.constant 0 : index
    %123 = vector.load %arg6[%c6, %c0_52, %c0_53] : memref<8x256x64xbf16, #tpu.memory_space<vmem>>, vector<1x256x64xbf16>
    %124 = vector.shape_cast %123 : vector<1x256x64xbf16> to vector<256x64xbf16>
    %cst_54 = arith.constant dense<0.000000e+00> : vector<1x64xf32>
    %125 = tpu.matmul %122, %124, %cst_54 {dimension_numbers = #tpu.dot_dimension_numbers<[1], [0], [0], [1], [0, 0, 1, 1], [], []>} : vector<1x256xbf16>, vector<256x64xbf16>, vector<1x64xf32> -> vector<1x64xf32>
    %126 = arith.addf %116, %125 : vector<1x64xf32>
    %127 = vector.extract_strided_slice %55 {offsets = [0, 14, 0], sizes = [1, 1, 256], strides = [1, 1, 1]} : vector<1x16x256xf32> to vector<1x1x256xf32>
    %128 = vector.shape_cast %127 : vector<1x1x256xf32> to vector<1x256xf32>
    %129 = vector.extract_strided_slice %55 {offsets = [0, 15, 0], sizes = [1, 1, 256], strides = [1, 1, 1]} : vector<1x16x256xf32> to vector<1x1x256xf32>
    %130 = vector.shape_cast %129 : vector<1x1x256xf32> to vector<1x256xf32>
    %131 = arith.maximumf %128, %130 : vector<1x256xf32>
    %132 = arith.truncf %131 : vector<1x256xf32> to vector<1x256xbf16>
    %c7 = arith.constant 7 : index
    %c0_55 = arith.constant 0 : index
    %c0_56 = arith.constant 0 : index
    %133 = vector.load %arg6[%c7, %c0_55, %c0_56] : memref<8x256x64xbf16, #tpu.memory_space<vmem>>, vector<1x256x64xbf16>
    %134 = vector.shape_cast %133 : vector<1x256x64xbf16> to vector<256x64xbf16>
    %cst_57 = arith.constant dense<0.000000e+00> : vector<1x64xf32>
    %135 = tpu.matmul %132, %134, %cst_57 {dimension_numbers = #tpu.dot_dimension_numbers<[1], [0], [0], [1], [0, 0, 1, 1], [], []>} : vector<1x256xbf16>, vector<256x64xbf16>, vector<1x64xf32> -> vector<1x64xf32>
    %136 = arith.addf %126, %135 : vector<1x64xf32>
    %c0_58 = arith.constant 0 : index
    %c0_59 = arith.constant 0 : index
    %137 = vector.load %arg7[%c0_58, %c0_59] : memref<1x64xf32, #tpu.memory_space<vmem>>, vector<1x64xf32>
    %138 = arith.addf %136, %137 : vector<1x64xf32>
    %cst_60 = arith.constant 0.000000e+00 : f32
    %139 = vector.broadcast %cst_60 : f32 to vector<1x64xf32>
    %140 = arith.maximumf %138, %139 : vector<1x64xf32>
    %141 = arith.truncf %140 : vector<1x64xf32> to vector<1x64xbf16>
    %c0_61 = arith.constant 0 : index
    %c0_62 = arith.constant 0 : index
    %142 = vector.load %arg8[%c0_61, %c0_62] : memref<64x10xbf16, #tpu.memory_space<vmem>>, vector<64x10xbf16>
    %cst_63 = arith.constant dense<0.000000e+00> : vector<1x10xf32>
    %143 = tpu.matmul %141, %142, %cst_63 {dimension_numbers = #tpu.dot_dimension_numbers<[1], [0], [0], [1], [0, 0, 1, 1], [], []>} : vector<1x64xbf16>, vector<64x10xbf16>, vector<1x10xf32> -> vector<1x10xf32>
    %c0_64 = arith.constant 0 : index
    %c0_65 = arith.constant 0 : index
    %144 = vector.load %arg9[%c0_64, %c0_65] : memref<1x10xf32, #tpu.memory_space<vmem>>, vector<1x10xf32>
    %145 = arith.addf %143, %144 : vector<1x10xf32>
    %c0_66 = arith.constant 0 : index
    %c0_67 = arith.constant 0 : index
    %c0_68 = arith.constant 0 : index
    %146 = vector.load %arg10[%c0_66, %c0_67, %c0_68] : memref<1x1x10xf32, #tpu.memory_space<vmem>>, vector<1x1x10xf32>
    %147 = vector.shape_cast %146 : vector<1x1x10xf32> to vector<1x10xf32>
    %148 = vector.shape_cast %145 : vector<1x10xf32> to vector<1x1x10xf32>
    tpu.vector_store %arg10[%c0_66, %c0_67, %c0_68], %148 {strides = array<i32>} : memref<1x1x10xf32, #tpu.memory_space<vmem>>, vector<1x1x10xf32>,
    return
  }
  func.func @transform_0(%arg0: i32) -> (i32, i32, i32) {
    %c0_i32 = arith.constant 0 : i32
    %c0_i32_0 = arith.constant 0 : i32
    %c0_i32_1 = arith.constant 0 : i32
    return %arg0, %c0_i32, %c0_i32_0 : i32, i32, i32
  }
  func.func @transform_1(%arg0: i32) -> (i32, i32, i32) {
    %c0_i32 = arith.constant 0 : i32
    %c0_i32_0 = arith.constant 0 : i32
    %c0_i32_1 = arith.constant 0 : i32
    %c0_i32_2 = arith.constant 0 : i32
    return %c0_i32, %c0_i32_0, %c0_i32_1 : i32, i32, i32
  }
  func.func @transform_2(%arg0: i32) -> (i32, i32) {
    %c0_i32 = arith.constant 0 : i32
    %c0_i32_0 = arith.constant 0 : i32
    %c0_i32_1 = arith.constant 0 : i32
    return %c0_i32, %c0_i32_0 : i32, i32
  }
  func.func @transform_3(%arg0: i32) -> (i32, i32, i32) {
    %c0_i32 = arith.constant 0 : i32
    %c0_i32_0 = arith.constant 0 : i32
    %c0_i32_1 = arith.constant 0 : i32
    %c0_i32_2 = arith.constant 0 : i32
    return %c0_i32, %c0_i32_0, %c0_i32_1 : i32, i32, i32
  }
  func.func @transform_4(%arg0: i32) -> (i32, i32) {
    %c0_i32 = arith.constant 0 : i32
    %c0_i32_0 = arith.constant 0 : i32
    %c0_i32_1 = arith.constant 0 : i32
    return %c0_i32, %c0_i32_0 : i32, i32
  }
  func.func @transform_5(%arg0: i32) -> (i32, i32, i32) {
    %c0_i32 = arith.constant 0 : i32
    %c0_i32_0 = arith.constant 0 : i32
    %c0_i32_1 = arith.constant 0 : i32
    %c0_i32_2 = arith.constant 0 : i32
    return %c0_i32, %c0_i32_0, %c0_i32_1 : i32, i32, i32
  }
  func.func @transform_6(%arg0: i32) -> (i32, i32) {
    %c0_i32 = arith.constant 0 : i32
    %c0_i32_0 = arith.constant 0 : i32
    %c0_i32_1 = arith.constant 0 : i32
    return %c0_i32, %c0_i32_0 : i32, i32
  }
  func.func @transform_7(%arg0: i32) -> (i32, i32) {
    %c0_i32 = arith.constant 0 : i32
    %c0_i32_0 = arith.constant 0 : i32
    %c0_i32_1 = arith.constant 0 : i32
    return %c0_i32, %c0_i32_0 : i32, i32
  }
  func.func @transform_8(%arg0: i32) -> (i32, i32) {
    %c0_i32 = arith.constant 0 : i32
    %c0_i32_0 = arith.constant 0 : i32
    %c0_i32_1 = arith.constant 0 : i32
    return %c0_i32, %c0_i32_0 : i32, i32
  }
  func.func @transform_9(%arg0: i32) -> (i32, i32, i32) {
    %c0_i32 = arith.constant 0 : i32
    %c0_i32_0 = arith.constant 0 : i32
    %c0_i32_1 = arith.constant 0 : i32
    return %arg0, %c0_i32, %c0_i32_0 : i32, i32, i32
  }
}

</mosaic_0001>

<bundles_post_ra>
// kernel: tile.18
= control target key start
LH: loop header
LB: loop body
LE: loop exit
PB: predicated region body
PF: predicated region fallthrough
CT: control target
= control target key end

     0   :  { %s28_s0 = inlined_call_operand.vmem [shape: f32[32], index: 0, kind: input, shape index: {}]   ;;  %s29_s1 = inlined_call_operand.vmem [shape: f32[16,32], index: 1, kind: output, shape index: {}]  }
   0x1   :  { %v4_v0 = vld [vmem:[%s28_s0] ss:$0 sm:$0xff] }
   0x2   :  { %5 = vst [vmem:[%s29_s1] sm:$0xff] %v4_v0 }
   0x3   :  { %8 = vst [vmem:[%s29_s1 + $0x8] sm:$0xff] %v4_v0 }

// kernel: tile.19
= control target key start
LH: loop header
LB: loop body
LE: loop exit
PB: predicated region body
PF: predicated region fallthrough
CT: control target
= control target key end

     0   :  { %s56_s8 = smov 96   ;;  %s57_s11 = smov 32   ;;  %vm3_vm0 = vcmask 261120   ;;  %vm9_vm1 = vcmask 1048320   ;;  %vm15_vm2 = vcmask 785920   ;;  %vm21_vm3 = vcmask 523520   ;;  %s93_s0 = inlined_call_operand.vmem [shape: f32[16,32], index: 0, kind: input, shape index: {}]   ;;  %s94_s1 = inlined_call_operand.vmem [shape: f32[1,512], index: 1, kind: output, shape index: {}]  }
   0x1   :  { %v47_v0 = vld [vmem:[%s93_s0 + $0x3] ss:$4 sm:$0xf]   ;;  %v49_v1 = vld [vmem:[%s93_s0 + $0x1] ss:$4 sm:$0xf]  }
   0x2   :  { %7 = vrot.lane.b32.xlu0 %v47_v0, %s56_s8  ;;  %19 = vrot.lane.b32.xlu1 %v49_v1, %s57_s11  ;;  %v48_v2 = vld [vmem:[%s93_s0 + $0x2] ss:$4 sm:$0xf]   ;;  %s58_s14 = smov 64  }
   0x3   :  { %v2_v3 = vld [vmem:[%s93_s0] ss:$4 sm:$0xf]  }
   0x4   :  { %4 = vst.msk [vmem:[#allocation0] ss:$8 sm:$0xf] %vm3_vm0, %v2_v3  }
   0xa   :  { %13 = vrot.lane.b32.xlu0 %v48_v2, %s58_s14 }
  0x74   :  { %v8_v4 = vpop.permute.xlu0 %7   ;;  %v20_v5 = vpop.permute.xlu1 %19  }
  0x75   :  { %10 = vst.msk [vmem:[#allocation0] ss:$8 sm:$0xf] %vm9_vm1, %v8_v4  }
  0x7c   :  { %v14_v6 = vpop.permute.xlu0 %13  }
  0x7d   :  { %16 = vst.msk [vmem:[#allocation0] ss:$8 sm:$0xf] %vm15_vm2, %v14_v6  }
  0x7e   :  { %22 = vst.msk [vmem:[#allocation0] ss:$8 sm:$0xf] %vm21_vm3, %v20_v5  }
  0x85   :  { %v25_v7 = vld [vmem:[#allocation0] sm:$0x1]  ;;  %v30_v8 = vld [vmem:[#allocation0 + $0x8] sm:$0x1]  ;;  %v36_v9 = vld [vmem:[#allocation0 + $0x10] sm:$0x1] }
  0x86   :  { %28 = vst [vmem:[%s94_s1] sm:$0x1] %v25_v7  ;;  %v42_v10 = vld [vmem:[#allocation0 + $0x18] sm:$0x1] }
  0x87   :  { %50 = vst [vmem:[%s94_s1 + $0x1] sm:$0x1] %v30_v8 }
  0x88   :  { %51 = vst [vmem:[%s94_s1 + $0x2] sm:$0x1] %v36_v9 }
  0x89   :  { %52 = vst [vmem:[%s94_s1 + $0x3] sm:$0x1] %v42_v10 }

// kernel: tile.13
= control target key start
LH: loop header
LB: loop body
LE: loop exit
PB: predicated region body
PF: predicated region fallthrough
CT: control target
= control target key end

     0   :  { %s28_s0 = inlined_call_operand.vmem [shape: f32[16], index: 0, kind: input, shape index: {}]   ;;  %s29_s1 = inlined_call_operand.vmem [shape: f32[16,16], index: 1, kind: output, shape index: {}]  }
   0x1   :  { %v4_v0 = vld [vmem:[%s28_s0] ss:$0 sm:$0xff] }
   0x2   :  { %5 = vst [vmem:[%s29_s1] sm:$0xff] %v4_v0 }
   0x3   :  { %8 = vst [vmem:[%s29_s1 + $0x8] sm:$0xff] %v4_v0 }

// kernel: tile.14
= control target key start
LH: loop header
LB: loop body
LE: loop exit
PB: predicated region body
PF: predicated region fallthrough
CT: control target
= control target key end

     0   :  { %s7_s6 = smov 3  ;;  %s21_s9 = smov 3  ;;  %vm4_vm0 = vcmask 130048   ;;  %vm11_vm1 = vcmask 1048448   ;;  %vm18_vm2 = vcmask 917248   ;;  %vm25_vm3 = vcmask 786048   ;;  %s129_s0 = inlined_call_operand.vmem [shape: f32[16,16], index: 0, kind: input, shape index: {}]   ;;  %s130_s1 = inlined_call_operand.vmem [shape: f32[1,256], index: 1, kind: output, shape index: {}]  }
   0x1   :  { %v67_v0 = vld [vmem:[%s129_s0 + $0x7] ss:$8 sm:%s7_s6]   ;;  %s82_s10 = smov 112   ;;  %v69_v1 = vld [vmem:[%s129_s0 + $0x5] ss:$8 sm:%s21_s9]   ;;  %s83_s13 = smov 80  }
   0x2   :  { %9 = vrot.lane.b32.xlu0 %v67_v0, %s82_s10  ;;  %23 = vrot.lane.b32.xlu1 %v69_v1, %s83_s13  ;;  %s14_s14 = smov 3  ;;  %s28_s15 = smov 3  ;;  %vm32_vm4 = vcmask 654848   ;;  %vm39_vm5 = vcmask 523648   ;;  %vm46_vm6 = vcmask 392448   ;;  %vm53_vm7 = vcmask 261248  }
   0x3   :  { %s35_s16 = smov 3  ;;  %v68_v3 = vld [vmem:[%s129_s0 + $0x6] ss:$8 sm:%s14_s14]   ;;  %s84_s21 = smov 48   ;;  %v70_v4 = vld [vmem:[%s129_s0 + $0x4] ss:$8 sm:%s28_s15]  }
   0x4   :  { %v71_v2 = vld [vmem:[%s129_s0 + $0x3] ss:$8 sm:%s35_s16]   ;;  %s42_s24 = smov 3  ;;  %s85_s25 = smov 96  }
   0x5   :  { %37 = vrot.lane.b32.xlu2 %v71_v2, %s84_s21  ;;  %s86_s26 = smov 64   ;;  %s49_s27 = smov 3  ;;  %v72_v5 = vld [vmem:[%s129_s0 + $0x2] ss:$8 sm:%s42_s24]  }
   0x6   :  { %v73_v6 = vld [vmem:[%s129_s0 + $0x1] ss:$8 sm:%s49_s27]   ;;  %s87_s3 = smov 32   ;;  %s88_s4 = smov 16  }
   0x7   :  { %s2_s5 = smov 3 }
   0x8   :  { %v3_v7 = vld [vmem:[%s129_s0] ss:$8 sm:%s2_s5]  }
   0x9   :  { %5 = vst.msk [vmem:[#allocation0] ss:$8 sm:$0x3] %vm4_vm0, %v3_v7  }
   0xa   :  { %16 = vrot.lane.b32.xlu0 %v68_v3, %s85_s25  ;;  %30 = vrot.lane.b32.xlu1 %v70_v4, %s86_s26 }
   0xd   :  { %44 = vrot.lane.b32.xlu2 %v72_v5, %s87_s3 }
  0x12   :  { %51 = vrot.lane.b32.xlu0 %v73_v6, %s88_s4 }
  0x5f   :  { %v38_v8 = vpop.permute.xlu2 %37  }
  0x67   :  { %v45_v9 = vpop.permute.xlu2 %44  }
  0x74   :  { %v10_v10 = vpop.permute.xlu0 %9   ;;  %v24_v11 = vpop.permute.xlu1 %23  }
  0x75   :  { %12 = vst.msk [vmem:[#allocation0] ss:$8 sm:$0x3] %vm11_vm1, %v10_v10  }
  0x7c   :  { %v17_v12 = vpop.permute.xlu0 %16   ;;  %v31_v13 = vpop.permute.xlu1 %30  }
  0x7d   :  { %19 = vst.msk [vmem:[#allocation0] ss:$8 sm:$0x3] %vm18_vm2, %v17_v12  }
  0x7e   :  { %26 = vst.msk [vmem:[#allocation0] ss:$8 sm:$0x3] %vm25_vm3, %v24_v11  }
  0x7f   :  { %33 = vst.msk [vmem:[#allocation0] ss:$8 sm:$0x3] %vm32_vm4, %v31_v13  }
  0x80   :  { %40 = vst.msk [vmem:[#allocation0] ss:$8 sm:$0x3] %vm39_vm5, %v38_v8  }
  0x81   :  { %47 = vst.msk [vmem:[#allocation0] ss:$8 sm:$0x3] %vm46_vm6, %v45_v9  }
  0x84   :  { %v52_v14 = vpop.permute.xlu0 %51  }
  0x85   :  { %54 = vst.msk [vmem:[#allocation0] ss:$8 sm:$0x3] %vm53_vm7, %v52_v14  }
  0x8c   :  { %v57_v15 = vld [vmem:[#allocation0] sm:$0x1]  ;;  %v62_v16 = vld [vmem:[#allocation0 + $0x8] sm:$0x1] }
  0x8d   :  { %60 = vst [vmem:[%s130_s1] sm:$0x1] %v57_v15 }
  0x8e   :  { %74 = vst [vmem:[%s130_s1 + $0x1] sm:$0x1] %v62_v16 }

// kernel: vggnet_forward.1
= control target key start
LH: loop header
LB: loop body
LE: loop exit
PB: predicated region body
PF: predicated region fallthrough
CT: control target
= control target key end

     0   :  { %14 = vsyncpa [#allocation3], 0  ;;  %s7983_s0 = inlined_call_operand.vmem [shape: f32[2,24,72], index: 0, kind: input, shape index: {}]   ;;  %s7984_s1 = inlined_call_operand.vmem [shape: bf16[3,72,256], index: 1, kind: input, shape index: {}]   ;;  %s7985_s2 = inlined_call_operand.vmem [shape: f32[1,256], index: 2, kind: input, shape index: {}]   ;;  %s7986_s3 = inlined_call_operand.vmem [shape: bf16[3,256,512], index: 3, kind: input, shape index: {}]   ;;  %s7987_s4 = inlined_call_operand.vmem [shape: f32[1,512], index: 4, kind: input, shape index: {}]   ;;  %s7988_s5 = inlined_call_operand.vmem [shape: bf16[8,256,64], index: 5, kind: input, shape index: {}]   ;;  %s7989_s6 = inlined_call_operand.vmem [shape: f32[1,64], index: 6, kind: input, shape index: {}]   ;;  %s7990_s7 = inlined_call_operand.vmem [shape: bf16[64,10], index: 7, kind: input, shape index: {}]   ;;  %s7991_s8 = inlined_call_operand.vmem [shape: f32[1,10], index: 8, kind: input, shape index: {}]   ;;  %s7992_s9 = inlined_call_operand.hbm [shape: f32[2,1,10], index: 9, kind: output, shape index: {}]  }
   0x1   :  { %16 = vsyncpa [#allocation3 + $0x1], 0  ;;  %s6000_s30 = smov 0   ;;  %s6002_s10 = smov 0  }
   0x2   :  { %s6004_s11 = smov 0   ;;  %s6006_s12 = smov 0  }
   0x3 LB: > { %s6021_s13 = sadd.s32 4294967295, %s5948_s12   ;;  %s3716_s14 = sadd.s32 4294967294, %s5948_s12   ;;  %s5948_s12 = sphi %s6006_s12, %s8000_s12   ;;  %s5944_s11 = sphi %s6004_s11, %s7999_s11   ;;  %s5940_s10 = sphi %s6002_s10, %s7998_s10   ;;  %s5936_s30 = sphi %s6000_s30, %s7997_s30  }
   0x4   : > { %s6025_s15 = sadd.s32 1, %s5948_s12   ;;  %s223_s16 = sadd.s32 1, %s5944_s11 }
   0x5   : > { %s220_s17 = ssub.s32 %s5948_s12, %s6025_s15  ;;  %p233_p0 = scmp.ne.s32.totalorder %s5944_s11, %s5940_s10 }
   0x6   : > { %p221_p1 = scmp.eq.s32.totalorder %s220_s17, 0  ;;  %p234_p2 = scmp.eq.s32.totalorder %s6021_s13, 1 }
   0x7   : > { %p239_p3 = scmp.ne.s32.totalorder %s5940_s10, %s5936_s30  ;;  %p240_p4 = scmp.eq.s32.totalorder %s3716_s14, 1 }
   0x8   : > { %s6036_s18 = scalar_select %p221_p1, %s5944_s11, %s223_s16  }
   0x9   : > { %p6038_p5 = por %p234_p2, %p233_p0  ;;  %p6042_p6 = por %p240_p4, %p239_p3 }
   0xa   : > { %7993 = sst [smem:[#allocation5_spill]] %s6036_s18  ;;  %p3719_p7 = scmp.ge.s32.totalorder %s5948_s12, 1 }
   0xb   : > { %p290_p8 = scmp.lt.s32.totalorder %s5948_s12, 3 }
   0xd   : > { %p291_p9 = pnand %p3719_p7, %p290_p8 }
   0xe   : > { %p325_p10 = scmp.lt.s32.totalorder (!%p291_p9), %s6021_s13, 1  ;;  %s323_s29 = sand.u32 (!%p291_p9), 1, %s5940_s10  }
   0xf   : > { %294 = sbr.rel (%p291_p9) target bundleno = 869 (0x365), region = 56  ;;  %s3657_s14 = scalar_lea.hbm (!%p291_p9), %s7992_s9, %s6021_s13 }
  0x10   : > { %s324_s22 = scalar_lea.vmem (!%p291_p9), [#allocation2], %s323_s29  ;;  %s3661_s24 = sshll.u32 (!%p291_p9), %s3657_s14, 4  ;;  %s3662_s24 = int_to_ptr.hbm [resolvable:$true] %s3661_s24 }
  0x11   : > { %s3659_s18 = sshll.u32 (!%p291_p9), %s324_s22, 4  ;;  %s5900_s26 = sshra.s32 (!%p291_p9), %s3662_s24, 4  ;;  %s3660_s18 = int_to_ptr.vmem [resolvable:$true] %s3659_s18  ;;  %s5901_s26 = int_to_ptr.hbm [resolvable:$true] %s5900_s26 }
  0x12   : > { %s5902_s27 = scalar_lea.hbm (!%p291_p9), %s5901_s26, 1  ;;  %p5907_p0 = scmp.lt.s32.totalorder (!%p291_p9), %s5901_s26, %s7992_s9 }
  0x13   : > { %p5903_p11 = scmp.ne.s32.totalorder (!%p291_p9), %s5901_s26, %s5902_s27 }
  0x14   : > { %v344_v0 = vld [vmem:[%s7984_s1 + $0x40] sm:$0xff]  ;;  %v3765_v1 = vld [vmem:[%s7984_s1 + $0x88] sm:$0xff]  ;;  %vm397_vm0 = vcmask 1043456   ;;  %v3747_v6 = vld [vmem:[%s7984_s1 + $0x30] sm:$0xf]  ;;  %s326_s25 = scalar_select %p325_p10, %s6021_s13, 1 }
  0x15   : > { %v370_v2 = vunpack.c.l.b16 %v344_v0  ;;  %v371_v3 = vunpack.c.h.b16 %v344_v0  ;;  %v473_v4 = vunpack.c.l.b16 %v3765_v1  ;;  %v474_v5 = vunpack.c.h.b16 %v3765_v1  ;;  %v5505_v7 = vld [vmem:[%s7984_s1 + $0x34] sm:$0xf0]  ;;  %v5504_v12 = vld [vmem:[%s7984_s1 + $0x34] sm:$0xf]  ;;  %v3749_v13 = vld [vmem:[%s7984_s1 + $0x38] sm:$0xf0]  ;;  %p5904_p12 = pnand %p5903_p11, %p6038_p5 }
  0x16   : > { %v3792_v14 = vld [vmem:[%s7984_s1 + $0x78] sm:$0xf]  ;;  %v5513_v15 = vld [vmem:[%s7984_s1 + $0x7c] sm:$0xf0]  ;;  %v5512_v16 = vld [vmem:[%s7984_s1 + $0x7c] sm:$0xf]  ;;  %v3748_v22 = vor.u32 %v5505_v7, %v3747_v6  ;;  %v3752_v23 = vor.u32 %v5504_v12, %v3749_v13 }
  0x17   : > { %v380_v8 = vpack.c.b16 %v370_v2, %v370_v2  ;;  %v381_v9 = vpack.c.b16 %v371_v3, %v371_v3  ;;  %v483_v10 = vpack.c.b16 %v473_v4, %v473_v4  ;;  %v484_v11 = vpack.c.b16 %v474_v5, %v474_v5  ;;  %v3794_v17 = vld [vmem:[%s7984_s1 + $0x80] sm:$0xf0]  ;;  %v3739_v24 = vld [vmem:[%s7984_s1 + $0x20] sm:$0xf]  ;;  %v5503_v25 = vld [vmem:[%s7984_s1 + $0x24] sm:$0xf0]  ;;  %p5905_p13 = pneg %p5904_p12 }
  0x18   : > { %v3793_v26 = vor.u32 %v5513_v15, %v3792_v14  ;;  %v3797_v27 = vor.u32 %v5512_v16, %v3794_v17  ;;  %v5502_v28 = vld [vmem:[%s7984_s1 + $0x24] sm:$0xf]  ;;  %v3741_v29 = vld [vmem:[%s7984_s1 + $0x28] sm:$0xf0]  ;;  %v3784_v30 = vld [vmem:[%s7984_s1 + $0x68] sm:$0xf]  ;;  %v3740_v34 = vor.u32 %v5503_v25, %v3739_v24 }
  0x19   : > { %v399_v18 = vsel %vm397_vm0, %v380_v8, 0  ;;  %v402_v19 = vsel %vm397_vm0, %v381_v9, 0  ;;  %v494_v20 = vsel %vm397_vm0, %v483_v10, 0  ;;  %v497_v21 = vsel %vm397_vm0, %v484_v11, 0  ;;  %v5511_v31 = vld [vmem:[%s7984_s1 + $0x6c] sm:$0xf0] }
  0x1a   : > { %407 = vmatpush.bf16.msra.mxu0 %v399_v18  ;;  %424 = vmatpush.bf16.msra.mxu1 %v402_v19  ;;  %v5510_v32 = vld [vmem:[%s7984_s1 + $0x6c] sm:$0xf]  ;;  %v3786_v33 = vld [vmem:[%s7984_s1 + $0x70] sm:$0xf0]  ;;  %v3744_v35 = vor.u32 %v5502_v28, %v3741_v29  ;;  %v3731_v36 = vld [vmem:[%s7984_s1 + $0x10] sm:$0xf]  ;;  %v3785_v39 = vor.u32 %v5511_v31, %v3784_v30 }
  0x1b   : > { %502 = vmatpush.bf16.msra.mxu2 %v494_v20  ;;  %520 = vmatpush.bf16.msra.mxu3 %v497_v21  ;;  %v5501_v37 = vld [vmem:[%s7984_s1 + $0x14] sm:$0xf0]  ;;  %v5500_v38 = vld [vmem:[%s7984_s1 + $0x14] sm:$0xf]  ;;  %v3789_v40 = vor.u32 %v5510_v32, %v3786_v33  ;;  %v3733_v41 = vld [vmem:[%s7984_s1 + $0x18] sm:$0xf0] }
  0x1c   : > { %v3776_v42 = vld [vmem:[%s7984_s1 + $0x58] sm:$0xf]  ;;  %v5509_v43 = vld [vmem:[%s7984_s1 + $0x5c] sm:$0xf0]  ;;  %v5508_v44 = vld [vmem:[%s7984_s1 + $0x5c] sm:$0xf]  ;;  %v3732_v49 = vor.u32 %v5501_v37, %v3731_v36  ;;  %v3736_v50 = vor.u32 %v5500_v38, %v3733_v41 }
  0x1d   : > { %v3778_v45 = vld [vmem:[%s7984_s1 + $0x60] sm:$0xf0]  ;;  %v3810_v46 = vld [vmem:[%s7984_s1 + $0xd0] sm:$0xff]  ;;  %v3723_v51 = vld [vmem:[%s7984_s1] sm:$0xf]  ;;  %s5846_s17 = smul.u32 24, %s326_s25  ;;  %v3777_v53 = vor.u32 %v5509_v43, %v3776_v42 }
  0x1e   : > { %408 = vmatpush.bf16.msra.mxu0 %v3748_v22  ;;  %425 = vmatpush.bf16.msra.mxu1 %v3752_v23  ;;  %v570_v47 = vunpack.c.l.b16 %v3810_v46  ;;  %v571_v48 = vunpack.c.h.b16 %v3810_v46  ;;  %v5499_v52 = vld [vmem:[%s7984_s1 + $0x4] sm:$0xf0]  ;;  %v3781_v54 = vor.u32 %v5508_v44, %v3778_v45  ;;  %v5498_v55 = vld [vmem:[%s7984_s1 + $0x4] sm:$0xf]  ;;  %v3725_v56 = vld [vmem:[%s7984_s1 + $0x8] sm:$0xf0] }
  0x1f   : > { %503 = vmatpush.bf16.msra.mxu2 %v3793_v26  ;;  %521 = vmatpush.bf16.msra.mxu3 %v3797_v27  ;;  %v3768_v57 = vld [vmem:[%s7984_s1 + $0x48] sm:$0xf]  ;;  %v5507_v58 = vld [vmem:[%s7984_s1 + $0x4c] sm:$0xf0]  ;;  %v5506_v59 = vld [vmem:[%s7984_s1 + $0x4c] sm:$0xf]  ;;  %s6164_s23 = scalar_lea.vmem %s7983_s0, %s5846_s17  ;;  %v3724_v63 = vor.u32 %v5499_v52, %v3723_v51  ;;  %v3728_v0 = vor.u32 %v5498_v55, %v3725_v56 }
  0x20   : > { %v3770_v60 = vld [vmem:[%s7984_s1 + $0x50] sm:$0xf0]  ;;  %v580_v61 = vpack.c.b16 %v570_v47, %v570_v47  ;;  %v581_v62 = vpack.c.b16 %v571_v48, %v571_v48  ;;  %v331_v1 = vld [vmem:[%s6164_s23] sm:$0xff]  ;;  %v332_v2 = vld [vmem:[%s6164_s23 + $0x8] sm:$0xff]  ;;  %v3769_v3 = vor.u32 %v5507_v58, %v3768_v57  ;;  %vm390_vm1 = vcmask 588800   ;;  %s3649_s17 = scalar_lea.sflag [#allocation3], %s323_s29 }
  0x21   : > { %v3773_v4 = vor.u32 %v5506_v59, %v3770_v60  ;;  %v3837_v5 = vld [vmem:[%s7984_s1 + $0xc0] sm:$0xf]  ;;  %v5521_v6 = vld [vmem:[%s7984_s1 + $0xc4] sm:$0xf0]  ;;  %v334_v7 = vpack.c.bf16 %v332_v2, %v331_v1  ;;  %v5520_v10 = vld [vmem:[%s7984_s1 + $0xc4] sm:$0xf] }
  0x22   : > { %409 = vmatpush.bf16.msra.mxu0 %v3740_v34  ;;  %426 = vmatpush.bf16.msra.mxu1 %v3744_v35  ;;  %v591_v8 = vsel %vm397_vm0, %v580_v61, 0  ;;  %v594_v9 = vsel %vm397_vm0, %v581_v62, 0  ;;  %v3839_v11 = vld [vmem:[%s7984_s1 + $0xc8] sm:$0xf0]  ;;  %v3838_v12 = vor.u32 %v5521_v6, %v3837_v5  ;;  %v3829_v14 = vld [vmem:[%s7984_s1 + $0xb0] sm:$0xf] }
  0x23   : > { %504 = vmatpush.bf16.msra.mxu2 %v3785_v39  ;;  %522 = vmatpush.bf16.msra.mxu3 %v3789_v40  ;;  %v3842_v13 = vor.u32 %v5520_v10, %v3839_v11  ;;  %v5519_v15 = vld [vmem:[%s7984_s1 + $0xb4] sm:$0xf0]  ;;  %v5518_v16 = vld [vmem:[%s7984_s1 + $0xb4] sm:$0xf]  ;;  %v3831_v17 = vld [vmem:[%s7984_s1 + $0xb8] sm:$0xf0] }
  0x24   : > { %v3830_v18 = vor.u32 %v5519_v15, %v3829_v14  ;;  %v3834_v19 = vor.u32 %v5518_v16, %v3831_v17  ;;  %v3821_v20 = vld [vmem:[%s7984_s1 + $0xa0] sm:$0xf]  ;;  %v5517_v21 = vld [vmem:[%s7984_s1 + $0xa4] sm:$0xf0]  ;;  %v5516_v22 = vld [vmem:[%s7984_s1 + $0xa4] sm:$0xf] }
  0x25   : > { %v3823_v23 = vld [vmem:[%s7984_s1 + $0xa8] sm:$0xf0]  ;;  %v3822_v24 = vor.u32 %v5517_v21, %v3821_v20  ;;  %v3813_v26 = vld [vmem:[%s7984_s1 + $0x90] sm:$0xf]  ;;  %v5515_v27 = vld [vmem:[%s7984_s1 + $0x94] sm:$0xf0] }
  0x26   : > { %410 = vmatpush.bf16.msra.mxu0 %v3732_v49  ;;  %427 = vmatpush.bf16.msra.mxu1 %v3736_v50  ;;  %v3826_v25 = vor.u32 %v5516_v22, %v3823_v23  ;;  %v5514_v28 = vld [vmem:[%s7984_s1 + $0x94] sm:$0xf]  ;;  %v3815_v29 = vld [vmem:[%s7984_s1 + $0x98] sm:$0xf0]  ;;  %v3814_v31 = vor.u32 %v5515_v27, %v3813_v26  ;;  %v3961_v34 = vld [vmem:[%s7986_s3 + $0xe0] sm:$0xf] }
  0x27   : > { %505 = vmatpush.bf16.msra.mxu2 %v3777_v53  ;;  %523 = vmatpush.bf16.msra.mxu3 %v3781_v54  ;;  %v333_v30 = vld [vmem:[%s6164_s23 + $0x10] sm:$0xff]  ;;  %v3818_v32 = vor.u32 %v5514_v28, %v3815_v29  ;;  %v4089_v36 = vld [vmem:[%s7986_s3 + $0x1e0] sm:$0xf]  ;;  %v5550_v39 = vld [vmem:[%s7986_s3 + $0xe4] sm:$0xf]  ;;  %vm638_vm2 = vcmask 1046528  }
  0x28   : > { %v335_v33 = vpack.c.bf16 %v333_v30, %v333_v30  ;;  %v5552_v35 = vld [vmem:[%s7986_s3 + $0xec] sm:$0xf0]  ;;  %v3963_v40 = vld [vmem:[%s7986_s3 + $0xf0] sm:$0xf0]  ;;  %v5582_v43 = vld [vmem:[%s7986_s3 + $0x1e4] sm:$0xf] }
  0x29   : > { %v3962_v37 = vor.u32 %v5552_v35, %v3961_v34  ;;  %v5584_v38 = vld [vmem:[%s7986_s3 + $0x1ec] sm:$0xf0]  ;;  %v3966_v42 = vor.u32 %v5550_v39, %v3963_v40  ;;  %v4091_v44 = vld [vmem:[%s7986_s3 + $0x1f0] sm:$0xf0]  ;;  %v3945_v46 = vld [vmem:[%s7986_s3 + $0xc0] sm:$0xf] }
  0x2a   : > { %411 = vmatpush.bf16.msra.mxu0 %v3724_v63  ;;  %428 = vmatpush.bf16.msra.mxu1 %v3728_v0  ;;  %v4090_v41 = vor.u32 %v5584_v38, %v4089_v36  ;;  %v4094_v45 = vor.u32 %v5582_v43, %v4091_v44  ;;  %v5548_v47 = vld [vmem:[%s7986_s3 + $0xcc] sm:$0xf0]  ;;  %v4073_v48 = vld [vmem:[%s7986_s3 + $0x1c0] sm:$0xf]  ;;  %v5546_v51 = vld [vmem:[%s7986_s3 + $0xc4] sm:$0xf] }
  0x2b   : > { %506 = vmatpush.bf16.msra.mxu2 %v3769_v3  ;;  %524 = vmatpush.bf16.msra.mxu3 %v3773_v4  ;;  %v3946_v49 = vor.u32 %v5548_v47, %v3945_v46  ;;  %v5580_v50 = vld [vmem:[%s7986_s3 + $0x1cc] sm:$0xf0]  ;;  %v3947_v52 = vld [vmem:[%s7986_s3 + $0xd0] sm:$0xf0]  ;;  %v5578_v55 = vld [vmem:[%s7986_s3 + $0x1c4] sm:$0xf] }
  0x2c   : > { %v4074_v53 = vor.u32 %v5580_v50, %v4073_v48  ;;  %v3950_v54 = vor.u32 %v5546_v51, %v3947_v52  ;;  %v4075_v56 = vld [vmem:[%s7986_s3 + $0x1d0] sm:$0xf0]  ;;  %v3929_v58 = vld [vmem:[%s7986_s3 + $0xa0] sm:$0xf]  ;;  %v5544_v59 = vld [vmem:[%s7986_s3 + $0xac] sm:$0xf0] }
  0x2d   : > { %3753 = vmatmul.msk.bf16.vlgmr.msra.gmra.mxu0 %vm390_vm1, %v334_v7  ;;  %3755 = vmatmul.msk.bf16.vlgmr.msra.gmra.mxu1 %vm390_vm1, %v334_v7  ;;  %v4078_v57 = vor.u32 %v5578_v55, %v4075_v56  ;;  %v4057_v60 = vld [vmem:[%s7986_s3 + $0x1a0] sm:$0xf]  ;;  %v3930_v61 = vor.u32 %v5544_v59, %v3929_v58  ;;  %v5576_v62 = vld [vmem:[%s7986_s3 + $0x1ac] sm:$0xf0]  ;;  %v5542_v63 = vld [vmem:[%s7986_s3 + $0xa4] sm:$0xf] }
  0x2e   : > { %599 = vmatpush.bf16.msrb.mxu0 %v591_v8  ;;  %617 = vmatpush.bf16.msrb.mxu1 %v594_v9  ;;  %v3931_v0 = vld [vmem:[%s7986_s3 + $0xb0] sm:$0xf0]  ;;  %v4058_v1 = vor.u32 %v5576_v62, %v4057_v60  ;;  %v5574_v3 = vld [vmem:[%s7986_s3 + $0x1a4] sm:$0xf]  ;;  %v3913_v6 = vld [vmem:[%s7986_s3 + $0x80] sm:$0xf] }
  0x2f   : > { %3798 = vmatmul.msk.bf16.vlgmr.msra.gmra.mxu2 %vm390_vm1, %v334_v7  ;;  %3800 = vmatmul.msk.bf16.vlgmr.msra.gmra.mxu3 %vm390_vm1, %v334_v7  ;;  %v3934_v2 = vor.u32 %v5542_v63, %v3931_v0  ;;  %v4059_v4 = vld [vmem:[%s7986_s3 + $0x1b0] sm:$0xf0]  ;;  %v4041_v8 = vld [vmem:[%s7986_s3 + $0x180] sm:$0xf]  ;;  %v5572_v10 = vld [vmem:[%s7986_s3 + $0x18c] sm:$0xf0] }
  0x30   : > { %1082 = vmatpush.bf16.msrb.mxu2 %v3962_v37  ;;  %1096 = vmatpush.bf16.msrb.mxu3 %v4090_v41  ;;  %v4062_v5 = vor.u32 %v5574_v3, %v4059_v4  ;;  %v5538_v11 = vld [vmem:[%s7986_s3 + $0x84] sm:$0xf]  ;;  %v4043_v16 = vld [vmem:[%s7986_s3 + $0x190] sm:$0xf0]  ;;  %v4025_v20 = vld [vmem:[%s7986_s3 + $0x160] sm:$0xf] }
  0x31   : > { %v5570_v15 = vld [vmem:[%s7986_s3 + $0x184] sm:$0xf]  ;;  %v5568_v22 = vld [vmem:[%s7986_s3 + $0x16c] sm:$0xf0]  ;;  %v4027_v28 = vld [vmem:[%s7986_s3 + $0x170] sm:$0xf0] }
  0x32   : > { %600 = vmatpush.bf16.msrb.mxu0 %v3838_v12  ;;  %618 = vmatpush.bf16.msrb.mxu1 %v3842_v13  ;;  %v3915_v12 = vld [vmem:[%s7986_s3 + $0x90] sm:$0xf0]  ;;  %v4042_v13 = vor.u32 %v5572_v10, %v4041_v8  ;;  %v4046_v17 = vor.u32 %v5570_v15, %v4043_v16  ;;  %v5534_v23 = vld [vmem:[%s7986_s3 + $0x64] sm:$0xf]  ;;  %v3881_v30 = vld [vmem:[%s7986_s3 + $0x40] sm:$0xf] }
  0x33   : > { %v3918_v14 = vor.u32 %v5538_v11, %v3915_v12  ;;  %v5566_v27 = vld [vmem:[%s7986_s3 + $0x164] sm:$0xf]  ;;  %v5564_v34 = vld [vmem:[%s7986_s3 + $0x14c] sm:$0xf0]  ;;  %v3883_v36 = vld [vmem:[%s7986_s3 + $0x50] sm:$0xf0] }
  0x34   : > { %1083 = vmatpush.bf16.msrb.mxu2 %v3946_v49  ;;  %1097 = vmatpush.bf16.msrb.mxu3 %v4074_v53  ;;  %v4030_v29 = vor.u32 %v5566_v27, %v4027_v28  ;;  %v5530_v35 = vld [vmem:[%s7986_s3 + $0x44] sm:$0xf]  ;;  %v4011_v40 = vld [vmem:[%s7986_s3 + $0x150] sm:$0xf0]  ;;  %v5528_v43 = vld [vmem:[%s7986_s3 + $0x2c] sm:$0xf0] }
  0x35   : > { %v3886_v38 = vor.u32 %v5530_v35, %v3883_v36  ;;  %v5562_v39 = vld [vmem:[%s7986_s3 + $0x144] sm:$0xf]  ;;  %v3993_v44 = vld [vmem:[%s7986_s3 + $0x120] sm:$0xf]  ;;  %v5560_v46 = vld [vmem:[%s7986_s3 + $0x12c] sm:$0xf0] }
  0x36   : > { %601 = vmatpush.bf16.msrb.mxu0 %v3830_v18  ;;  %619 = vmatpush.bf16.msrb.mxu1 %v3834_v19  ;;  %v3897_v18 = vld [vmem:[%s7986_s3 + $0x60] sm:$0xf]  ;;  %v5536_v19 = vld [vmem:[%s7986_s3 + $0x6c] sm:$0xf0]  ;;  %v4014_v41 = vor.u32 %v5562_v39, %v4011_v40  ;;  %v5526_v47 = vld [vmem:[%s7986_s3 + $0x24] sm:$0xf]  ;;  %v3994_v49 = vor.u32 %v5560_v46, %v3993_v44 }
  0x37   : > { %v3898_v21 = vor.u32 %v5536_v19, %v3897_v18  ;;  %v3867_v48 = vld [vmem:[%s7986_s3 + $0x30] sm:$0xf0]  ;;  %v5558_v51 = vld [vmem:[%s7986_s3 + $0x124] sm:$0xf]  ;;  %v5524_v55 = vld [vmem:[%s7986_s3 + $0xc] sm:$0xf0] }
  0x38   : > { %1084 = vmatpush.bf16.msrb.mxu2 %v3930_v61  ;;  %1098 = vmatpush.bf16.msrb.mxu3 %v4058_v1  ;;  %v3870_v50 = vor.u32 %v5526_v47, %v3867_v48  ;;  %v3995_v52 = vld [vmem:[%s7986_s3 + $0x130] sm:$0xf0]  ;;  %v3977_v56 = vld [vmem:[%s7986_s3 + $0x100] sm:$0xf]  ;;  %v5556_v58 = vld [vmem:[%s7986_s3 + $0x10c] sm:$0xf0] }
  0x39   : > { %v3998_v53 = vor.u32 %v5558_v51, %v3995_v52  ;;  %v5522_v59 = vld [vmem:[%s7986_s3 + $0x4] sm:$0xf]  ;;  %v3851_v60 = vld [vmem:[%s7986_s3 + $0x10] sm:$0xf0]  ;;  %v3978_v61 = vor.u32 %v5556_v58, %v3977_v56  ;;  %v3969_v1 = vld [vmem:[%s7986_s3 + $0xe8] sm:$0xf] }
  0x3a   : > { %602 = vmatpush.bf16.msrb.mxu0 %v3822_v24  ;;  %620 = vmatpush.bf16.msrb.mxu1 %v3826_v25  ;;  %v3899_v24 = vld [vmem:[%s7986_s3 + $0x70] sm:$0xf0]  ;;  %v4026_v25 = vor.u32 %v5568_v22, %v4025_v20  ;;  %v3854_v62 = vor.u32 %v5522_v59, %v3851_v60  ;;  %v5554_v63 = vld [vmem:[%s7986_s3 + $0x104] sm:$0xf]  ;;  %v5553_v3 = vld [vmem:[%s7986_s3 + $0xf4] sm:$0xf0] }
  0x3b   : > { %v3902_v26 = vor.u32 %v5534_v23, %v3899_v24  ;;  %v3979_v0 = vld [vmem:[%s7986_s3 + $0x110] sm:$0xf0]  ;;  %v4097_v4 = vld [vmem:[%s7986_s3 + $0x1e8] sm:$0xf]  ;;  %v5551_v8 = vld [vmem:[%s7986_s3 + $0xec] sm:$0xf] }
  0x3c   : > { %1099 = vmatpush.bf16.msrb.mxu3 %v4042_v13  ;;  %v5583_v10 = vld [vmem:[%s7986_s3 + $0x1ec] sm:$0xf]  ;;  %v3953_v16 = vld [vmem:[%s7986_s3 + $0xc8] sm:$0xf]  ;;  %v5581_v20 = vld [vmem:[%s7986_s3 + $0x1d4] sm:$0xf0] }
  0x3d   : > { %3754 = vmatmul.msk.bf16.gmra.mxu0 %vm390_vm1, %v335_v33  ;;  %3756 = vmatmul.msk.bf16.gmra.mxu1 %vm390_vm1, %v335_v33  ;;  %v4081_v18 = vld [vmem:[%s7986_s3 + $0x1c8] sm:$0xf]  ;;  %v3955_v22 = vld [vmem:[%s7986_s3 + $0xd8] sm:$0xf0]  ;;  %v5575_v35 = vld [vmem:[%s7986_s3 + $0x1ac] sm:$0xf] }
  0x3e   : > { %603 = vmatpush.bf16.msrb.mxu0 %v3814_v31  ;;  %621 = vmatpush.bf16.msrb.mxu1 %v3818_v32  ;;  %v5532_v31 = vld [vmem:[%s7986_s3 + $0x4c] sm:$0xf0]  ;;  %v4009_v32 = vld [vmem:[%s7986_s3 + $0x140] sm:$0xf]  ;;  %v4082_v23 = vor.u32 %v5581_v20, %v4081_v18  ;;  %v3937_v27 = vld [vmem:[%s7986_s3 + $0xa8] sm:$0xf] }
  0x3f   : > { %3799 = vmatmul.msk.bf16.gmra.mxu2 %vm390_vm1, %v335_v33  ;;  %3801 = vmatmul.msk.bf16.gmra.mxu3 %vm390_vm1, %v335_v33  ;;  %v4010_v37 = vor.u32 %v5564_v34, %v4009_v32  ;;  %v3939_v34 = vld [vmem:[%s7986_s3 + $0xb8] sm:$0xf0]  ;;  %v3921_v44 = vld [vmem:[%s7986_s3 + $0x88] sm:$0xf]  ;;  %v5573_v48 = vld [vmem:[%s7986_s3 + $0x194] sm:$0xf0] }
  0x40   : > { %1100 = vmatpush.bf16.msrb.mxu3 %v4026_v25  ;;  %v5579_v25 = vld [vmem:[%s7986_s3 + $0x1cc] sm:$0xf]  ;;  %v4049_v46 = vld [vmem:[%s7986_s3 + $0x188] sm:$0xf]  ;;  %v5569_v60 = vld [vmem:[%s7986_s3 + $0x174] sm:$0xf0] }
  0x41   : > { %v4050_v51 = vor.u32 %v5573_v48, %v4049_v46  ;;  %v3905_v56 = vld [vmem:[%s7986_s3 + $0x68] sm:$0xf]  ;;  %v4019_v20 = vld [vmem:[%s7986_s3 + $0x158] sm:$0xf0]  ;;  %v5557_v46 = vld [vmem:[%s7986_s3 + $0x114] sm:$0xf0] }
  0x42   : > { %1110 = vmatpush.bf16.msra.mxu0 %v3966_v42  ;;  %1124 = vmatpush.bf16.msra.mxu1 %v4094_v45  ;;  %v3865_v42 = vld [vmem:[%s7986_s3 + $0x20] sm:$0xf]  ;;  %v4033_v59 = vld [vmem:[%s7986_s3 + $0x168] sm:$0xf]  ;;  %v3859_v48 = vld [vmem:[%s7986_s3 + $0x18] sm:$0xf0] }
  0x43   : > { %v3866_v45 = vor.u32 %v5528_v43, %v3865_v42  ;;  %vm663_vm3 = vcmask 1045504   ;;  %vm2196_vm4 = vcmask 1040384   ;;  %vm3629_vm5 = vcmask 523264   ;;  %s5906_s25 = scalar_lea.hbm %s7992_s9, 2 }
  0x44   : > { %1101 = vmatpush.bf16.msrb.mxu3 %v4010_v37  ;;  %vm3646_vm6 = vcmask 73728   ;;  %p5908_p1 = scmp.lt.s32.totalorder %s5906_s25, %s5902_s27 }
  0x46   : > { %1111 = vmatpush.bf16.msra.mxu0 %v3950_v54  ;;  %1125 = vmatpush.bf16.msra.mxu1 %v4078_v57  ;;  %v3849_v54 = vld [vmem:[%s7986_s3] sm:$0xf]  ;;  %p5909_p2 = por %p5908_p1, %p5907_p0 }
  0x47   : > { %v3850_v57 = vor.u32 %v5524_v55, %v3849_v54  ;;  %v4051_v54 = vld [vmem:[%s7986_s3 + $0x198] sm:$0xf0] }
  0x48   : > { %1102 = vmatpush.bf16.msrb.mxu3 %v3994_v49  ;;  %v5539_v49 = vld [vmem:[%s7986_s3 + $0x8c] sm:$0xf]  ;;  %p5910_p3 = pnand %p5909_p2, %p5905_p13 }
  0x4a   : > { %1112 = vmatpush.bf16.msra.mxu0 %v3934_v2  ;;  %1126 = vmatpush.bf16.msra.mxu1 %v4062_v5  ;;  %v3982_v2 = vor.u32 %v5554_v63, %v3979_v0  ;;  %v5585_v5 = vld [vmem:[%s7986_s3 + $0x1f4] sm:$0xf0]  ;;  %v4034_v0 = vor.u32 %v5569_v60, %v4033_v59 }
  0x4c   : > { %1103 = vmatpush.bf16.msrb.mxu3 %v3978_v61  ;;  %v5535_v61 = vld [vmem:[%s7986_s3 + $0x6c] sm:$0xf] }
  0x4d   : > { %3843 = vmatmul.msk.bf16.vlgmr.msrb.gmra.mxu0 %vm390_vm1, %v334_v7  ;;  %3845 = vmatmul.msk.bf16.vlgmr.msrb.gmra.mxu1 %vm390_vm1, %v334_v7  ;;  %v5540_v7 = vld [vmem:[%s7986_s3 + $0x8c] sm:$0xf0] }
  0x4e   : > { %v3914_v9 = vor.u32 %v5540_v7, %v3913_v6  ;;  %1113 = vmatpush.bf16.msra.mxu0 %v3918_v14  ;;  %1127 = vmatpush.bf16.msra.mxu1 %v4046_v17  ;;  %v3970_v6 = vor.u32 %v5553_v3, %v3969_v1  ;;  %v4098_v7 = vor.u32 %v5585_v5, %v4097_v4  ;;  %v4099_v14 = vld [vmem:[%s7986_s3 + $0x1f8] sm:$0xf0]  ;;  %v5549_v17 = vld [vmem:[%s7986_s3 + $0xd4] sm:$0xf0] }
  0x4f   : > { %v4102_v15 = vor.u32 %v5583_v10, %v4099_v14  ;;  %v3954_v19 = vor.u32 %v5549_v17, %v3953_v16  ;;  %v3907_v1 = vld [vmem:[%s7986_s3 + $0x78] sm:$0xf0]  ;;  %v4017_v10 = vld [vmem:[%s7986_s3 + $0x148] sm:$0xf]  ;;  %v5565_v14 = vld [vmem:[%s7986_s3 + $0x154] sm:$0xf0] }
  0x50   : > { %1085 = vmatpush.bf16.msrb.mxu2 %v3914_v9  ;;  %v3971_v9 = vld [vmem:[%s7986_s3 + $0xf8] sm:$0xf0]  ;;  %1152 = vmatpush.bf16.msra.mxu3 %v4098_v7  ;;  %v4018_v17 = vor.u32 %v5565_v14, %v4017_v10 }
  0x51   : > { %v3974_v13 = vor.u32 %v5551_v8, %v3971_v9  ;;  %v4035_v3 = vld [vmem:[%s7986_s3 + $0x178] sm:$0xf0]  ;;  %v3889_v8 = vld [vmem:[%s7986_s3 + $0x48] sm:$0xf]  ;;  %v5533_v9 = vld [vmem:[%s7986_s3 + $0x54] sm:$0xf0] }
  0x52   : > { %1114 = vmatpush.bf16.msra.mxu0 %v3902_v26  ;;  %1128 = vmatpush.bf16.msra.mxu1 %v4030_v29  ;;  %v4083_v26 = vld [vmem:[%s7986_s3 + $0x1d8] sm:$0xf0]  ;;  %v5545_v29 = vld [vmem:[%s7986_s3 + $0xb4] sm:$0xf0] }
  0x53   : > { %v4086_v28 = vor.u32 %v5579_v25, %v4083_v26  ;;  %v3938_v32 = vor.u32 %v5545_v29, %v3937_v27  ;;  %v3891_v16 = vld [vmem:[%s7986_s3 + $0x58] sm:$0xf0]  ;;  %v5561_v26 = vld [vmem:[%s7986_s3 + $0x134] sm:$0xf0]  ;;  %v5527_v27 = vld [vmem:[%s7986_s3 + $0x2c] sm:$0xf] }
  0x54   : > { %1086 = vmatpush.bf16.msrb.mxu2 %v3898_v21  ;;  %v5547_v21 = vld [vmem:[%s7986_s3 + $0xcc] sm:$0xf]  ;;  %1153 = vmatpush.bf16.msra.mxu3 %v4082_v23  ;;  %v5529_v23 = vld [vmem:[%s7986_s3 + $0x34] sm:$0xf0] }
  0x55   : > { %v3958_v24 = vor.u32 %v5547_v21, %v3955_v22  ;;  %v3873_v22 = vld [vmem:[%s7986_s3 + $0x28] sm:$0xf] }
  0x56   : > { %1115 = vmatpush.bf16.msra.mxu0 %v3886_v38  ;;  %1129 = vmatpush.bf16.msra.mxu1 %v4014_v41  ;;  %v4067_v38 = vld [vmem:[%s7986_s3 + $0x1b8] sm:$0xf0]  ;;  %v3874_v25 = vor.u32 %v5529_v23, %v3873_v22 }
  0x57   : > { %v4070_v41 = vor.u32 %v5575_v35, %v4067_v38  ;;  %v3857_v38 = vld [vmem:[%s7986_s3 + $0x8] sm:$0xf] }
  0x5a   : > { %1116 = vmatpush.bf16.msra.mxu0 %v3870_v50  ;;  %1130 = vmatpush.bf16.msra.mxu1 %v3998_v53  ;;  %v3923_v50 = vld [vmem:[%s7986_s3 + $0x98] sm:$0xf0]  ;;  %v5571_v53 = vld [vmem:[%s7986_s3 + $0x18c] sm:$0xf] }
  0x5b   : > { %v3926_v52 = vor.u32 %v5539_v49, %v3923_v50  ;;  %v4054_v55 = vor.u32 %v5571_v53, %v4051_v54 }
  0x5d   : > { %3844 = vmatmul.msk.bf16.gmra.mxu0 %vm390_vm1, %v335_v33  ;;  %3846 = vmatmul.msk.bf16.gmra.mxu1 %vm390_vm1, %v335_v33  ;;  %v3882_v33 = vor.u32 %v5532_v31, %v3881_v30  ;;  %v4065_v30 = vld [vmem:[%s7986_s3 + $0x1a8] sm:$0xf]  ;;  %v5577_v31 = vld [vmem:[%s7986_s3 + $0x1b4] sm:$0xf0] }
  0x5e   : > { %1117 = vmatpush.bf16.msra.mxu0 %v3854_v62  ;;  %1131 = vmatpush.bf16.msra.mxu1 %v3982_v2  ;;  %v4066_v36 = vor.u32 %v5577_v31, %v4065_v30  ;;  %v5567_v2 = vld [vmem:[%s7986_s3 + $0x16c] sm:$0xf] }
  0x5f   : > { %1087 = vmatpush.bf16.msrb.mxu2 %v3882_v33  ;;  %v5543_v33 = vld [vmem:[%s7986_s3 + $0xac] sm:$0xf]  ;;  %v4038_v7 = vor.u32 %v5567_v2, %v4035_v3 }
  0x60   : > { %v3942_v37 = vor.u32 %v5543_v33, %v3939_v34  ;;  %1154 = vmatpush.bf16.msra.mxu3 %v4066_v36  ;;  %v5559_v33 = vld [vmem:[%s7986_s3 + $0x12c] sm:$0xf]  ;;  %v4003_v34 = vld [vmem:[%s7986_s3 + $0x138] sm:$0xf0] }
  0x62   : > { %1166 = vmatpush.bf16.msrb.mxu0 %v3974_v13  ;;  %1180 = vmatpush.bf16.msrb.mxu1 %v4102_v15  ;;  %v3890_v13 = vor.u32 %v5533_v9, %v3889_v8  ;;  %v5531_v15 = vld [vmem:[%s7986_s3 + $0x4c] sm:$0xf] }
  0x63   : > { %1088 = vmatpush.bf16.msrb.mxu2 %v3866_v45  ;;  %v5541_v45 = vld [vmem:[%s7986_s3 + $0x94] sm:$0xf0]  ;;  %v3894_v18 = vor.u32 %v5531_v15, %v3891_v16 }
  0x64   : > { %v3922_v47 = vor.u32 %v5541_v45, %v3921_v44  ;;  %1155 = vmatpush.bf16.msra.mxu3 %v4050_v51  ;;  %v3985_v44 = vld [vmem:[%s7986_s3 + $0x108] sm:$0xf]  ;;  %v5555_v51 = vld [vmem:[%s7986_s3 + $0x10c] sm:$0xf] }
  0x65   : > { %v3986_v49 = vor.u32 %v5557_v46, %v3985_v44  ;;  %v4411_v46 = vld [vmem:[%s7986_s3 + $0x3f0] sm:$0xf0] }
  0x66   : > { %1167 = vmatpush.bf16.msrb.mxu0 %v3958_v24  ;;  %1181 = vmatpush.bf16.msrb.mxu1 %v4086_v28  ;;  %v4001_v24 = vld [vmem:[%s7986_s3 + $0x128] sm:$0xf]  ;;  %v3875_v28 = vld [vmem:[%s7986_s3 + $0x38] sm:$0xf0] }
  0x67   : > { %1089 = vmatpush.bf16.msrb.mxu2 %v3850_v57  ;;  %v5537_v57 = vld [vmem:[%s7986_s3 + $0x74] sm:$0xf0]  ;;  %v4002_v31 = vor.u32 %v5561_v26, %v4001_v24 }
  0x68   : > { %v3906_v58 = vor.u32 %v5537_v57, %v3905_v56  ;;  %1156 = vmatpush.bf16.msra.mxu3 %v4034_v0 }
  0x6a   : > { %1168 = vmatpush.bf16.msrb.mxu0 %v3942_v37  ;;  %1182 = vmatpush.bf16.msrb.mxu1 %v4070_v41  ;;  %v4006_v37 = vor.u32 %v5559_v33, %v4003_v34  ;;  %v5525_v41 = vld [vmem:[%s7986_s3 + $0x14] sm:$0xf0]  ;;  %v5614_v33 = vld [vmem:[%s7986_s3 + $0x2e4] sm:$0xf]  ;;  %v4283_v34 = vld [vmem:[%s7986_s3 + $0x2f0] sm:$0xf0] }
  0x6b   : > { %1138 = vmatpush.bf16.msra.mxu2 %v3970_v6  ;;  %v3910_v6 = vor.u32 %v5535_v61, %v3907_v1  ;;  %v3858_v45 = vor.u32 %v5525_v41, %v3857_v38 }
  0x6c   : > { %1157 = vmatpush.bf16.msra.mxu3 %v4018_v17 }
  0x6e   : > { %1169 = vmatpush.bf16.msrb.mxu0 %v3926_v52  ;;  %1183 = vmatpush.bf16.msrb.mxu1 %v4054_v55  ;;  %v3987_v52 = vld [vmem:[%s7986_s3 + $0x118] sm:$0xf0] }
  0x6f   : > { %1139 = vmatpush.bf16.msra.mxu2 %v3954_v19  ;;  %v5563_v19 = vld [vmem:[%s7986_s3 + $0x14c] sm:$0xf]  ;;  %v3990_v53 = vor.u32 %v5555_v51, %v3987_v52  ;;  %v4265_v51 = vld [vmem:[%s7986_s3 + $0x2c0] sm:$0xf]  ;;  %v5612_v52 = vld [vmem:[%s7986_s3 + $0x2cc] sm:$0xf0] }
  0x70   : > { %v4022_v21 = vor.u32 %v5563_v19, %v4019_v20  ;;  %1158 = vmatpush.bf16.msra.mxu3 %v4002_v31 }
  0x72   : > { %1170 = vmatpush.bf16.msrb.mxu0 %v3910_v6  ;;  %1184 = vmatpush.bf16.msrb.mxu1 %v4038_v7 }
  0x73   : > { %1140 = vmatpush.bf16.msra.mxu2 %v3938_v32  ;;  %v3878_v32 = vor.u32 %v5527_v27, %v3875_v28 }
  0x74   : > { %1159 = vmatpush.bf16.msra.mxu3 %v3986_v49 }
  0x76   : > { %1171 = vmatpush.bf16.msrb.mxu0 %v3894_v18  ;;  %1185 = vmatpush.bf16.msrb.mxu1 %v4022_v21 }
  0x77   : > { %1141 = vmatpush.bf16.msra.mxu2 %v3922_v47  ;;  %v5523_v47 = vld [vmem:[%s7986_s3 + $0xc] sm:$0xf] }
  0x78   : > { %v3862_v50 = vor.u32 %v5523_v47, %v3859_v48 }
  0x7a   : > { %1172 = vmatpush.bf16.msrb.mxu0 %v3878_v32  ;;  %1186 = vmatpush.bf16.msrb.mxu1 %v4006_v37  ;;  %v5648_v32 = vld [vmem:[%s7986_s3 + $0x3ec] sm:$0xf0] }
  0x7b   : > { %1142 = vmatpush.bf16.msra.mxu2 %v3906_v58 }
  0x7e   : > { %1173 = vmatpush.bf16.msrb.mxu0 %v3862_v50  ;;  %1187 = vmatpush.bf16.msrb.mxu1 %v3990_v53  ;;  %v4286_v53 = vor.u32 %v5614_v33, %v4283_v34 }
  0x7f   : > { %1143 = vmatpush.bf16.msra.mxu2 %v3890_v13 }
  0x83   : > { %1144 = vmatpush.bf16.msra.mxu2 %v3874_v25 }
  0x87   : > { %1145 = vmatpush.bf16.msra.mxu2 %v3858_v45 }
  0xaa   : > { %v6444_v11 = vpop.f32.mrf.mxu0  ;;  %v6446_v12 = vpop.f32.mrf.mxu1 }
  0xb2   : > { %v6499_v39 = vpop.f32.mrf.mxu2  ;;  %v6501_v40 = vpop.f32.mrf.mxu3 }
  0xb3   : > { %v6503_v42 = vpop.f32.mrf.mxu0  ;;  %v6505_v43 = vpop.f32.mrf.mxu1  ;;  %v639_v58 = vrot.slane %v6499_v39, 1  ;;  %v642_v59 = vrot.slane %v6501_v40, 1 }
  0xba   : > { %v6546_v62 = vpop.f32.mrf.mxu2  ;;  %v6548_v63 = vpop.f32.mrf.mxu3 }
  0xbb   : > { %v418_v4 = vpop.f32.mrf.mxu0  ;;  %v435_v5 = vpop.f32.mrf.mxu1  ;;  %v640_v60 = vrot.slane %v6546_v62, 1  ;;  %v643_v61 = vrot.slane %v6548_v63, 1  ;;  %v682_v62 = vld [vmem:[%s7985_s2] sm:$0x3] }
  0xbc   : > { %v684_v16 = vperm.slane %v682_v62, 0  ;;  %v685_v18 = vperm.slane %v682_v62, 1 }
  0xbd   : > { %v641_v4 = vsel %vm638_vm2, %v639_v58, %v640_v60  ;;  %v644_v5 = vsel %vm638_vm2, %v642_v59, %v643_v61  ;;  %v4267_v58 = vld [vmem:[%s7986_s3 + $0x2d0] sm:$0xf0]  ;;  %v5642_v59 = vld [vmem:[%s7986_s3 + $0x3c4] sm:$0xf] }
  0xbe   : > { %v653_v9 = vadd.f32 %v641_v4, %v6444_v11  ;;  %v654_v10 = vadd.f32 %v644_v5, %v6446_v12  ;;  %v4377_v5 = vld [vmem:[%s7986_s3 + $0x3a0] sm:$0xf] }
  0xc2   : > { %v513_v29 = vpop.f32.mrf.mxu2  ;;  %v531_v30 = vpop.f32.mrf.mxu3 }
  0xc3   : > { %v419_v35 = vpop.f32.mrf.mxu0  ;;  %v436_v36 = vpop.f32.mrf.mxu1  ;;  %v645_v6 = vrot.slane %v513_v29, 1  ;;  %v647_v7 = vrot.slane %v531_v30, 1  ;;  %v4281_v29 = vld [vmem:[%s7986_s3 + $0x2e0] sm:$0xf] }
  0xc4   : > { %v5646_v35 = vld [vmem:[%s7986_s3 + $0x3e4] sm:$0xf] }
  0xc5   : > { %v646_v13 = vsel %vm638_vm2, %v640_v60, %v645_v6  ;;  %v648_v14 = vsel %vm638_vm2, %v643_v61, %v647_v7  ;;  %v4395_v60 = vld [vmem:[%s7986_s3 + $0x3d0] sm:$0xf0]  ;;  %v4266_v61 = vor.u32 %v5612_v52, %v4265_v51  ;;  %v5640_v6 = vld [vmem:[%s7986_s3 + $0x3ac] sm:$0xf0]  ;;  %v5606_v7 = vld [vmem:[%s7986_s3 + $0x2a4] sm:$0xf] }
  0xc6   : > { %v655_v23 = vadd.f32 %v646_v13, %v6503_v42  ;;  %v656_v24 = vadd.f32 %v648_v14, %v6505_v43  ;;  %v5616_v42 = vld [vmem:[%s7986_s3 + $0x2ec] sm:$0xf0]  ;;  %v4409_v43 = vld [vmem:[%s7986_s3 + $0x3e0] sm:$0xf]  ;;  %v4398_v4 = vor.u32 %v5642_v59, %v4395_v60 }
  0xc7   : > { %v4282_v49 = vor.u32 %v5616_v42, %v4281_v29  ;;  %v4410_v50 = vor.u32 %v5648_v32, %v4409_v43  ;;  %v5630_v29 = vld [vmem:[%s7986_s3 + $0x364] sm:$0xf]  ;;  %v4201_v43 = vld [vmem:[%s7986_s3 + $0x240] sm:$0xf]  ;;  %v5596_v32 = vld [vmem:[%s7986_s3 + $0x24c] sm:$0xf0] }
  0xc8   : > { %v4169_v59 = vld [vmem:[%s7986_s3 + $0x200] sm:$0xf] }
  0xca   : > { %v515_v54 = vpop.f32.mrf.mxu2  ;;  %v533_v55 = vpop.f32.mrf.mxu3 }
  0xcb   : > { %v605_v56 = vpop.f32.mrf.mxu0  ;;  %v623_v57 = vpop.f32.mrf.mxu1  ;;  %v4414_v54 = vor.u32 %v5646_v35, %v4411_v46  ;;  %v4393_v55 = vld [vmem:[%s7986_s3 + $0x3c0] sm:$0xf] }
  0xcc   : > { %v664_v8 = vrot.slane %v605_v56, 2  ;;  %v667_v39 = vrot.slane %v623_v57, 2  ;;  %v5644_v56 = vld [vmem:[%s7986_s3 + $0x3cc] sm:$0xf0]  ;;  %v5610_v57 = vld [vmem:[%s7986_s3 + $0x2c4] sm:$0xf] }
  0xcd   : > { %v4329_v35 = vld [vmem:[%s7986_s3 + $0x340] sm:$0xf] }
  0xd3   : > { %v607_v0 = vpop.f32.mrf.mxu0  ;;  %v625_v1 = vpop.f32.mrf.mxu1 }
  0xd4   : > { %v665_v2 = vrot.slane %v607_v0, 2  ;;  %v668_v3 = vrot.slane %v625_v1, 2  ;;  %v4394_v0 = vor.u32 %v5644_v56, %v4393_v55  ;;  %v4249_v1 = vld [vmem:[%s7986_s3 + $0x2a0] sm:$0xf]  ;;  %v5590_v55 = vld [vmem:[%s7986_s3 + $0x224] sm:$0xf] }
  0xd5   : > { %v4187_v56 = vld [vmem:[%s7986_s3 + $0x230] sm:$0xf0] }
  0xd6   : > { %v666_v40 = vsel %vm663_vm3, %v664_v8, %v665_v2  ;;  %v669_v63 = vsel %vm663_vm3, %v667_v39, %v668_v3  ;;  %v4251_v8 = vld [vmem:[%s7986_s3 + $0x2b0] sm:$0xf0]  ;;  %v5638_v39 = vld [vmem:[%s7986_s3 + $0x3a4] sm:$0xf] }
  0xd7   : > { %v678_v15 = vadd.f32 %v666_v40, %v653_v9  ;;  %v679_v17 = vadd.f32 %v669_v63, %v654_v10  ;;  %v4379_v40 = vld [vmem:[%s7986_s3 + $0x3b0] sm:$0xf0]  ;;  %v4378_v63 = vor.u32 %v5640_v6, %v4377_v5  ;;  %v4233_v9 = vld [vmem:[%s7986_s3 + $0x280] sm:$0xf]  ;;  %v5604_v10 = vld [vmem:[%s7986_s3 + $0x28c] sm:$0xf0]  ;;  %v4254_v13 = vor.u32 %v5606_v7, %v4251_v8 }
  0xd8   : > { %v4382_v14 = vor.u32 %v5638_v39, %v4379_v40  ;;  %v5586_v5 = vld [vmem:[%s7986_s3 + $0x204] sm:$0xf]  ;;  %v4171_v6 = vld [vmem:[%s7986_s3 + $0x210] sm:$0xf0]  ;;  %v4289_v39 = vld [vmem:[%s7986_s3 + $0x2e8] sm:$0xf] }
  0xd9   : > { %v688_v25 = vadd.f32 %v684_v16, %v678_v15  ;;  %v689_v26 = vadd.f32 %v685_v18, %v679_v17  ;;  %v4361_v15 = vld [vmem:[%s7986_s3 + $0x380] sm:$0xf]  ;;  %v5602_v17 = vld [vmem:[%s7986_s3 + $0x284] sm:$0xf]  ;;  %v4299_v8 = vld [vmem:[%s7986_s3 + $0x310] sm:$0xf0] }
  0xda   : > { %v5618_v7 = vld [vmem:[%s7986_s3 + $0x304] sm:$0xf]  ;;  %v5617_v40 = vld [vmem:[%s7986_s3 + $0x2f4] sm:$0xf0] }
  0xdb   : > { %v610_v19 = vpop.f32.mrf.mxu0  ;;  %v628_v20 = vpop.f32.mrf.mxu1  ;;  %v692_v36 = vmax.f32 %v688_v25, 0.0  ;;  %v693_v37 = vmax.f32 %v689_v26, 0.0  ;;  %v4345_v25 = vld [vmem:[%s7986_s3 + $0x360] sm:$0xf]  ;;  %v5632_v26 = vld [vmem:[%s7986_s3 + $0x36c] sm:$0xf0] }
  0xdc   : > { %v670_v21 = vrot.slane %v610_v19, 2  ;;  %v672_v22 = vrot.slane %v628_v20, 2  ;;  %v5634_v19 = vld [vmem:[%s7986_s3 + $0x384] sm:$0xf]  ;;  %v4363_v20 = vld [vmem:[%s7986_s3 + $0x390] sm:$0xf0]  ;;  %v4346_v42 = vor.u32 %v5632_v26, %v4345_v25 }
  0xdd   : > { %v5611_v25 = vld [vmem:[%s7986_s3 + $0x2cc] sm:$0xf]  ;;  %v4275_v26 = vld [vmem:[%s7986_s3 + $0x2d8] sm:$0xf0] }
  0xde   : > { %v671_v11 = vsel %vm663_vm3, %v665_v2, %v670_v21  ;;  %v673_v12 = vsel %vm663_vm3, %v668_v3, %v672_v22  ;;  %v5608_v2 = vld [vmem:[%s7986_s3 + $0x2ac] sm:$0xf0]  ;;  %v4270_v3 = vor.u32 %v5610_v57, %v4267_v58  ;;  %v4234_v21 = vor.u32 %v5604_v10, %v4233_v9  ;;  %v5622_v57 = vld [vmem:[%s7986_s3 + $0x324] sm:$0xf]  ;;  %v4315_v58 = vld [vmem:[%s7986_s3 + $0x330] sm:$0xf0] }
  0xdf   : > { %v680_v27 = vadd.f32 %v671_v11, %v655_v23  ;;  %v681_v28 = vadd.f32 %v673_v12, %v656_v24  ;;  %v4250_v62 = vor.u32 %v5608_v2, %v4249_v1  ;;  %v4217_v23 = vld [vmem:[%s7986_s3 + $0x260] sm:$0xf]  ;;  %v5600_v24 = vld [vmem:[%s7986_s3 + $0x26c] sm:$0xf0]  ;;  %v4366_v12 = vor.u32 %v5634_v19, %v4363_v20  ;;  %v5615_v9 = vld [vmem:[%s7986_s3 + $0x2ec] sm:$0xf] }
  0xe0   : > { %v4297_v1 = vld [vmem:[%s7986_s3 + $0x300] sm:$0xf]  ;;  %v5620_v2 = vld [vmem:[%s7986_s3 + $0x30c] sm:$0xf0]  ;;  %v4290_v19 = vor.u32 %v5617_v40, %v4289_v39  ;;  %v4209_v39 = vld [vmem:[%s7986_s3 + $0x248] sm:$0xf] }
  0xe1   : > { %v690_v30 = vadd.f32 %v684_v16, %v680_v27  ;;  %v691_v31 = vadd.f32 %v685_v18, %v681_v28  ;;  %v5636_v16 = vld [vmem:[%s7986_s3 + $0x38c] sm:$0xf0]  ;;  %v4235_v18 = vld [vmem:[%s7986_s3 + $0x290] sm:$0xf0]  ;;  %v5598_v27 = vld [vmem:[%s7986_s3 + $0x264] sm:$0xf] }
  0xe2   : > { %v4362_v22 = vor.u32 %v5636_v16, %v4361_v15  ;;  %v4238_v11 = vor.u32 %v5602_v17, %v4235_v18  ;;  %v4219_v28 = vld [vmem:[%s7986_s3 + $0x270] sm:$0xf0]  ;;  %v5647_v15 = vld [vmem:[%s7986_s3 + $0x3ec] sm:$0xf]  ;;  %v4419_v16 = vld [vmem:[%s7986_s3 + $0x3f8] sm:$0xf0]  ;;  %v4174_v17 = vor.u32 %v5586_v5, %v4171_v6  ;;  %v4302_v18 = vor.u32 %v5618_v7, %v4299_v8 }
  0xe3   : > { %v694_v38 = vmax.f32 %v690_v30, 0.0  ;;  %v695_v41 = vmax.f32 %v691_v31, 0.0  ;;  %v612_v44 = vpop.f32.mrf.mxu0  ;;  %v630_v45 = vpop.f32.mrf.mxu1  ;;  %v4347_v30 = vld [vmem:[%s7986_s3 + $0x370] sm:$0xf0]  ;;  %v4218_v31 = vor.u32 %v5600_v24, %v4217_v23  ;;  %v4222_v33 = vor.u32 %v5598_v27, %v4219_v28  ;;  %v5643_v27 = vld [vmem:[%s7986_s3 + $0x3cc] sm:$0xf] }
  0xe4   : > { %v4350_v34 = vor.u32 %v5630_v29, %v4347_v30  ;;  %v4331_v44 = vld [vmem:[%s7986_s3 + $0x350] sm:$0xf0]  ;;  %v4202_v45 = vor.u32 %v5596_v32, %v4201_v43  ;;  %v4422_v24 = vor.u32 %v5647_v15, %v4419_v16  ;;  %v4403_v28 = vld [vmem:[%s7986_s3 + $0x3d8] sm:$0xf0]  ;;  %v4278_v43 = vor.u32 %v5611_v25, %v4275_v26  ;;  %v5631_v5 = vld [vmem:[%s7986_s3 + $0x36c] sm:$0xf] }
  0xe5   : > { %v6674_v47 = vpack.c.bf16 %v694_v38, %v692_v36  ;;  %v6676_v48 = vpack.c.bf16 %v695_v41, %v693_v37  ;;  %v5628_v36 = vld [vmem:[%s7986_s3 + $0x34c] sm:$0xf0]  ;;  %v5594_v37 = vld [vmem:[%s7986_s3 + $0x244] sm:$0xf]  ;;  %v4203_v38 = vld [vmem:[%s7986_s3 + $0x250] sm:$0xf0]  ;;  %v4406_v32 = vor.u32 %v5643_v27, %v4403_v28 }
  0xe6   : > { %v5626_v41 = vld [vmem:[%s7986_s3 + $0x344] sm:$0xf]  ;;  %v4330_v46 = vor.u32 %v5628_v36, %v4329_v35  ;;  %v4206_v51 = vor.u32 %v5594_v37, %v4203_v38  ;;  %v5607_v35 = vld [vmem:[%s7986_s3 + $0x2ac] sm:$0xf]  ;;  %v4259_v36 = vld [vmem:[%s7986_s3 + $0x2b8] sm:$0xf0] }
  0xe7   : > { %1090 = vmatmul.bf16.vlgmr.msrb.gmra.mxu2 %v6674_v47  ;;  %1104 = vmatmul.bf16.vlgmr.msrb.gmra.mxu3 %v6676_v48  ;;  %v4334_v52 = vor.u32 %v5626_v41, %v4331_v44  ;;  %v5639_v37 = vld [vmem:[%s7986_s3 + $0x3ac] sm:$0xf]  ;;  %v4387_v38 = vld [vmem:[%s7986_s3 + $0x3b8] sm:$0xf0]  ;;  %v5597_v40 = vld [vmem:[%s7986_s3 + $0x254] sm:$0xf0] }
  0xe8   : > { %1118 = vmatmul.bf16.vlgmr.msra.gmra.mxu0 %v6674_v47  ;;  %1132 = vmatmul.bf16.vlgmr.msra.gmra.mxu1 %v6676_v48  ;;  %v4355_v6 = vld [vmem:[%s7986_s3 + $0x378] sm:$0xf0]  ;;  %v5627_v15 = vld [vmem:[%s7986_s3 + $0x34c] sm:$0xf]  ;;  %v4177_v27 = vld [vmem:[%s7986_s3 + $0x208] sm:$0xf] }
  0xe9   : > { %1579 = vmatpush.bf16.msrb.mxu2 %v4282_v49  ;;  %1593 = vmatpush.bf16.msrb.mxu3 %v4410_v50  ;;  %v4185_v49 = vld [vmem:[%s7986_s3 + $0x220] sm:$0xf]  ;;  %v5592_v50 = vld [vmem:[%s7986_s3 + $0x22c] sm:$0xf0]  ;;  %v4339_v16 = vld [vmem:[%s7986_s3 + $0x358] sm:$0xf0] }
  0xea   : > { %1607 = vmatpush.bf16.msra.mxu0 %v4286_v53  ;;  %1621 = vmatpush.bf16.msra.mxu1 %v4414_v54  ;;  %v4313_v53 = vld [vmem:[%s7986_s3 + $0x320] sm:$0xf]  ;;  %v5624_v54 = vld [vmem:[%s7986_s3 + $0x32c] sm:$0xf0]  ;;  %v4186_v60 = vor.u32 %v5592_v50, %v4185_v49  ;;  %v4262_v49 = vor.u32 %v5607_v35, %v4259_v36  ;;  %v4390_v50 = vor.u32 %v5639_v37, %v4387_v38  ;;  %v5623_v25 = vld [vmem:[%s7986_s3 + $0x32c] sm:$0xf] }
  0xeb   : > { %v4323_v26 = vld [vmem:[%s7986_s3 + $0x338] sm:$0xf0]  ;;  %v5619_v35 = vld [vmem:[%s7986_s3 + $0x30c] sm:$0xf]  ;;  %v4601_v37 = vld [vmem:[%s7986_s3 + $0x4e0] sm:$0xf] }
  0xec   : > { %v4307_v36 = vld [vmem:[%s7986_s3 + $0x318] sm:$0xf0]  ;;  %v5680_v38 = vld [vmem:[%s7986_s3 + $0x4ec] sm:$0xf0] }
  0xed   : > { %1580 = vmatpush.bf16.msrb.mxu2 %v4266_v61  ;;  %1594 = vmatpush.bf16.msrb.mxu3 %v4394_v0  ;;  %v4314_v61 = vor.u32 %v5624_v54, %v4313_v53  ;;  %v5588_v0 = vld [vmem:[%s7986_s3 + $0x20c] sm:$0xf0]  ;;  %v5603_v53 = vld [vmem:[%s7986_s3 + $0x28c] sm:$0xf]  ;;  %v4243_v54 = vld [vmem:[%s7986_s3 + $0x298] sm:$0xf0] }
  0xee   : > { %1608 = vmatpush.bf16.msra.mxu0 %v4270_v3  ;;  %1622 = vmatpush.bf16.msra.mxu1 %v4398_v4  ;;  %v4190_v3 = vor.u32 %v5590_v55, %v4187_v56  ;;  %v4318_v4 = vor.u32 %v5622_v57, %v4315_v58  ;;  %v4170_v10 = vor.u32 %v5588_v0, %v4169_v59  ;;  %v5635_v55 = vld [vmem:[%s7986_s3 + $0x38c] sm:$0xf]  ;;  %v4371_v56 = vld [vmem:[%s7986_s3 + $0x398] sm:$0xf0]  ;;  %v4225_v59 = vld [vmem:[%s7986_s3 + $0x268] sm:$0xf] }
  0xef   : > { %v4374_v0 = vor.u32 %v5635_v55, %v4371_v56  ;;  %v4602_v55 = vor.u32 %v5680_v38, %v4601_v37  ;;  %v4521_v37 = vld [vmem:[%s7986_s3 + $0x440] sm:$0xf]  ;;  %v5660_v38 = vld [vmem:[%s7986_s3 + $0x44c] sm:$0xf0] }
  0xf1   : > { %1581 = vmatpush.bf16.msrb.mxu2 %v4250_v62  ;;  %1595 = vmatpush.bf16.msrb.mxu3 %v4378_v63  ;;  %v4417_v62 = vld [vmem:[%s7986_s3 + $0x3e8] sm:$0xf]  ;;  %v5649_v63 = vld [vmem:[%s7986_s3 + $0x3f4] sm:$0xf0] }
  0xf2   : > { %1609 = vmatpush.bf16.msra.mxu0 %v4254_v13  ;;  %1623 = vmatpush.bf16.msra.mxu1 %v4382_v14  ;;  %v4298_v13 = vor.u32 %v5620_v2, %v4297_v1  ;;  %v4291_v14 = vld [vmem:[%s7986_s3 + $0x2f8] sm:$0xf0]  ;;  %v4418_v20 = vor.u32 %v5649_v63, %v4417_v62  ;;  %v4353_v1 = vld [vmem:[%s7986_s3 + $0x368] sm:$0xf]  ;;  %v5633_v2 = vld [vmem:[%s7986_s3 + $0x374] sm:$0xf0]  ;;  %v4358_v63 = vor.u32 %v5631_v5, %v4355_v6 }
  0xf3   : > { %v4294_v23 = vor.u32 %v5615_v9, %v4291_v14  ;;  %v4354_v8 = vor.u32 %v5633_v2, %v4353_v1  ;;  %v4337_v9 = vld [vmem:[%s7986_s3 + $0x348] sm:$0xf]  ;;  %v4211_v14 = vld [vmem:[%s7986_s3 + $0x258] sm:$0xf0]  ;;  %v5674_v1 = vld [vmem:[%s7986_s3 + $0x4c4] sm:$0xf] }
  0xf4   : > { %v4587_v2 = vld [vmem:[%s7986_s3 + $0x4d0] sm:$0xf0] }
  0xf5   : > { %1582 = vmatpush.bf16.msrb.mxu2 %v4234_v21  ;;  %1596 = vmatpush.bf16.msrb.mxu3 %v4362_v22  ;;  %v4273_v21 = vld [vmem:[%s7986_s3 + $0x2c8] sm:$0xf]  ;;  %v5613_v22 = vld [vmem:[%s7986_s3 + $0x2d4] sm:$0xf0] }
  0xf6   : > { %1610 = vmatpush.bf16.msra.mxu0 %v4238_v11  ;;  %1624 = vmatpush.bf16.msra.mxu1 %v4366_v12  ;;  %v4401_v11 = vld [vmem:[%s7986_s3 + $0x3c8] sm:$0xf]  ;;  %v5645_v12 = vld [vmem:[%s7986_s3 + $0x3d4] sm:$0xf0]  ;;  %v4274_v29 = vor.u32 %v5613_v22, %v4273_v21  ;;  %v4342_v22 = vor.u32 %v5627_v15, %v4339_v16 }
  0xf7   : > { %1146 = vmatmul.bf16.vlgmr.msra.gmra.mxu2 %v6674_v47  ;;  %1160 = vmatmul.bf16.vlgmr.msra.gmra.mxu3 %v6676_v48  ;;  %v4402_v30 = vor.u32 %v5645_v12, %v4401_v11  ;;  %v5591_v11 = vld [vmem:[%s7986_s3 + $0x22c] sm:$0xf]  ;;  %v4195_v12 = vld [vmem:[%s7986_s3 + $0x238] sm:$0xf0] }
  0xf8   : > { %1174 = vmatmul.bf16.vlgmr.msrb.gmra.mxu0 %v6674_v47  ;;  %1188 = vmatmul.bf16.vlgmr.msrb.gmra.mxu1 %v6676_v48 }
  0xf9   : > { %1583 = vmatpush.bf16.msrb.mxu2 %v4218_v31  ;;  %1597 = vmatpush.bf16.msrb.mxu3 %v4346_v42  ;;  %v4257_v31 = vld [vmem:[%s7986_s3 + $0x2a8] sm:$0xf]  ;;  %v5609_v42 = vld [vmem:[%s7986_s3 + $0x2b4] sm:$0xf0] }
  0xfa   : > { %1611 = vmatpush.bf16.msra.mxu0 %v4222_v33  ;;  %1625 = vmatpush.bf16.msra.mxu1 %v4350_v34  ;;  %v4385_v33 = vld [vmem:[%s7986_s3 + $0x3a8] sm:$0xf]  ;;  %v5641_v34 = vld [vmem:[%s7986_s3 + $0x3b4] sm:$0xf0]  ;;  %v4258_v41 = vor.u32 %v5609_v42, %v4257_v31 }
  0xfb   : > { %v4386_v44 = vor.u32 %v5641_v34, %v4385_v33  ;;  %v4305_v31 = vld [vmem:[%s7986_s3 + $0x308] sm:$0xf]  ;;  %v5621_v42 = vld [vmem:[%s7986_s3 + $0x314] sm:$0xf0]  ;;  %v5587_v33 = vld [vmem:[%s7986_s3 + $0x20c] sm:$0xf] }
  0xfc   : > { %v4179_v34 = vld [vmem:[%s7986_s3 + $0x218] sm:$0xf0] }
  0xfd   : > { %1584 = vmatpush.bf16.msrb.mxu2 %v4202_v45  ;;  %1598 = vmatpush.bf16.msrb.mxu3 %v4330_v46  ;;  %v4241_v45 = vld [vmem:[%s7986_s3 + $0x288] sm:$0xf]  ;;  %v5605_v46 = vld [vmem:[%s7986_s3 + $0x294] sm:$0xf0] }
  0xfe   : > { %1612 = vmatpush.bf16.msra.mxu0 %v4206_v51  ;;  %1626 = vmatpush.bf16.msra.mxu1 %v4334_v52  ;;  %v4369_v51 = vld [vmem:[%s7986_s3 + $0x388] sm:$0xf]  ;;  %v5637_v52 = vld [vmem:[%s7986_s3 + $0x394] sm:$0xf0]  ;;  %v4242_v57 = vor.u32 %v5605_v46, %v4241_v45  ;;  %v5678_v45 = vld [vmem:[%s7986_s3 + $0x4e4] sm:$0xf] }
  0xff   : > { %v4370_v58 = vor.u32 %v5637_v52, %v4369_v51  ;;  %v5710_v51 = vld [vmem:[%s7986_s3 + $0x5e4] sm:$0xf]  ;;  %v4731_v52 = vld [vmem:[%s7986_s3 + $0x5f0] sm:$0xf0] }
 0x101   : > { %1585 = vmatpush.bf16.msrb.mxu2 %v4186_v60  ;;  %1599 = vmatpush.bf16.msrb.mxu3 %v4314_v61  ;;  %v5601_v60 = vld [vmem:[%s7986_s3 + $0x274] sm:$0xf0]  ;;  %v4246_v61 = vor.u32 %v5603_v53, %v4243_v54  ;;  %v4182_v53 = vor.u32 %v5587_v33, %v4179_v34  ;;  %v4310_v54 = vor.u32 %v5619_v35, %v4307_v36  ;;  %v5694_v33 = vld [vmem:[%s7986_s3 + $0x564] sm:$0xf]  ;;  %v4667_v34 = vld [vmem:[%s7986_s3 + $0x570] sm:$0xf0] }
 0x102   : > { %1613 = vmatpush.bf16.msra.mxu0 %v4190_v3  ;;  %1627 = vmatpush.bf16.msra.mxu1 %v4318_v4  ;;  %v5599_v3 = vld [vmem:[%s7986_s3 + $0x26c] sm:$0xf]  ;;  %v4227_v4 = vld [vmem:[%s7986_s3 + $0x278] sm:$0xf0]  ;;  %v4226_v7 = vor.u32 %v5601_v60, %v4225_v59  ;;  %v4734_v60 = vor.u32 %v5710_v51, %v4731_v52  ;;  %v5690_v51 = vld [vmem:[%s7986_s3 + $0x544] sm:$0xf] }
 0x103   : > { %v4230_v62 = vor.u32 %v5599_v3, %v4227_v4  ;;  %v5706_v3 = vld [vmem:[%s7986_s3 + $0x5c4] sm:$0xf]  ;;  %v4715_v4 = vld [vmem:[%s7986_s3 + $0x5d0] sm:$0xf0] }
 0x104   : > { %v4651_v52 = vld [vmem:[%s7986_s3 + $0x550] sm:$0xf0] }
 0x105   : > { %1586 = vmatpush.bf16.msrb.mxu2 %v4170_v10  ;;  %1600 = vmatpush.bf16.msrb.mxu3 %v4298_v13  ;;  %v5629_v10 = vld [vmem:[%s7986_s3 + $0x354] sm:$0xf0]  ;;  %v5595_v13 = vld [vmem:[%s7986_s3 + $0x24c] sm:$0xf] }
 0x106   : > { %1614 = vmatpush.bf16.msra.mxu0 %v4174_v17  ;;  %1628 = vmatpush.bf16.msra.mxu1 %v4302_v18  ;;  %v4210_v17 = vor.u32 %v5597_v40, %v4209_v39  ;;  %v4338_v18 = vor.u32 %v5629_v10, %v4337_v9  ;;  %v4214_v21 = vor.u32 %v5595_v13, %v4211_v14  ;;  %v5670_v9 = vld [vmem:[%s7986_s3 + $0x4a4] sm:$0xf]  ;;  %v4571_v10 = vld [vmem:[%s7986_s3 + $0x4b0] sm:$0xf0] }
 0x107   : > { %v4590_v39 = vor.u32 %v5674_v1, %v4587_v2  ;;  %v4718_v40 = vor.u32 %v5706_v3, %v4715_v4  ;;  %v5702_v13 = vld [vmem:[%s7986_s3 + $0x5a4] sm:$0xf]  ;;  %v4699_v14 = vld [vmem:[%s7986_s3 + $0x5b0] sm:$0xf0]  ;;  %v4489_v3 = vld [vmem:[%s7986_s3 + $0x400] sm:$0xf] }
 0x108   : > { %1587 = vmatmul.bf16.vlgmr.msrb.gmra.mxu2 %v6674_v47  ;;  %1601 = vmatmul.bf16.vlgmr.msrb.gmra.mxu3 %v6676_v48  ;;  %v5686_v1 = vld [vmem:[%s7986_s3 + $0x524] sm:$0xf]  ;;  %v4635_v2 = vld [vmem:[%s7986_s3 + $0x530] sm:$0xf0] }
 0x109   : > { %1635 = vmatpush.bf16.msra.mxu2 %v4290_v19  ;;  %1649 = vmatpush.bf16.msra.mxu3 %v4418_v20  ;;  %v4193_v19 = vld [vmem:[%s7986_s3 + $0x228] sm:$0xf]  ;;  %v5593_v20 = vld [vmem:[%s7986_s3 + $0x234] sm:$0xf0] }
 0x10a   : > { %1663 = vmatpush.bf16.msrb.mxu0 %v4294_v23  ;;  %1677 = vmatpush.bf16.msrb.mxu1 %v4422_v24  ;;  %v4321_v23 = vld [vmem:[%s7986_s3 + $0x328] sm:$0xf]  ;;  %v5625_v24 = vld [vmem:[%s7986_s3 + $0x334] sm:$0xf0]  ;;  %v4194_v28 = vor.u32 %v5593_v20, %v4193_v19  ;;  %v4574_v19 = vor.u32 %v5670_v9, %v4571_v10  ;;  %v4702_v20 = vor.u32 %v5702_v13, %v4699_v14  ;;  %v5682_v9 = vld [vmem:[%s7986_s3 + $0x504] sm:$0xf] }
 0x10b   : > { %1615 = vmatmul.bf16.vlgmr.msra.gmra.mxu0 %v6674_v47  ;;  %1629 = vmatmul.bf16.vlgmr.msra.gmra.mxu1 %v6676_v48  ;;  %v4619_v10 = vld [vmem:[%s7986_s3 + $0x510] sm:$0xf0]  ;;  %v4609_v13 = vld [vmem:[%s7986_s3 + $0x4e8] sm:$0xf]  ;;  %v5681_v14 = vld [vmem:[%s7986_s3 + $0x4f4] sm:$0xf0] }
 0x10d   : > { %1636 = vmatpush.bf16.msra.mxu2 %v4274_v29  ;;  %1650 = vmatpush.bf16.msra.mxu3 %v4402_v30  ;;  %v4322_v29 = vor.u32 %v5625_v24, %v4321_v23  ;;  %v5589_v30 = vld [vmem:[%s7986_s3 + $0x214] sm:$0xf0]  ;;  %v5666_v23 = vld [vmem:[%s7986_s3 + $0x484] sm:$0xf]  ;;  %v4555_v24 = vld [vmem:[%s7986_s3 + $0x490] sm:$0xf0] }
 0x10e   : > { %1664 = vmatpush.bf16.msrb.mxu0 %v4278_v43  ;;  %1678 = vmatpush.bf16.msrb.mxu1 %v4406_v32  ;;  %v4198_v43 = vor.u32 %v5591_v11, %v4195_v12  ;;  %v4326_v32 = vor.u32 %v5623_v25, %v4323_v26  ;;  %v4178_v46 = vor.u32 %v5589_v30, %v4177_v27  ;;  %v5698_v11 = vld [vmem:[%s7986_s3 + $0x584] sm:$0xf]  ;;  %v4683_v12 = vld [vmem:[%s7986_s3 + $0x590] sm:$0xf0]  ;;  %v4537_v27 = vld [vmem:[%s7986_s3 + $0x460] sm:$0xf] }
 0x10f   : > { %v4686_v30 = vor.u32 %v5698_v11, %v4683_v12  ;;  %v4610_v11 = vor.u32 %v5681_v14, %v4609_v13  ;;  %v4529_v13 = vld [vmem:[%s7986_s3 + $0x448] sm:$0xf]  ;;  %v5661_v14 = vld [vmem:[%s7986_s3 + $0x454] sm:$0xf0] }
 0x111   : > { %1637 = vmatpush.bf16.msra.mxu2 %v4258_v41  ;;  %1651 = vmatpush.bf16.msra.mxu3 %v4386_v44  ;;  %v4729_v41 = vld [vmem:[%s7986_s3 + $0x5e0] sm:$0xf]  ;;  %v5712_v44 = vld [vmem:[%s7986_s3 + $0x5ec] sm:$0xf0] }
 0x112   : > { %1665 = vmatpush.bf16.msrb.mxu0 %v4262_v49  ;;  %1679 = vmatpush.bf16.msrb.mxu1 %v4390_v50  ;;  %v4306_v49 = vor.u32 %v5621_v42, %v4305_v31  ;;  %v4603_v50 = vld [vmem:[%s7986_s3 + $0x4f0] sm:$0xf0]  ;;  %v4730_v56 = vor.u32 %v5712_v44, %v4729_v41  ;;  %v4665_v31 = vld [vmem:[%s7986_s3 + $0x560] sm:$0xf]  ;;  %v5696_v42 = vld [vmem:[%s7986_s3 + $0x56c] sm:$0xf0]  ;;  %v4670_v44 = vor.u32 %v5694_v33, %v4667_v34 }
 0x113   : > { %v4606_v59 = vor.u32 %v5678_v45, %v4603_v50  ;;  %v4666_v36 = vor.u32 %v5696_v42, %v4665_v31  ;;  %v4649_v45 = vld [vmem:[%s7986_s3 + $0x540] sm:$0xf]  ;;  %v4523_v50 = vld [vmem:[%s7986_s3 + $0x450] sm:$0xf0]  ;;  %v5675_v31 = vld [vmem:[%s7986_s3 + $0x4cc] sm:$0xf] }
 0x114   : > { %v4595_v42 = vld [vmem:[%s7986_s3 + $0x4d8] sm:$0xf0] }
 0x115   : > { %1638 = vmatpush.bf16.msra.mxu2 %v4242_v57  ;;  %1652 = vmatpush.bf16.msra.mxu3 %v4370_v58  ;;  %v4585_v57 = vld [vmem:[%s7986_s3 + $0x4c0] sm:$0xf]  ;;  %v5676_v58 = vld [vmem:[%s7986_s3 + $0x4cc] sm:$0xf0] }
 0x116   : > { %1666 = vmatpush.bf16.msrb.mxu0 %v4246_v61  ;;  %1680 = vmatpush.bf16.msrb.mxu1 %v4374_v0  ;;  %v4713_v61 = vld [vmem:[%s7986_s3 + $0x5c0] sm:$0xf]  ;;  %v5708_v0 = vld [vmem:[%s7986_s3 + $0x5cc] sm:$0xf0]  ;;  %v4586_v5 = vor.u32 %v5676_v58, %v4585_v57  ;;  %v4654_v58 = vor.u32 %v5690_v51, %v4651_v52 }
 0x117   : > { %v4714_v6 = vor.u32 %v5708_v0, %v4713_v61  ;;  %v5654_v61 = vld [vmem:[%s7986_s3 + $0x424] sm:$0xf]  ;;  %v4507_v0 = vld [vmem:[%s7986_s3 + $0x430] sm:$0xf0] }
 0x119   : > { %1639 = vmatpush.bf16.msra.mxu2 %v4226_v7  ;;  %1653 = vmatpush.bf16.msra.mxu3 %v4354_v8  ;;  %v4569_v7 = vld [vmem:[%s7986_s3 + $0x4a0] sm:$0xf]  ;;  %v5672_v8 = vld [vmem:[%s7986_s3 + $0x4ac] sm:$0xf0] }
 0x11a   : > { %1667 = vmatpush.bf16.msrb.mxu0 %v4230_v62  ;;  %1681 = vmatpush.bf16.msrb.mxu1 %v4358_v63  ;;  %v4697_v62 = vld [vmem:[%s7986_s3 + $0x5a0] sm:$0xf]  ;;  %v5704_v63 = vld [vmem:[%s7986_s3 + $0x5ac] sm:$0xf0]  ;;  %v4570_v15 = vor.u32 %v5672_v8, %v4569_v7 }
 0x11b   : > { %v4698_v16 = vor.u32 %v5704_v63, %v4697_v62  ;;  %v4617_v7 = vld [vmem:[%s7986_s3 + $0x500] sm:$0xf]  ;;  %v5684_v8 = vld [vmem:[%s7986_s3 + $0x50c] sm:$0xf0]  ;;  %v5650_v62 = vld [vmem:[%s7986_s3 + $0x404] sm:$0xf] }
 0x11c   : > { %v4491_v63 = vld [vmem:[%s7986_s3 + $0x410] sm:$0xf0] }
 0x11d   : > { %1640 = vmatpush.bf16.msra.mxu2 %v4210_v17  ;;  %1654 = vmatpush.bf16.msra.mxu3 %v4338_v18  ;;  %v4553_v17 = vld [vmem:[%s7986_s3 + $0x480] sm:$0xf]  ;;  %v5668_v18 = vld [vmem:[%s7986_s3 + $0x48c] sm:$0xf0] }
 0x11e   : > { %1668 = vmatpush.bf16.msrb.mxu0 %v4214_v21  ;;  %1682 = vmatpush.bf16.msrb.mxu1 %v4342_v22  ;;  %v4681_v21 = vld [vmem:[%s7986_s3 + $0x580] sm:$0xf]  ;;  %v5700_v22 = vld [vmem:[%s7986_s3 + $0x58c] sm:$0xf0]  ;;  %v4554_v25 = vor.u32 %v5668_v18, %v4553_v17  ;;  %v5679_v17 = vld [vmem:[%s7986_s3 + $0x4ec] sm:$0xf] }
 0x11f   : > { %v4682_v26 = vor.u32 %v5700_v22, %v4681_v21  ;;  %v5711_v21 = vld [vmem:[%s7986_s3 + $0x5ec] sm:$0xf]  ;;  %v4739_v22 = vld [vmem:[%s7986_s3 + $0x5f8] sm:$0xf0] }
 0x121   : > { %1641 = vmatpush.bf16.msra.mxu2 %v4194_v28  ;;  %1655 = vmatpush.bf16.msra.mxu3 %v4322_v29  ;;  %v5664_v28 = vld [vmem:[%s7986_s3 + $0x46c] sm:$0xf0]  ;;  %v4558_v29 = vor.u32 %v5666_v23, %v4555_v24  ;;  %v4494_v23 = vor.u32 %v5650_v62, %v4491_v63  ;;  %v4622_v24 = vor.u32 %v5682_v9, %v4619_v10  ;;  %v5695_v62 = vld [vmem:[%s7986_s3 + $0x56c] sm:$0xf]  ;;  %v4675_v63 = vld [vmem:[%s7986_s3 + $0x578] sm:$0xf0] }
 0x122   : > { %1669 = vmatpush.bf16.msrb.mxu0 %v4198_v43  ;;  %1683 = vmatpush.bf16.msrb.mxu1 %v4326_v32  ;;  %v5662_v43 = vld [vmem:[%s7986_s3 + $0x464] sm:$0xf]  ;;  %v4539_v32 = vld [vmem:[%s7986_s3 + $0x470] sm:$0xf0]  ;;  %v4538_v35 = vor.u32 %v5664_v28, %v4537_v27  ;;  %v4742_v28 = vor.u32 %v5711_v21, %v4739_v22  ;;  %v5691_v21 = vld [vmem:[%s7986_s3 + $0x54c] sm:$0xf] }
 0x123   : > { %v4542_v41 = vor.u32 %v5662_v43, %v4539_v32  ;;  %v5707_v43 = vld [vmem:[%s7986_s3 + $0x5cc] sm:$0xf]  ;;  %v4723_v32 = vld [vmem:[%s7986_s3 + $0x5d8] sm:$0xf0] }
 0x124   : > { %v4659_v22 = vld [vmem:[%s7986_s3 + $0x558] sm:$0xf0] }
 0x125   : > { %1642 = vmatpush.bf16.msra.mxu2 %v4178_v46  ;;  %1656 = vmatpush.bf16.msra.mxu3 %v4306_v49  ;;  %v5692_v46 = vld [vmem:[%s7986_s3 + $0x54c] sm:$0xf0]  ;;  %v5658_v49 = vld [vmem:[%s7986_s3 + $0x444] sm:$0xf] }
 0x126   : > { %1670 = vmatpush.bf16.msrb.mxu0 %v4182_v53  ;;  %1684 = vmatpush.bf16.msrb.mxu1 %v4310_v54  ;;  %v4522_v53 = vor.u32 %v5660_v38, %v4521_v37  ;;  %v4650_v54 = vor.u32 %v5692_v46, %v4649_v45  ;;  %v4526_v57 = vor.u32 %v5658_v49, %v4523_v50  ;;  %v5671_v45 = vld [vmem:[%s7986_s3 + $0x4ac] sm:$0xf]  ;;  %v4579_v46 = vld [vmem:[%s7986_s3 + $0x4b8] sm:$0xf0] }
 0x127   : > { %v4598_v37 = vor.u32 %v5675_v31, %v4595_v42  ;;  %v4726_v38 = vor.u32 %v5707_v43, %v4723_v32  ;;  %v5703_v49 = vld [vmem:[%s7986_s3 + $0x5ac] sm:$0xf]  ;;  %v4707_v50 = vld [vmem:[%s7986_s3 + $0x5b8] sm:$0xf0] }
 0x128   : > { %1643 = vmatmul.bf16.vlgmr.msra.gmra.mxu2 %v6674_v47  ;;  %1657 = vmatmul.bf16.vlgmr.msra.gmra.mxu3 %v6676_v48  ;;  %v5687_v31 = vld [vmem:[%s7986_s3 + $0x52c] sm:$0xf]  ;;  %v4643_v42 = vld [vmem:[%s7986_s3 + $0x538] sm:$0xf0] }
 0x129   : > { %2076 = vmatpush.bf16.msrb.mxu2 %v4602_v55  ;;  %2090 = vmatpush.bf16.msrb.mxu3 %v4730_v56  ;;  %v4505_v55 = vld [vmem:[%s7986_s3 + $0x420] sm:$0xf]  ;;  %v5656_v56 = vld [vmem:[%s7986_s3 + $0x42c] sm:$0xf0] }
 0x12a   : > { %2104 = vmatpush.bf16.msra.mxu0 %v4606_v59  ;;  %2118 = vmatpush.bf16.msra.mxu1 %v4734_v60  ;;  %v4633_v59 = vld [vmem:[%s7986_s3 + $0x520] sm:$0xf]  ;;  %v5688_v60 = vld [vmem:[%s7986_s3 + $0x52c] sm:$0xf0]  ;;  %v4506_v4 = vor.u32 %v5656_v56, %v4505_v55  ;;  %v4582_v55 = vor.u32 %v5671_v45, %v4579_v46  ;;  %v4710_v56 = vor.u32 %v5703_v49, %v4707_v50  ;;  %v5683_v45 = vld [vmem:[%s7986_s3 + $0x50c] sm:$0xf] }
 0x12b   : > { %1671 = vmatmul.bf16.vlgmr.msrb.gmra.mxu0 %v6674_v47  ;;  %1685 = vmatmul.bf16.vlgmr.msrb.gmra.mxu1 %v6676_v48  ;;  %v4627_v46 = vld [vmem:[%s7986_s3 + $0x518] sm:$0xf0] }
 0x12d   : > { %2077 = vmatpush.bf16.msrb.mxu2 %v4586_v5  ;;  %2091 = vmatpush.bf16.msrb.mxu3 %v4714_v6  ;;  %v4634_v5 = vor.u32 %v5688_v60, %v4633_v59  ;;  %v5652_v6 = vld [vmem:[%s7986_s3 + $0x40c] sm:$0xf0]  ;;  %v5667_v59 = vld [vmem:[%s7986_s3 + $0x48c] sm:$0xf]  ;;  %v4563_v60 = vld [vmem:[%s7986_s3 + $0x498] sm:$0xf0] }
 0x12e   : > { %2105 = vmatpush.bf16.msra.mxu0 %v4590_v39  ;;  %2119 = vmatpush.bf16.msra.mxu1 %v4718_v40  ;;  %v4510_v39 = vor.u32 %v5654_v61, %v4507_v0  ;;  %v4638_v40 = vor.u32 %v5686_v1, %v4635_v2  ;;  %v4490_v18 = vor.u32 %v5652_v6, %v4489_v3  ;;  %v5699_v61 = vld [vmem:[%s7986_s3 + $0x58c] sm:$0xf]  ;;  %v4691_v0 = vld [vmem:[%s7986_s3 + $0x598] sm:$0xf0]  ;;  %v4545_v3 = vld [vmem:[%s7986_s3 + $0x468] sm:$0xf] }
 0x12f   : > { %v4694_v6 = vor.u32 %v5699_v61, %v4691_v0 }
 0x131   : > { %2078 = vmatpush.bf16.msrb.mxu2 %v4570_v15  ;;  %2092 = vmatpush.bf16.msrb.mxu3 %v4698_v16  ;;  %v4737_v15 = vld [vmem:[%s7986_s3 + $0x5e8] sm:$0xf]  ;;  %v5713_v16 = vld [vmem:[%s7986_s3 + $0x5f4] sm:$0xf0] }
 0x132   : > { %2106 = vmatpush.bf16.msra.mxu0 %v4574_v19  ;;  %2120 = vmatpush.bf16.msra.mxu1 %v4702_v20  ;;  %v4618_v19 = vor.u32 %v5684_v8, %v4617_v7  ;;  %v4611_v20 = vld [vmem:[%s7986_s3 + $0x4f8] sm:$0xf0]  ;;  %v4738_v12 = vor.u32 %v5713_v16, %v4737_v15  ;;  %v4673_v7 = vld [vmem:[%s7986_s3 + $0x568] sm:$0xf]  ;;  %v5697_v8 = vld [vmem:[%s7986_s3 + $0x574] sm:$0xf0]  ;;  %v4678_v16 = vor.u32 %v5695_v62, %v4675_v63 }
 0x133   : > { %v4614_v27 = vor.u32 %v5679_v17, %v4611_v20  ;;  %v4674_v10 = vor.u32 %v5697_v8, %v4673_v7  ;;  %v4657_v17 = vld [vmem:[%s7986_s3 + $0x548] sm:$0xf]  ;;  %v4531_v20 = vld [vmem:[%s7986_s3 + $0x458] sm:$0xf0] }
 0x135   : > { %2079 = vmatpush.bf16.msrb.mxu2 %v4554_v25  ;;  %2093 = vmatpush.bf16.msrb.mxu3 %v4682_v26  ;;  %v4593_v25 = vld [vmem:[%s7986_s3 + $0x4c8] sm:$0xf]  ;;  %v5677_v26 = vld [vmem:[%s7986_s3 + $0x4d4] sm:$0xf0] }
 0x136   : > { %2107 = vmatpush.bf16.msra.mxu0 %v4558_v29  ;;  %2121 = vmatpush.bf16.msra.mxu1 %v4686_v30  ;;  %v4721_v29 = vld [vmem:[%s7986_s3 + $0x5c8] sm:$0xf]  ;;  %v5709_v30 = vld [vmem:[%s7986_s3 + $0x5d4] sm:$0xf0]  ;;  %v4594_v33 = vor.u32 %v5677_v26, %v4593_v25  ;;  %v4662_v26 = vor.u32 %v5691_v21, %v4659_v22 }
 0x137   : > { %v4722_v34 = vor.u32 %v5709_v30, %v4721_v29  ;;  %v5655_v29 = vld [vmem:[%s7986_s3 + $0x42c] sm:$0xf]  ;;  %v4515_v30 = vld [vmem:[%s7986_s3 + $0x438] sm:$0xf0] }
 0x139   : > { %2080 = vmatpush.bf16.msrb.mxu2 %v4538_v35  ;;  %2094 = vmatpush.bf16.msrb.mxu3 %v4666_v36  ;;  %v4577_v35 = vld [vmem:[%s7986_s3 + $0x4a8] sm:$0xf]  ;;  %v5673_v36 = vld [vmem:[%s7986_s3 + $0x4b4] sm:$0xf0] }
 0x13a   : > { %2108 = vmatpush.bf16.msra.mxu0 %v4542_v41  ;;  %2122 = vmatpush.bf16.msra.mxu1 %v4670_v44  ;;  %v4705_v41 = vld [vmem:[%s7986_s3 + $0x5a8] sm:$0xf]  ;;  %v5705_v44 = vld [vmem:[%s7986_s3 + $0x5b4] sm:$0xf0]  ;;  %v4578_v51 = vor.u32 %v5673_v36, %v4577_v35  ;;  %v4518_v35 = vor.u32 %v5655_v29, %v4515_v30  ;;  %v4646_v36 = vor.u32 %v5687_v31, %v4643_v42 }
 0x13b   : > { %v4706_v52 = vor.u32 %v5705_v44, %v4705_v41  ;;  %v5651_v41 = vld [vmem:[%s7986_s3 + $0x40c] sm:$0xf]  ;;  %v4499_v44 = vld [vmem:[%s7986_s3 + $0x418] sm:$0xf0] }
 0x13c   : > { %v5729_v42 = vld [vmem:[%s7988_s5 + $0x78] sm:$0xff] }
 0x13d   : > { %2081 = vmatpush.bf16.msrb.mxu2 %v4522_v53  ;;  %2095 = vmatpush.bf16.msrb.mxu3 %v4650_v54  ;;  %v4561_v53 = vld [vmem:[%s7986_s3 + $0x488] sm:$0xf]  ;;  %v5669_v54 = vld [vmem:[%s7986_s3 + $0x494] sm:$0xf0] }
 0x13e   : > { %2109 = vmatpush.bf16.msra.mxu0 %v4526_v57  ;;  %2123 = vmatpush.bf16.msra.mxu1 %v4654_v58  ;;  %v4689_v57 = vld [vmem:[%s7986_s3 + $0x588] sm:$0xf]  ;;  %v5701_v58 = vld [vmem:[%s7986_s3 + $0x594] sm:$0xf0]  ;;  %v4562_v1 = vor.u32 %v5669_v54, %v4561_v53 }
 0x13f   : > { %v4690_v2 = vor.u32 %v5701_v58, %v4689_v57 }
 0x141   : > { %2082 = vmatpush.bf16.msrb.mxu2 %v4506_v4  ;;  %2096 = vmatpush.bf16.msrb.mxu3 %v4634_v5  ;;  %v5665_v4 = vld [vmem:[%s7986_s3 + $0x474] sm:$0xf0]  ;;  %v4566_v5 = vor.u32 %v5667_v59, %v4563_v60 }
 0x142   : > { %2110 = vmatpush.bf16.msra.mxu0 %v4510_v39  ;;  %2124 = vmatpush.bf16.msra.mxu1 %v4638_v40  ;;  %v5663_v39 = vld [vmem:[%s7986_s3 + $0x46c] sm:$0xf]  ;;  %v4547_v40 = vld [vmem:[%s7986_s3 + $0x478] sm:$0xf0]  ;;  %v4546_v9 = vor.u32 %v5665_v4, %v4545_v3 }
 0x143   : > { %v4550_v15 = vor.u32 %v5663_v39, %v4547_v40 }
 0x145   : > { %2083 = vmatpush.bf16.msrb.mxu2 %v4490_v18  ;;  %2097 = vmatpush.bf16.msrb.mxu3 %v4618_v19  ;;  %v5693_v18 = vld [vmem:[%s7986_s3 + $0x554] sm:$0xf0]  ;;  %v5659_v19 = vld [vmem:[%s7986_s3 + $0x44c] sm:$0xf] }
 0x146   : > { %2111 = vmatpush.bf16.msra.mxu0 %v4494_v23  ;;  %2125 = vmatpush.bf16.msra.mxu1 %v4622_v24  ;;  %v4530_v23 = vor.u32 %v5661_v14, %v4529_v13  ;;  %v4658_v24 = vor.u32 %v5693_v18, %v4657_v17  ;;  %v4534_v25 = vor.u32 %v5659_v19, %v4531_v20 }
 0x148   : > { %2084 = vmatmul.bf16.vlgmr.msrb.gmra.mxu2 %v6674_v47  ;;  %2098 = vmatmul.bf16.vlgmr.msrb.gmra.mxu3 %v6676_v48 }
 0x149   : > { %2132 = vmatpush.bf16.msra.mxu2 %v4610_v11  ;;  %2146 = vmatpush.bf16.msra.mxu3 %v4738_v12  ;;  %v4513_v11 = vld [vmem:[%s7986_s3 + $0x428] sm:$0xf]  ;;  %v5657_v12 = vld [vmem:[%s7986_s3 + $0x434] sm:$0xf0] }
 0x14a   : > { %2160 = vmatpush.bf16.msrb.mxu0 %v4614_v27  ;;  %2174 = vmatpush.bf16.msrb.mxu1 %v4742_v28  ;;  %v4641_v27 = vld [vmem:[%s7986_s3 + $0x528] sm:$0xf]  ;;  %v5689_v28 = vld [vmem:[%s7986_s3 + $0x534] sm:$0xf0]  ;;  %v4514_v43 = vor.u32 %v5657_v12, %v4513_v11 }
 0x14b   : > { %2112 = vmatmul.bf16.vlgmr.msra.gmra.mxu0 %v6674_v47  ;;  %2126 = vmatmul.bf16.vlgmr.msra.gmra.mxu1 %v6676_v48  ;;  %v4642_v32 = vor.u32 %v5689_v28, %v4641_v27 }
 0x14d   : > { %2133 = vmatpush.bf16.msra.mxu2 %v4594_v33  ;;  %2147 = vmatpush.bf16.msra.mxu3 %v4722_v34  ;;  %v4497_v33 = vld [vmem:[%s7986_s3 + $0x408] sm:$0xf]  ;;  %v5653_v34 = vld [vmem:[%s7986_s3 + $0x414] sm:$0xf0] }
 0x14e   : > { %2161 = vmatpush.bf16.msrb.mxu0 %v4598_v37  ;;  %2175 = vmatpush.bf16.msrb.mxu1 %v4726_v38  ;;  %v4625_v37 = vld [vmem:[%s7986_s3 + $0x508] sm:$0xf]  ;;  %v5685_v38 = vld [vmem:[%s7986_s3 + $0x514] sm:$0xf0]  ;;  %v4498_v49 = vor.u32 %v5653_v34, %v4497_v33  ;;  %v5728_v33 = vld [vmem:[%s7988_s5 + $0x70] sm:$0xff] }
 0x14f   : > { %v4626_v50 = vor.u32 %v5685_v38, %v4625_v37  ;;  %v5721_v37 = vld [vmem:[%s7988_s5 + $0x38] sm:$0xff] }
 0x150   : > { %v5737_v38 = vld [vmem:[%s7988_s5 + $0xb8] sm:$0xff] }
 0x151   : > { %2134 = vmatpush.bf16.msra.mxu2 %v4578_v51  ;;  %2148 = vmatpush.bf16.msra.mxu3 %v4706_v52  ;;  %v4502_v51 = vor.u32 %v5651_v41, %v4499_v44  ;;  %v4630_v52 = vor.u32 %v5683_v45, %v4627_v46  ;;  %v5727_v41 = vld [vmem:[%s7988_s5 + $0x68] sm:$0xff] }
 0x152   : > { %2162 = vmatpush.bf16.msrb.mxu0 %v4582_v55  ;;  %2176 = vmatpush.bf16.msrb.mxu1 %v4710_v56  ;;  %v5743_v46 = vld [vmem:[%s7988_s5 + $0xe8] sm:$0xff] }
 0x155   : > { %2135 = vmatpush.bf16.msra.mxu2 %v4562_v1  ;;  %2149 = vmatpush.bf16.msra.mxu3 %v4690_v2 }
 0x156   : > { %2163 = vmatpush.bf16.msrb.mxu0 %v4566_v5  ;;  %2177 = vmatpush.bf16.msrb.mxu1 %v4694_v6 }
 0x159   : > { %2136 = vmatpush.bf16.msra.mxu2 %v4546_v9  ;;  %2150 = vmatpush.bf16.msra.mxu3 %v4674_v10 }
 0x15a   : > { %2164 = vmatpush.bf16.msrb.mxu0 %v4550_v15  ;;  %2178 = vmatpush.bf16.msrb.mxu1 %v4678_v16 }
 0x15d   : > { %2137 = vmatpush.bf16.msra.mxu2 %v4530_v23  ;;  %2151 = vmatpush.bf16.msra.mxu3 %v4658_v24 }
 0x15e   : > { %2165 = vmatpush.bf16.msrb.mxu0 %v4534_v25  ;;  %2179 = vmatpush.bf16.msrb.mxu1 %v4662_v26 }
 0x161   : > { %2138 = vmatpush.bf16.msra.mxu2 %v4514_v43  ;;  %2152 = vmatpush.bf16.msra.mxu3 %v4642_v32  ;;  %v5745_v32 = vld [vmem:[%s7988_s5 + $0xf8] sm:$0xff] }
 0x162   : > { %2166 = vmatpush.bf16.msrb.mxu0 %v4518_v35  ;;  %2180 = vmatpush.bf16.msrb.mxu1 %v4646_v36  ;;  %v5744_v36 = vld [vmem:[%s7988_s5 + $0xf0] sm:$0xff] }
 0x165   : > { %2139 = vmatpush.bf16.msra.mxu2 %v4498_v49  ;;  %2153 = vmatpush.bf16.msra.mxu3 %v4626_v50  ;;  %v1119_v53 = vpop.f32.mrf.mxu0  ;;  %v1133_v54 = vpop.f32.mrf.mxu1  ;;  %v5720_v49 = vld [vmem:[%s7988_s5 + $0x30] sm:$0xff] }
 0x166   : > { %2167 = vmatpush.bf16.msrb.mxu0 %v4502_v51  ;;  %2181 = vmatpush.bf16.msrb.mxu1 %v4630_v52  ;;  %v7446_v55 = vadd.f32 %v1133_v54, %v1119_v53  ;;  %v5736_v50 = vld [vmem:[%s7988_s5 + $0xb0] sm:$0xff]  ;;  %v5726_v51 = vld [vmem:[%s7988_s5 + $0x60] sm:$0xff] }
 0x168   : > { %2140 = vmatmul.bf16.vlgmr.msra.gmra.mxu2 %v6674_v47  ;;  %2154 = vmatmul.bf16.vlgmr.msra.gmra.mxu3 %v6676_v48  ;;  %v2198_v0 = vrot.slane %v7446_v55, 7 }
 0x169   : > { %2168 = vmatmul.bf16.vlgmr.msrb.gmra.mxu0 %v6674_v47  ;;  %2182 = vmatmul.bf16.vlgmr.msrb.gmra.mxu1 %v6676_v48 }
 0x16a   : > { %v1091_v56 = vpop.f32.mrf.mxu2  ;;  %v1105_v57 = vpop.f32.mrf.mxu3  ;;  %2611 = vmatpush.bf16.msra.mxu1 %v5729_v42  ;;  %2489 = vmatpush.bf16.msrb.mxu3 %v5745_v32  ;;  %v5775_v42 = vld [vmem:[%s7988_s5 + $0x1e8] sm:$0xff] }
 0x16b   : > { %v7448_v58 = vadd.f32 %v1105_v57, %v1091_v56  ;;  %2598 = vmatpush.bf16.msra.mxu0 %v5721_v37  ;;  %2476 = vmatpush.bf16.msrb.mxu2 %v5737_v38  ;;  %v5742_v56 = vld [vmem:[%s7988_s5 + $0xe0] sm:$0xff]  ;;  %v5719_v57 = vld [vmem:[%s7988_s5 + $0x28] sm:$0xff] }
 0x16c   : > { %v5759_v32 = vld [vmem:[%s7988_s5 + $0x168] sm:$0xff]  ;;  %v5774_v37 = vld [vmem:[%s7988_s5 + $0x1e0] sm:$0xff] }
 0x16d   : > { %v1121_v59 = vpop.f32.mrf.mxu0  ;;  %v1135_v60 = vpop.f32.mrf.mxu1  ;;  %v2197_v4 = vrot.slane %v7448_v58, 7  ;;  %v5758_v38 = vld [vmem:[%s7988_s5 + $0x160] sm:$0xff] }
 0x16e   : > { %v1136_v61 = vadd.f32 %v1135_v60, %v1121_v59  ;;  %2612 = vmatpush.bf16.msra.mxu1 %v5728_v33  ;;  %2490 = vmatpush.bf16.msrb.mxu3 %v5744_v36  ;;  %v5735_v60 = vld [vmem:[%s7988_s5 + $0xa8] sm:$0xff]  ;;  %v5768_v33 = vld [vmem:[%s7988_s5 + $0x1b0] sm:$0xff] }
 0x16f   : > { %2599 = vmatpush.bf16.msra.mxu0 %v5720_v49  ;;  %2477 = vmatpush.bf16.msrb.mxu2 %v5736_v50  ;;  %v5752_v36 = vld [vmem:[%s7988_s5 + $0x130] sm:$0xff]  ;;  %v5773_v49 = vld [vmem:[%s7988_s5 + $0x1d8] sm:$0xff] }
 0x170   : > { %v2203_v1 = vrot.slane %v1136_v61, 7  ;;  %v5725_v61 = vld [vmem:[%s7988_s5 + $0x58] sm:$0xff] }
 0x172   : > { %v1093_v2 = vpop.f32.mrf.mxu2  ;;  %v1107_v3 = vpop.f32.mrf.mxu3  ;;  %v2204_v47 = vsel %vm2196_vm4, %v2198_v0, %v2203_v1  ;;  %2613 = vmatpush.bf16.msra.mxu1 %v5727_v41  ;;  %2491 = vmatpush.bf16.msrb.mxu3 %v5743_v46  ;;  %v5767_v41 = vld [vmem:[%s7988_s5 + $0x1a8] sm:$0xff] }
 0x173   : > { %v1108_v48 = vadd.f32 %v1107_v3, %v1093_v2  ;;  %2600 = vmatpush.bf16.msra.mxu0 %v5719_v57  ;;  %2478 = vmatpush.bf16.msrb.mxu2 %v5735_v60  ;;  %v5741_v3 = vld [vmem:[%s7988_s5 + $0xd8] sm:$0xff]  ;;  %v5751_v46 = vld [vmem:[%s7988_s5 + $0x128] sm:$0xff] }
 0x175   : > { %v2201_v5 = vrot.slane %v1108_v48, 7  ;;  %v1175_v6 = vpop.f32.mrf.mxu0  ;;  %v1189_v7 = vpop.f32.mrf.mxu1 }
 0x176   : > { %v7455_v8 = vadd.f32 %v1189_v7, %v1175_v6  ;;  %2614 = vmatpush.bf16.msra.mxu1 %v5726_v51  ;;  %2492 = vmatpush.bf16.msrb.mxu3 %v5742_v56  ;;  %v5724_v6 = vld [vmem:[%s7988_s5 + $0x50] sm:$0xff] }
 0x177   : > { %v2202_v39 = vsel %vm2196_vm4, %v2197_v4, %v2201_v5  ;;  %v5734_v5 = vld [vmem:[%s7988_s5 + $0xa0] sm:$0xff]  ;;  %v5772_v56 = vld [vmem:[%s7988_s5 + $0x1d0] sm:$0xff] }
 0x178   : > { %v2200_v14 = vrot.slane %v7455_v8, 7  ;;  %2479 = vmatpush.bf16.msrb.mxu2 %v5734_v5 }
 0x17a   : > { %v1147_v40 = vpop.f32.mrf.mxu2  ;;  %v1161_v62 = vpop.f32.mrf.mxu3  ;;  %2615 = vmatpush.bf16.msra.mxu1 %v5725_v61  ;;  %2493 = vmatpush.bf16.msrb.mxu3 %v5741_v3  ;;  %v5756_v61 = vld [vmem:[%s7988_s5 + $0x150] sm:$0xff]  ;;  %v5771_v3 = vld [vmem:[%s7988_s5 + $0x1c8] sm:$0xff] }
 0x17b   : > { %v7460_v63 = vadd.f32 %v1161_v62, %v1147_v40  ;;  %v5717_v40 = vld [vmem:[%s7988_s5 + $0x18] sm:$0xff] }
 0x17c   : > { %v5733_v62 = vld [vmem:[%s7988_s5 + $0x98] sm:$0xff] }
 0x17d   : > { %v1177_v9 = vpop.f32.mrf.mxu0  ;;  %v1191_v10 = vpop.f32.mrf.mxu1  ;;  %v2199_v20 = vrot.slane %v7460_v63, 7  ;;  %2480 = vmatpush.bf16.msrb.mxu2 %v5733_v62  ;;  %v5754_v62 = vld [vmem:[%s7988_s5 + $0x140] sm:$0xff] }
 0x17e   : > { %v1192_v13 = vadd.f32 %v1191_v10, %v1177_v9  ;;  %2616 = vmatpush.bf16.msra.mxu1 %v5724_v6  ;;  %v5723_v9 = vld [vmem:[%s7988_s5 + $0x48] sm:$0xff] }
 0x17f   : > { %v5739_v10 = vld [vmem:[%s7988_s5 + $0xc8] sm:$0xff] }
 0x180   : > { %v2207_v15 = vrot.slane %v1192_v13, 7  ;;  %v5716_v13 = vld [vmem:[%s7988_s5 + $0x10] sm:$0xff] }
 0x182   : > { %v1149_v16 = vpop.f32.mrf.mxu2  ;;  %v1163_v17 = vpop.f32.mrf.mxu3  ;;  %v2208_v18 = vsel %vm2196_vm4, %v2200_v14, %v2207_v15  ;;  %2617 = vmatpush.bf16.msra.mxu1 %v5723_v9  ;;  %v5732_v15 = vld [vmem:[%s7988_s5 + $0x90] sm:$0xff]  ;;  %v5763_v9 = vld [vmem:[%s7988_s5 + $0x188] sm:$0xff] }
 0x183   : > { %v1164_v19 = vadd.f32 %v1163_v17, %v1149_v16  ;;  %v5722_v16 = vld [vmem:[%s7988_s5 + $0x40] sm:$0xff]  ;;  %v5777_v17 = vld [vmem:[%s7988_s5 + $0x1f8] sm:$0xff]  ;;  %2481 = vmatpush.bf16.msrb.mxu2 %v5732_v15 }
 0x185   : > { %v2205_v21 = vrot.slane %v1164_v19, 7  ;;  %v5715_v19 = vld [vmem:[%s7988_s5 + $0x8] sm:$0xff] }
 0x186   : > { %2618 = vmatpush.bf16.msra.mxu1 %v5722_v16  ;;  %v5747_v16 = vld [vmem:[%s7988_s5 + $0x108] sm:$0xff] }
 0x187   : > { %v2206_v24 = vsel %vm2196_vm4, %v2199_v20, %v2205_v21  ;;  %v5761_v21 = vld [vmem:[%s7988_s5 + $0x178] sm:$0xff] }
 0x188   : > { %v7467_v22 = vpop.f32.mrf.mxu0  ;;  %v7469_v23 = vpop.f32.mrf.mxu1 }
 0x18a   : > { %2930 = vmatpush.bf16.msrb.mxu1 %v5777_v17 }
 0x18b   : > { %v7474_v11 = vpop.f32.mrf.mxu2  ;;  %v7476_v12 = vpop.f32.mrf.mxu3 }
 0x190   : > { %v1618_v25 = vpop.f32.mrf.mxu0  ;;  %v1632_v26 = vpop.f32.mrf.mxu1 }
 0x191   : > { %v1633_v27 = vadd.f32 %v1632_v26, %v1618_v25  ;;  %v5776_v25 = vld [vmem:[%s7988_s5 + $0x1f0] sm:$0xff]  ;;  %v5714_v26 = vld [vmem:[%s7988_s5] sm:$0xff] }
 0x192   : > { %2931 = vmatpush.bf16.msrb.mxu1 %v5776_v25  ;;  %v5746_v25 = vld [vmem:[%s7988_s5 + $0x100] sm:$0xff] }
 0x193   : > { %v7478_v28 = vadd.f32 %v2204_v47, %v1633_v27  ;;  %v1590_v29 = vpop.f32.mrf.mxu2  ;;  %v1604_v30 = vpop.f32.mrf.mxu3  ;;  %v5718_v47 = vld [vmem:[%s7988_s5 + $0x20] sm:$0xff]  ;;  %v5760_v27 = vld [vmem:[%s7988_s5 + $0x170] sm:$0xff] }
 0x194   : > { %v1605_v31 = vadd.f32 %v1604_v30, %v1590_v29  ;;  %2601 = vmatpush.bf16.msra.mxu0 %v5718_v47  ;;  %v5769_v29 = vld [vmem:[%s7988_s5 + $0x1b8] sm:$0xff]  ;;  %v5730_v30 = vld [vmem:[%s7988_s5 + $0x80] sm:$0xff]  ;;  %v5755_v47 = vld [vmem:[%s7988_s5 + $0x148] sm:$0xff] }
 0x196   : > { %v7483_v43 = vadd.f32 %v2202_v39, %v1605_v31  ;;  %v5740_v39 = vld [vmem:[%s7988_s5 + $0xd0] sm:$0xff]  ;;  %v5753_v31 = vld [vmem:[%s7988_s5 + $0x138] sm:$0xff]  ;;  %2932 = vmatpush.bf16.msrb.mxu1 %v5775_v42 }
 0x197   : > { %2494 = vmatpush.bf16.msrb.mxu3 %v5740_v39  ;;  %v5748_v39 = vld [vmem:[%s7988_s5 + $0x110] sm:$0xff] }
 0x198   : > { %2602 = vmatpush.bf16.msra.mxu0 %v5717_v40  ;;  %v5770_v40 = vld [vmem:[%s7988_s5 + $0x1c0] sm:$0xff] }
 0x19a   : > { %2933 = vmatpush.bf16.msrb.mxu1 %v5774_v37 }
 0x19b   : > { %2495 = vmatpush.bf16.msrb.mxu3 %v5739_v10 }
 0x19c   : > { %2603 = vmatpush.bf16.msra.mxu0 %v5716_v13 }
 0x19e   : > { %2934 = vmatpush.bf16.msrb.mxu1 %v5773_v49 }
 0x1a0   : > { %2604 = vmatpush.bf16.msra.mxu0 %v5715_v19 }
 0x1a2   : > { %2935 = vmatpush.bf16.msrb.mxu1 %v5772_v56 }
 0x1a4   : > { %2605 = vmatpush.bf16.msra.mxu0 %v5714_v26  ;;  %v1631_v26 = vadd.f32 %v7469_v23, %v7467_v22  ;;  %v2269_v22 = vld [vmem:[%s7987_s4] sm:$0xf] }
 0x1a6   : > { %2936 = vmatpush.bf16.msrb.mxu1 %v5771_v3 }
 0x1a8   : > { %v7491_v34 = vpop.f32.mrf.mxu0  ;;  %v7493_v35 = vpop.f32.mrf.mxu1  ;;  %2917 = vmatpush.bf16.msrb.mxu0 %v5769_v29 }
 0x1a9   : > { %v1687_v55 = vadd.f32 %v7493_v35, %v7491_v34 }
 0x1aa   : > { %2937 = vmatpush.bf16.msrb.mxu1 %v5770_v40 }
 0x1ab   : > { %v7507_v44 = vpop.f32.mrf.mxu2  ;;  %v7509_v45 = vpop.f32.mrf.mxu3 }
 0x1ac   : > { %2918 = vmatpush.bf16.msrb.mxu0 %v5768_v33  ;;  %v1659_v58 = vadd.f32 %v7509_v45, %v7507_v44  ;;  %v2219_v45 = vsel %vm2196_vm4, 0.0, %v2199_v20 }
 0x1b0   : > { %v1674_v52 = vpop.f32.mrf.mxu0  ;;  %v1688_v53 = vpop.f32.mrf.mxu1  ;;  %2919 = vmatpush.bf16.msrb.mxu0 %v5767_v41 }
 0x1b1   : > { %v1689_v54 = vadd.f32 %v1688_v53, %v1674_v52  ;;  %v5757_v52 = vld [vmem:[%s7988_s5 + $0x158] sm:$0xff]  ;;  %v5766_v53 = vld [vmem:[%s7988_s5 + $0x1a0] sm:$0xff] }
 0x1b3   : > { %v7529_v59 = vadd.f32 %v2208_v18, %v1689_v54  ;;  %v1646_v1 = vpop.f32.mrf.mxu2  ;;  %v1660_v2 = vpop.f32.mrf.mxu3  ;;  %v5738_v18 = vld [vmem:[%s7988_s5 + $0xc0] sm:$0xff] }
 0x1b4   : > { %v1661_v48 = vadd.f32 %v1660_v2, %v1646_v1  ;;  %2496 = vmatpush.bf16.msrb.mxu3 %v5738_v18  ;;  %2920 = vmatpush.bf16.msrb.mxu0 %v5766_v53  ;;  %v5750_v54 = vld [vmem:[%s7988_s5 + $0x120] sm:$0xff]  ;;  %v5765_v1 = vld [vmem:[%s7988_s5 + $0x198] sm:$0xff] }
 0x1b5   : > { %v5749_v2 = vld [vmem:[%s7988_s5 + $0x118] sm:$0xff] }
 0x1b6   : > { %v7549_v7 = vadd.f32 %v2206_v24, %v1661_v48  ;;  %v5731_v24 = vld [vmem:[%s7988_s5 + $0x88] sm:$0xff]  ;;  %v5764_v48 = vld [vmem:[%s7988_s5 + $0x190] sm:$0xff] }
 0x1b7   : > { %2482 = vmatpush.bf16.msrb.mxu2 %v5731_v24 }
 0x1b8   : > { %2770 = vmatpush.bf16.msra.mxu3 %v5761_v21  ;;  %2921 = vmatpush.bf16.msrb.mxu0 %v5765_v1  ;;  %v5762_v21 = vld [vmem:[%s7988_s5 + $0x180] sm:$0xff] }
 0x1bb   : > { %2483 = vmatpush.bf16.msrb.mxu2 %v5730_v30  ;;  %v2218_v30 = vsel %vm2196_vm4, 0.0, %v2198_v0  ;;  %v2217_v0 = vsel %vm2196_vm4, 0.0, %v2197_v4 }
 0x1bc   : > { %2771 = vmatpush.bf16.msra.mxu3 %v5760_v27  ;;  %2922 = vmatpush.bf16.msrb.mxu0 %v5764_v48  ;;  %v2222_v23 = vadd.f32 %v2218_v30, %v1631_v26 }
 0x1bf   : > { %2757 = vmatpush.bf16.msra.mxu2 %v5753_v31 }
 0x1c0   : > { %2772 = vmatpush.bf16.msra.mxu3 %v5759_v32  ;;  %2923 = vmatpush.bf16.msrb.mxu0 %v5763_v9  ;;  %v1603_v32 = vadd.f32 %v7476_v12, %v7474_v11 }
 0x1c2   : > { %v2221_v53 = vadd.f32 %v2217_v0, %v1603_v32 }
 0x1c3   : > { %2758 = vmatpush.bf16.msra.mxu2 %v5752_v36 }
 0x1c4   : > { %2773 = vmatpush.bf16.msra.mxu3 %v5758_v38  ;;  %2924 = vmatpush.bf16.msrb.mxu0 %v5762_v21 }
 0x1c7   : > { %2759 = vmatpush.bf16.msra.mxu2 %v5751_v46 }
 0x1c8   : > { %v2113_v50 = vpop.f32.mrf.mxu0  ;;  %v2127_v51 = vpop.f32.mrf.mxu1  ;;  %2774 = vmatpush.bf16.msra.mxu3 %v5757_v52  ;;  %v2220_v52 = vsel %vm2196_vm4, 0.0, %v2200_v14 }
 0x1c9   : > { %v2128_v17 = vadd.f32 %v2127_v51, %v2113_v50  ;;  %v2272_v50 = vperm.slane %v2269_v22, 1  ;;  %v2224_v34 = vadd.f32 %v2220_v52, %v1687_v55  ;;  %v5807_v52 = vld [vmem:[%s7988_s5 + $0x2e8] sm:$0xff] }
 0x1cb   : > { %v2085_v57 = vpop.f32.mrf.mxu2  ;;  %v2099_v60 = vpop.f32.mrf.mxu3  ;;  %2760 = vmatpush.bf16.msra.mxu2 %v5750_v54  ;;  %v2240_v27 = vrot.slane %v2128_v17, 1  ;;  %v2273_v17 = vperm.slane %v2269_v22, 2 }
 0x1cc   : > { %2775 = vmatpush.bf16.msra.mxu3 %v5756_v61  ;;  %v2100_v33 = vadd.f32 %v2099_v60, %v2085_v57 }
 0x1ce   : > { %v2237_v54 = vrot.slane %v2100_v33, 1 }
 0x1cf   : > { %2761 = vmatpush.bf16.msra.mxu2 %v5749_v2 }
 0x1d0   : > { %v2115_v5 = vpop.f32.mrf.mxu0  ;;  %v2129_v6 = vpop.f32.mrf.mxu1  ;;  %2776 = vmatpush.bf16.msra.mxu3 %v5755_v47 }
 0x1d1   : > { %v2130_v15 = vadd.f32 %v2129_v6, %v2115_v5 }
 0x1d3   : > { %2762 = vmatpush.bf16.msra.mxu2 %v5748_v39  ;;  %v2087_v10 = vpop.f32.mrf.mxu2  ;;  %v2101_v13 = vpop.f32.mrf.mxu3  ;;  %v2241_v24 = vrot.slane %v2130_v15, 1  ;;  %v2271_v39 = vperm.slane %v2269_v22, 0 }
 0x1d4   : > { %2777 = vmatpush.bf16.msra.mxu3 %v5754_v62  ;;  %v2102_v29 = vadd.f32 %v2101_v13, %v2087_v10  ;;  %v2223_v13 = vadd.f32 %v2219_v45, %v1659_v58  ;;  %v5806_v58 = vld [vmem:[%s7988_s5 + $0x2e0] sm:$0xff] }
 0x1d5   : > { %v2242_v36 = vsel %vm638_vm2, %v2240_v27, %v2241_v24  ;;  %v2258_v37 = vsel %vm638_vm2, %v2241_v24, 0.0 }
 0x1d6   : > { %v2238_v41 = vrot.slane %v2102_v29, 1  ;;  %v2262_v46 = vadd.f32 %v2242_v36, %v2222_v23  ;;  %v2266_v49 = vadd.f32 %v2258_v37, %v7478_v28  ;;  %v2274_v28 = vperm.slane %v2269_v22, 3  ;;  %v5809_v22 = vld [vmem:[%s7988_s5 + $0x2f8] sm:$0xff] }
 0x1d7   : > { %2763 = vmatpush.bf16.msra.mxu2 %v5747_v16 }
 0x1d8   : > { %v2239_v56 = vsel %vm638_vm2, %v2237_v54, %v2238_v41  ;;  %v2257_v57 = vsel %vm638_vm2, %v2238_v41, 0.0  ;;  %v2280_v61 = vadd.f32 %v2272_v50, %v2262_v46  ;;  %v2284_v1 = vadd.f32 %v2272_v50, %v2266_v49  ;;  %v5808_v41 = vld [vmem:[%s7988_s5 + $0x2f0] sm:$0xff]  ;;  %v5785_v50 = vld [vmem:[%s7988_s5 + $0x238] sm:$0xff]  ;;  %v5791_v54 = vld [vmem:[%s7988_s5 + $0x268] sm:$0xff] }
 0x1d9   : > { %v2261_v5 = vadd.f32 %v2239_v56, %v2221_v53  ;;  %v2265_v6 = vadd.f32 %v2257_v57, %v7483_v43  ;;  %v5792_v49 = vld [vmem:[%s7988_s5 + $0x270] sm:$0xff]  ;;  %v5783_v56 = vld [vmem:[%s7988_s5 + $0x228] sm:$0xff]  ;;  %v5805_v57 = vld [vmem:[%s7988_s5 + $0x2d8] sm:$0xff] }
 0x1da   : > { %v2288_v15 = vmax.f32 %v2280_v61, 0.0  ;;  %v2292_v16 = vmax.f32 %v2284_v1, 0.0  ;;  %v5800_v53 = vld [vmem:[%s7988_s5 + $0x2b0] sm:$0xff]  ;;  %v5789_v61 = vld [vmem:[%s7988_s5 + $0x258] sm:$0xff] }
 0x1db   : > { %2764 = vmatpush.bf16.msra.mxu2 %v5746_v25  ;;  %v2279_v21 = vadd.f32 %v2271_v39, %v2261_v5  ;;  %v2283_v20 = vadd.f32 %v2271_v39, %v2265_v6  ;;  %v5803_v5 = vld [vmem:[%s7988_s5 + $0x2c8] sm:$0xff]  ;;  %v5796_v6 = vld [vmem:[%s7988_s5 + $0x290] sm:$0xff] }
 0x1e6   : > { %v2169_v18 = vpop.f32.mrf.mxu0  ;;  %v2183_v19 = vpop.f32.mrf.mxu1 }
 0x1e7   : > { %v2184_v38 = vadd.f32 %v2183_v19, %v2169_v18 }
 0x1e9   : > { %v2246_v35 = vrot.slane %v2184_v38, 1 }
 0x1eb   : > { %v2141_v31 = vpop.f32.mrf.mxu2  ;;  %v2155_v42 = vpop.f32.mrf.mxu3 }
 0x1ec   : > { %v2156_v60 = vadd.f32 %v2155_v42, %v2141_v31  ;;  %v2287_v31 = vmax.f32 %v2279_v21, 0.0  ;;  %v2291_v42 = vmax.f32 %v2283_v20, 0.0  ;;  %v5794_v20 = vld [vmem:[%s7988_s5 + $0x280] sm:$0xff] }
 0x1ee   : > { %v2171_v11 = vpop.f32.mrf.mxu0  ;;  %v2185_v12 = vpop.f32.mrf.mxu1  ;;  %v2243_v40 = vrot.slane %v2156_v60, 1 }
 0x1ef   : > { %v2186_v51 = vadd.f32 %v2185_v12, %v2171_v11  ;;  %v5801_v12 = vld [vmem:[%s7988_s5 + $0x2b8] sm:$0xff] }
 0x1f1   : > { %v2247_v4 = vrot.slane %v2186_v51, 1 }
 0x1f3   : > { %v2248_v8 = vsel %vm638_vm2, %v2246_v35, %v2247_v4  ;;  %v2260_v14 = vsel %vm638_vm2, %v2247_v4, 0.0  ;;  %v2143_v2 = vpop.f32.mrf.mxu2  ;;  %v2157_v3 = vpop.f32.mrf.mxu3  ;;  %v5799_v35 = vld [vmem:[%s7988_s5 + $0x2a8] sm:$0xff]  ;;  %v5790_v4 = vld [vmem:[%s7988_s5 + $0x260] sm:$0xff] }
 0x1f4   : > { %v2264_v47 = vadd.f32 %v2248_v8, %v2224_v34  ;;  %v2268_v48 = vadd.f32 %v2260_v14, %v7529_v59  ;;  %v2158_v44 = vadd.f32 %v2157_v3, %v2143_v2  ;;  %v5784_v34 = vld [vmem:[%s7988_s5 + $0x230] sm:$0xff]  ;;  %v5782_v8 = vld [vmem:[%s7988_s5 + $0x220] sm:$0xff]  ;;  %v5797_v2 = vld [vmem:[%s7988_s5 + $0x298] sm:$0xff] }
 0x1f5   : > { %v5804_v14 = vld [vmem:[%s7988_s5 + $0x2d0] sm:$0xff] }
 0x1f6   : > { %v2282_v62 = vadd.f32 %v2274_v28, %v2264_v47  ;;  %v2286_v9 = vadd.f32 %v2274_v28, %v2268_v48  ;;  %v2244_v10 = vrot.slane %v2158_v44, 1  ;;  %v5798_v28 = vld [vmem:[%s7988_s5 + $0x2a0] sm:$0xff]  ;;  %v5788_v48 = vld [vmem:[%s7988_s5 + $0x250] sm:$0xff]  ;;  %v5781_v44 = vld [vmem:[%s7988_s5 + $0x218] sm:$0xff] }
 0x1f8   : > { %v2290_v18 = vmax.f32 %v2282_v62, 0.0  ;;  %v2294_v19 = vmax.f32 %v2286_v9, 0.0  ;;  %v2245_v59 = vsel %vm638_vm2, %v2243_v40, %v2244_v10  ;;  %v2259_v63 = vsel %vm638_vm2, %v2244_v10, 0.0  ;;  %v5787_v40 = vld [vmem:[%s7988_s5 + $0x248] sm:$0xff]  ;;  %v5780_v62 = vld [vmem:[%s7988_s5 + $0x210] sm:$0xff]  ;;  %v5802_v10 = vld [vmem:[%s7988_s5 + $0x2c0] sm:$0xff] }
 0x1f9   : > { %v2263_v24 = vadd.f32 %v2245_v59, %v2223_v13  ;;  %v2267_v43 = vadd.f32 %v2259_v63, %v7549_v7  ;;  %v5793_v7 = vld [vmem:[%s7988_s5 + $0x278] sm:$0xff]  ;;  %v5840_v63 = vld [vmem:[%s7988_s5 + $0x3f0] sm:$0xff] }
 0x1fa   : > { %v7721_v25 = vmax.f32 %v2292_v16, %v2294_v19  ;;  %v2296_v26 = vmax.f32 %v2288_v15, %v2290_v18  ;;  %v5841_v13 = vld [vmem:[%s7988_s5 + $0x3f8] sm:$0xff]  ;;  %v5795_v15 = vld [vmem:[%s7988_s5 + $0x288] sm:$0xff] }
 0x1fb   : > { %v2281_v27 = vadd.f32 %v2273_v17, %v2263_v24  ;;  %v2285_v29 = vadd.f32 %v2273_v17, %v2267_v43  ;;  %v5786_v17 = vld [vmem:[%s7988_s5 + $0x240] sm:$0xff]  ;;  %v5825_v18 = vld [vmem:[%s7988_s5 + $0x378] sm:$0xff]  ;;  %v5779_v19 = vld [vmem:[%s7988_s5 + $0x208] sm:$0xff] }
 0x1fc   : > { %v2302_v30 = vrot.slane %v2296_v26, 1  ;;  %v2947_v3 = vrot.slane %v7721_v25, 1  ;;  %v5824_v24 = vld [vmem:[%s7988_s5 + $0x370] sm:$0xff]  ;;  %v5833_v43 = vld [vmem:[%s7988_s5 + $0x3b8] sm:$0xff] }
 0x1fd   : > { %v2289_v32 = vmax.f32 %v2281_v27, 0.0  ;;  %v2293_v33 = vmax.f32 %v2285_v29, 0.0  ;;  %v5817_v27 = vld [vmem:[%s7988_s5 + $0x338] sm:$0xff]  ;;  %v5839_v29 = vld [vmem:[%s7988_s5 + $0x3e8] sm:$0xff] }
 0x1fe   : > { %v2306_v36 = vmax.f32 %v2296_v26, %v2302_v30  ;;  %v2951_v39 = vmax.f32 %v7721_v25, %v2947_v3  ;;  %v5778_v26 = vld [vmem:[%s7988_s5 + $0x200] sm:$0xff]  ;;  %v5823_v30 = vld [vmem:[%s7988_s5 + $0x368] sm:$0xff] }
 0x1ff   : > { %v7723_v37 = vmax.f32 %v2291_v42, %v2293_v33  ;;  %v2295_v23 = vmax.f32 %v2287_v31, %v2289_v32  ;;  %v5832_v31 = vld [vmem:[%s7988_s5 + $0x3b0] sm:$0xff]  ;;  %v5838_v33 = vld [vmem:[%s7988_s5 + $0x3e0] sm:$0xff] }
 0x200   : > { %v2308_v55 = vpack.c.bf16 %v2306_v36, %v2306_v36  ;;  %v7815_v16 = vpack.c.bf16 %v2951_v39, %v2951_v39  ;;  %v5816_v32 = vld [vmem:[%s7988_s5 + $0x330] sm:$0xff]  ;;  %v5822_v36 = vld [vmem:[%s7988_s5 + $0x360] sm:$0xff] }
 0x201   : > { %v2301_v38 = vrot.slane %v2295_v23, 1  ;;  %v2946_v9 = vrot.slane %v7723_v37, 1 }
 0x202   : > { %2619 = vmatmul.bf16.vlgmr.msra.gmra.mxu1 %v2308_v55  ;;  %v2377_v0 = vrot.slane %v2308_v55, 1  ;;  %v2818_v60 = vrot.slane %v2308_v55, 3  ;;  %v2658_v1 = vrot.slane %v2308_v55, 2  ;;  %v3146_v21 = vrot.slane %v7815_v16, 1  ;;  %v5821_v55 = vld [vmem:[%s7988_s5 + $0x358] sm:$0xff] }
 0x203   : > { %3258 = vmatpush.bf16.msra.mxu1 %v5809_v22  ;;  %v2305_v11 = vmax.f32 %v2295_v23, %v2301_v38  ;;  %v2950_v59 = vmax.f32 %v7723_v37, %v2946_v9  ;;  %v5831_v37 = vld [vmem:[%s7988_s5 + $0x3a8] sm:$0xff]  ;;  %v5837_v23 = vld [vmem:[%s7988_s5 + $0x3d8] sm:$0xff]  ;;  %v5814_v38 = vld [vmem:[%s7988_s5 + $0x320] sm:$0xff] }
 0x204   : > { %2497 = vmatmul.bf16.vlgmr.msrb.gmra.mxu3 %v2377_v0  ;;  %v5815_v22 = vld [vmem:[%s7988_s5 + $0x328] sm:$0xff]  ;;  %v5836_v0 = vld [vmem:[%s7988_s5 + $0x3d0] sm:$0xff] }
 0x205   : > { %3096 = vmatpush.bf16.msrb.mxu3 %v5793_v7  ;;  %v2307_v46 = vpack.c.bf16 %v2305_v11, %v2305_v11  ;;  %v7840_v25 = vpack.c.bf16 %v2950_v59, %v2950_v59  ;;  %v5830_v7 = vld [vmem:[%s7988_s5 + $0x3a0] sm:$0xff]  ;;  %v5829_v11 = vld [vmem:[%s7988_s5 + $0x398] sm:$0xff]  ;;  %v5843_v59 = vld [vmem:[%s7990_s7 + $0x8] sm:$0xff] }
 0x207   : > { %3259 = vmatpush.bf16.msra.mxu1 %v5808_v41  ;;  %2606 = vmatmul.bf16.vlgmr.msra.gmra.mxu0 %v2307_v46  ;;  %v2376_v51 = vrot.slane %v2307_v46, 1  ;;  %v2817_v47 = vrot.slane %v2307_v46, 3  ;;  %v2657_v45 = vrot.slane %v2307_v46, 2  ;;  %v3145_v42 = vrot.slane %v7840_v25, 1  ;;  %v5820_v41 = vld [vmem:[%s7988_s5 + $0x350] sm:$0xff]  ;;  %v5835_v46 = vld [vmem:[%s7988_s5 + $0x3c8] sm:$0xff] }
 0x208   : > { %3245 = vmatpush.bf16.msra.mxu0 %v5801_v12  ;;  %v5813_v12 = vld [vmem:[%s7988_s5 + $0x318] sm:$0xff] }
 0x209   : > { %3097 = vmatpush.bf16.msrb.mxu3 %v5792_v49  ;;  %2484 = vmatmul.bf16.vlgmr.msrb.gmra.mxu2 %v2376_v51  ;;  %v5819_v49 = vld [vmem:[%s7988_s5 + $0x348] sm:$0xff]  ;;  %v5812_v51 = vld [vmem:[%s7988_s5 + $0x310] sm:$0xff] }
 0x20a   : > { %3083 = vmatpush.bf16.msrb.mxu2 %v5785_v50  ;;  %v5828_v50 = vld [vmem:[%s7988_s5 + $0x390] sm:$0xff] }
 0x20b   : > { %3260 = vmatpush.bf16.msra.mxu1 %v5807_v52  ;;  %v5834_v52 = vld [vmem:[%s7988_s5 + $0x3c0] sm:$0xff] }
 0x20c   : > { %3246 = vmatpush.bf16.msra.mxu0 %v5800_v53  ;;  %v5818_v53 = vld [vmem:[%s7988_s5 + $0x340] sm:$0xff] }
 0x20d   : > { %3098 = vmatpush.bf16.msrb.mxu3 %v5791_v54  ;;  %v5827_v54 = vld [vmem:[%s7988_s5 + $0x388] sm:$0xff] }
 0x20e   : > { %3084 = vmatpush.bf16.msrb.mxu2 %v5784_v34  ;;  %v5811_v34 = vld [vmem:[%s7988_s5 + $0x308] sm:$0xff] }
 0x20f   : > { %3261 = vmatpush.bf16.msra.mxu1 %v5806_v58  ;;  %v3466_v58 = vrot.slane %v7815_v16, 3 }
 0x210   : > { %3247 = vmatpush.bf16.msra.mxu0 %v5799_v35  ;;  %v5826_v35 = vld [vmem:[%s7988_s5 + $0x380] sm:$0xff] }
 0x211   : > { %3099 = vmatpush.bf16.msrb.mxu3 %v5790_v4  ;;  %v3306_v4 = vrot.slane %v7815_v16, 2 }
 0x212   : > { %2938 = vmatmul.bf16.vlgmr.msrb.gmra.mxu1 %v2818_v60  ;;  %3085 = vmatpush.bf16.msrb.mxu2 %v5783_v56  ;;  %v5810_v56 = vld [vmem:[%s7988_s5 + $0x300] sm:$0xff]  ;;  %v3305_v60 = vrot.slane %v7840_v25, 2 }
 0x213   : > { %3262 = vmatpush.bf16.msra.mxu1 %v5805_v57  ;;  %v3465_v57 = vrot.slane %v7840_v25, 3 }
 0x214   : > { %2778 = vmatmul.bf16.vlgmr.msra.gmra.mxu3 %v2658_v1  ;;  %3248 = vmatpush.bf16.msra.mxu0 %v5798_v28 }
 0x215   : > { %3100 = vmatpush.bf16.msrb.mxu3 %v5789_v61 }
 0x216   : > { %3086 = vmatpush.bf16.msrb.mxu2 %v5782_v8 }
 0x217   : > { %3263 = vmatpush.bf16.msra.mxu1 %v5804_v14  ;;  %2925 = vmatmul.bf16.vlgmr.msrb.gmra.mxu0 %v2817_v47 }
 0x218   : > { %3249 = vmatpush.bf16.msra.mxu0 %v5797_v2 }
 0x219   : > { %3101 = vmatpush.bf16.msrb.mxu3 %v5788_v48  ;;  %2765 = vmatmul.bf16.vlgmr.msra.gmra.mxu2 %v2657_v45 }
 0x21a   : > { %3087 = vmatpush.bf16.msrb.mxu2 %v5781_v44 }
 0x21b   : > { %3264 = vmatpush.bf16.msra.mxu1 %v5803_v5 }
 0x21c   : > { %3250 = vmatpush.bf16.msra.mxu0 %v5796_v6 }
 0x21d   : > { %3102 = vmatpush.bf16.msrb.mxu3 %v5787_v40 }
 0x21e   : > { %3088 = vmatpush.bf16.msrb.mxu2 %v5780_v62 }
 0x21f   : > { %3265 = vmatpush.bf16.msra.mxu1 %v5802_v10  ;;  %v5845_v10 = vld [vmem:[%s7990_s7 + $0x18] sm:$0xff] }
 0x220   : > { %3251 = vmatpush.bf16.msra.mxu0 %v5795_v15 }
 0x221   : > { %3103 = vmatpush.bf16.msrb.mxu3 %v5786_v17  ;;  %v5844_v17 = vld [vmem:[%s7990_s7 + $0x10] sm:$0xff] }
 0x222   : > { %3089 = vmatpush.bf16.msrb.mxu2 %v5779_v19  ;;  %3266 = vmatmul.bf16.vlgmr.msra.gmra.mxu1 %v3146_v21  ;;  %v5842_v21 = vld [vmem:[%s7990_s7] sm:$0xff] }
 0x223   : > { %3578 = vmatpush.bf16.msrb.mxu1 %v5841_v13 }
 0x224   : > { %3104 = vmatmul.bf16.vlgmr.msrb.gmra.mxu3 %v7815_v16  ;;  %3252 = vmatpush.bf16.msra.mxu0 %v5794_v20 }
 0x225   : > { %3418 = vmatpush.bf16.msra.mxu3 %v5825_v18 }
 0x226   : > { %3090 = vmatpush.bf16.msrb.mxu2 %v5778_v26 }
 0x227   : > { %3579 = vmatpush.bf16.msrb.mxu1 %v5840_v63  ;;  %3253 = vmatmul.bf16.vlgmr.msra.gmra.mxu0 %v3145_v42 }
 0x228   : > { %3565 = vmatpush.bf16.msrb.mxu0 %v5833_v43 }
 0x229   : > { %3419 = vmatpush.bf16.msra.mxu3 %v5824_v24  ;;  %3091 = vmatmul.bf16.vlgmr.msrb.gmra.mxu2 %v7840_v25 }
 0x22a   : > { %3405 = vmatpush.bf16.msra.mxu2 %v5817_v27 }
 0x22b   : > { %3580 = vmatpush.bf16.msrb.mxu1 %v5839_v29 }
 0x22c   : > { %3566 = vmatpush.bf16.msrb.mxu0 %v5832_v31 }
 0x22d   : > { %3420 = vmatpush.bf16.msra.mxu3 %v5823_v30 }
 0x22e   : > { %3406 = vmatpush.bf16.msra.mxu2 %v5816_v32 }
 0x22f   : > { %3581 = vmatpush.bf16.msrb.mxu1 %v5838_v33 }
 0x230   : > { %3567 = vmatpush.bf16.msrb.mxu0 %v5831_v37 }
 0x231   : > { %3421 = vmatpush.bf16.msra.mxu3 %v5822_v36 }
 0x232   : > { %3407 = vmatpush.bf16.msra.mxu2 %v5815_v22 }
 0x233   : > { %3582 = vmatpush.bf16.msrb.mxu1 %v5837_v23 }
 0x234   : > { %3568 = vmatpush.bf16.msrb.mxu0 %v5830_v7 }
 0x235   : > { %3422 = vmatpush.bf16.msra.mxu3 %v5821_v55 }
 0x236   : > { %3408 = vmatpush.bf16.msra.mxu2 %v5814_v38 }
 0x237   : > { %3583 = vmatpush.bf16.msrb.mxu1 %v5836_v0 }
 0x238   : > { %3569 = vmatpush.bf16.msrb.mxu0 %v5829_v11 }
 0x239   : > { %3423 = vmatpush.bf16.msra.mxu3 %v5820_v41 }
 0x23a   : > { %3409 = vmatpush.bf16.msra.mxu2 %v5813_v12  ;;  %v3592_v12 = vld [vmem:[%s7989_s6] sm:$0x1] }
 0x23b   : > { %3584 = vmatpush.bf16.msrb.mxu1 %v5835_v46 }
 0x23c   : > { %3570 = vmatpush.bf16.msrb.mxu0 %v5828_v50 }
 0x23d   : > { %3424 = vmatpush.bf16.msra.mxu3 %v5819_v49 }
 0x23e   : > { %3410 = vmatpush.bf16.msra.mxu2 %v5812_v51 }
 0x23f   : > { %3585 = vmatpush.bf16.msrb.mxu1 %v5834_v52 }
 0x240   : > { %3571 = vmatpush.bf16.msrb.mxu0 %v5827_v54 }
 0x241   : > { %3425 = vmatpush.bf16.msra.mxu3 %v5818_v53  ;;  %v3604_v53 = vld [vmem:[%s7991_s8] sm:$0x1] }
 0x242   : > { %3586 = vmatmul.bf16.vlgmr.msrb.gmra.mxu1 %v3466_v58  ;;  %3411 = vmatpush.bf16.msra.mxu2 %v5811_v34 }
 0x244   : > { %3426 = vmatmul.bf16.vlgmr.msra.gmra.mxu3 %v3306_v4  ;;  %3572 = vmatpush.bf16.msrb.mxu0 %v5826_v35 }
 0x246   : > { %3412 = vmatpush.bf16.msra.mxu2 %v5810_v56 }
 0x247   : > { %3573 = vmatmul.bf16.vlgmr.msrb.gmra.mxu0 %v3465_v57 }
 0x249   : > { %3413 = vmatmul.bf16.vlgmr.msra.gmra.mxu2 %v3305_v60 }
 0x24a   : > { %3637 = vmatpush.bf16.msrb.mxu2 %v5845_v10 }
 0x24e   : > { %3638 = vmatpush.bf16.msrb.mxu2 %v5844_v17 }
 0x252   : > { %3639 = vmatpush.bf16.msrb.mxu2 %v5843_v59 }
 0x256   : > { %3640 = vmatpush.bf16.msrb.mxu2 %v5842_v21 }
 0x27f   : > { %v2620_v28 = vpop.f32.mrf.mxu1 }
 0x284   : > { %v2607_v61 = vpop.f32.mrf.mxu0 }
 0x287   : > { %v2498_v1 = vpop.f32.mrf.mxu3  ;;  %v2622_v8 = vpop.f32.mrf.mxu1 }
 0x28c   : > { %v2485_v14 = vpop.f32.mrf.mxu2  ;;  %v2609_v2 = vpop.f32.mrf.mxu0 }
 0x28d   : > { %v2499_v24 = vadd.f32 %v2498_v1, %v2485_v14 }
 0x28f   : > { %v2500_v3 = vpop.f32.mrf.mxu3  ;;  %v2939_v47 = vpop.f32.mrf.mxu1  ;;  %v2608_v43 = vadd.f32 %v2607_v61, %v2499_v24 }
 0x291   : > { %v2621_v27 = vadd.f32 %v2620_v28, %v2608_v43 }
 0x294   : > { %v2487_v48 = vpop.f32.mrf.mxu2  ;;  %v2926_v44 = vpop.f32.mrf.mxu0 }
 0x295   : > { %v2940_v31 = vadd.f32 %v2939_v47, %v2926_v44 }
 0x297   : > { %v2779_v45 = vpop.f32.mrf.mxu3  ;;  %v2941_v5 = vpop.f32.mrf.mxu1 }
 0x29c   : > { %v2766_v6 = vpop.f32.mrf.mxu2  ;;  %v2928_v39 = vpop.f32.mrf.mxu0 }
 0x29d   : > { %v2780_v26 = vadd.f32 %v2779_v45, %v2766_v6 }
 0x29f   : > { %v2781_v40 = vpop.f32.mrf.mxu3  ;;  %v3267_v62 = vpop.f32.mrf.mxu1  ;;  %v2783_v29 = vadd.f32 %v2780_v26, %v2621_v27 }
 0x2a1   : > { %v2943_v36 = vadd.f32 %v2940_v31, %v2783_v29 }
 0x2a4   : > { %v2768_v9 = vpop.f32.mrf.mxu2  ;;  %v3254_v13 = vpop.f32.mrf.mxu0 }
 0x2a5   : > { %v3268_v22 = vadd.f32 %v3267_v62, %v3254_v13 }
 0x2a7   : > { %v3105_v15 = vpop.f32.mrf.mxu3  ;;  %v3269_v16 = vpop.f32.mrf.mxu1 }
 0x2ac   : > { %v3092_v18 = vpop.f32.mrf.mxu2  ;;  %v3256_v19 = vpop.f32.mrf.mxu0 }
 0x2ad   : > { %v3106_v42 = vadd.f32 %v3105_v15, %v3092_v18 }
 0x2af   : > { %v3107_v63 = vpop.f32.mrf.mxu3  ;;  %v3109_v37 = vadd.f32 %v3106_v42, %v2943_v36 }
 0x2b1   : > { %v3271_v7 = vadd.f32 %v3268_v22, %v3109_v37 }
 0x2b4   : > { %v3094_v20 = vpop.f32.mrf.mxu2 }
 0x2bf   : > { %v3587_v25 = vpop.f32.mrf.mxu1 }
 0x2c4   : > { %v3574_v30 = vpop.f32.mrf.mxu0 }
 0x2c5   : > { %v3588_v41 = vadd.f32 %v3587_v25, %v3574_v30 }
 0x2c7   : > { %v3427_v32 = vpop.f32.mrf.mxu3  ;;  %v3589_v33 = vpop.f32.mrf.mxu1 }
 0x2cc   : > { %v3414_v23 = vpop.f32.mrf.mxu2  ;;  %v3576_v55 = vpop.f32.mrf.mxu0 }
 0x2cd   : > { %v3428_v38 = vadd.f32 %v3427_v32, %v3414_v23 }
 0x2cf   : > { %v3429_v0 = vpop.f32.mrf.mxu3  ;;  %v3431_v11 = vadd.f32 %v3428_v38, %v3271_v7 }
 0x2d1   : > { %v3591_v46 = vadd.f32 %v3588_v41, %v3431_v11 }
 0x2d3   : > { %v3593_v49 = vadd.f32 %v3592_v12, %v3591_v46 }
 0x2d4   : > { %v3416_v50 = vpop.f32.mrf.mxu2 }
 0x2d5   : > { %v3594_v51 = vmax.f32 %v3593_v49, 0.0 }
 0x2d7   : > { %v3595_v52 = vpack.c.bf16 %v3594_v51, %v3594_v51 }
 0x2d9   : > { %5495 = vmatmul.msk.bf16.vlgmr.msrb.gmra.mxu2 %vm3629_vm5, %v3595_v52 }
 0x35c   : > { %v3642_v54 = vpop.f32.mrf.mxu2 }
 0x35d   : > { %v3643_v34 = vadd.f32 %v3642_v54, %v3604_v53 }
 0x35f   : > { %3647 = vst.msk [vmem:[%s324_s22] sm:$0x1] %vm3646_vm6, %v3643_v34 }
 0x360   : > { %5913 = shalt.err (!%p5910_p3)
}
 0x361   : > { %5847 = dma.vmem_to_hbm [thread:$0]  (%p6038_p5), %s3660_s18, 16, %s3662_s24, %s3649_s17  }
 0x364   : > { %v3644_v58 = vpop.f32.mrf.mxu2 }
 0x365 PF: > { %p5853_p4 = scmp.ge.s32.totalorder %s5948_s12, 2  ;;  %s3673_s29 = sand.u32 1, %s5936_s30  }
 0x366   : > { %s3674_s16 = scalar_lea.sflag [#allocation3], %s3673_s29 }
 0x367   : > { %p5850_p7 = pnand %p5853_p4, %p6042_p6 }
 0x369   : > { %p5851_p8 = pneg %p5850_p7 }
 0x36b   : > { %5931 = dma.done.wait (%p5851_p8), %s3674_s16, 16  }
 0x36c   : > { %5933 = vsyncadd (%p5851_p8), %s3674_s16, 4294967280  ;;  %s7996_s21 = sld [smem:[#allocation5_spill]]  ;;  %p19_p9 = scmp.ge.s32.totalorder %s6025_s15, 4  }
 0x36d   : > { %s7997_s30 = smov %s5940_s10  ;;  %s7998_s10 = smov %s5944_s11 }
 0x36e   : > { %s8000_s12 = smov %s6025_s15  ;;  %21 = sbr.rel (!%p19_p9) target bundleno = 3 (0x3), region = 102 }
 0x372   : > { %s7999_s11 = smov %s7996_s21 }
 0x373   :  { %3679 = vsyncpa [#allocation3], 1 }
 0x374   :  { %3681 = vsyncpa [#allocation3 + $0x1], 1 }

</bundles_post_ra>
